<compile_context>
chip_gen: v7x
topology: tpu7x:2x2x1
jax: 0.10.0
libtpu: 0.0.40
codegen_flags: <defaults>
</compile_context>

<pallas_src>
import functools
import math

import jax
import jax.numpy as jnp
from jax import lax
from jax.experimental import pallas as pl
from jax.experimental.pallas import tpu as pltpu

_LN_EPS = 1e-5
_NEG_INF = -1e9  # CLIP's causal mask uses -inf above the diagonal


def _layer_norm(x, w, b):
    mu = jnp.mean(x, axis=-1, keepdims=True)
    var = jnp.mean(jnp.square(x - mu), axis=-1, keepdims=True)
    return (x - mu) * lax.rsqrt(var + _LN_EPS) * w + b


def _dense(x, w, b):
    # x: (TB, S, Din), w: (Din, Dout), b: (1, Dout)
    tb, s, din = x.shape
    y = jnp.dot(x.reshape(tb * s, din), w, preferred_element_type=jnp.float32)
    return y.reshape(tb, s, w.shape[-1]) + b


def _text_encoder_kernel(eot_ref,                       # scalar-prefetch: (B,) int32
                         prompts_ref, pos_ref,
                         ln1_w_ref, ln1_b_ref, wqkv_ref, bqkv_ref,
                         wout_ref, bout_ref, ln2_w_ref, ln2_b_ref,
                         wfc_ref, bfc_ref, wproj_ref, bproj_ref,
                         lnf_w_ref, lnf_b_ref, proj_ref,
                         out_ref, *, n_heads: int):
    tb, s, d = prompts_ref.shape
    n_layers = ln1_w_ref.shape[0]
    hd = d // n_heads
    scale = 1.0 / math.sqrt(hd)

    # x = prompts + positional_embedding
    x = prompts_ref[...].astype(jnp.float32) + pos_ref[...].astype(jnp.float32)

    # CLIP build_attention_mask: 0 on/below diagonal, -inf above (causal).
    qi = lax.broadcasted_iota(jnp.int32, (s, s), 0)
    ki = lax.broadcasted_iota(jnp.int32, (s, s), 1)
    mask = jnp.where(ki <= qi, 0.0, _NEG_INF).astype(jnp.float32)

    for l in range(n_layers):
        # ---- multi-head self-attention block ----
        h = _layer_norm(x, ln1_w_ref[l], ln1_b_ref[l])
        qkv = _dense(h, wqkv_ref[l], bqkv_ref[l])           # (tb, s, 3d)
        q = qkv[:, :, 0 * d:1 * d]
        k = qkv[:, :, 1 * d:2 * d]
        v = qkv[:, :, 2 * d:3 * d]
        heads = []
        for hh in range(n_heads):
            sl = slice(hh * hd, (hh + 1) * hd)
            qh, kh, vh = q[:, :, sl], k[:, :, sl], v[:, :, sl]
            sc = jnp.einsum('bqd,bkd->bqk', qh, kh,
                            preferred_element_type=jnp.float32) * scale
            sc = sc + mask[None, :, :]
            sc = sc - jnp.max(sc, axis=-1, keepdims=True)
            p = jnp.exp(sc)
            p = p / jnp.sum(p, axis=-1, keepdims=True)
            heads.append(jnp.einsum('bqk,bkd->bqd', p, vh,
                                    preferred_element_type=jnp.float32))
        attn = jnp.concatenate(heads, axis=-1)              # (tb, s, d)
        x = x + _dense(attn, wout_ref[l], bout_ref[l])

        # ---- MLP block: Linear -> QuickGELU -> Linear ----
        h = _layer_norm(x, ln2_w_ref[l], ln2_b_ref[l])
        g = _dense(h, wfc_ref[l], bfc_ref[l])               # (tb, s, 4d)
        g = g * jax.nn.sigmoid(1.702 * g)                   # QuickGELU
        x = x + _dense(g, wproj_ref[l], bproj_ref[l])

    # final LayerNorm
    x = _layer_norm(x, lnf_w_ref[...], lnf_b_ref[...])

    # gather the EOT token of each sample (argmax position, scalar-prefetched)
    base = pl.program_id(0) * tb
    sel_rows = []
    for j in range(tb):
        e = eot_ref[base + j]
        sel_rows.append(
            (lax.broadcasted_iota(jnp.int32, (1, s), 1) == e).astype(jnp.float32))
    sel = jnp.concatenate(sel_rows, axis=0)                 # (tb, s) one-hot
    pooled = jnp.sum(sel[:, :, None] * x, axis=1)           # (tb, d)

    out = jnp.dot(pooled, proj_ref[...], preferred_element_type=jnp.float32)
    out_ref[...] = out.astype(out_ref.dtype)                # single full-tile store


def text_encoder_forward(prompts, tokenized_prompts, params, *, n_heads):
    """Pallas equivalent of TextEncoder.forward.

    prompts           : (B, S, D) float  — assembled prompt embeddings
    tokenized_prompts : (B, S)    int    — EOT position = argmax along S
    params            : dict of stacked per-layer weights (see __main__)
    """
    B, S, D = prompts.shape
    P = params["text_projection"].shape[-1]
    dtype = prompts.dtype

    # Batch several samples per grid step (perf review item #1).
    if B <= 8:
        tb = B
    else:
        assert B % 8 == 0, "batch must be a multiple of 8 when B > 8"
        tb = 8
    num_tiles = B // tb

    eot = jnp.argmax(tokenized_prompts, axis=-1).astype(jnp.int32)

    full2 = lambda i, eot_ref: (0, 0)
    full3 = lambda i, eot_ref: (0, 0, 0)

    in_specs = [
        pl.BlockSpec((tb, S, D), lambda i, eot_ref: (i, 0, 0)),      # prompts tile
        pl.BlockSpec((S, D), full2),                                 # positional emb
        pl.BlockSpec(params["ln1_w"].shape, full3),
        pl.BlockSpec(params["ln1_b"].shape, full3),
        pl.BlockSpec(params["w_qkv"].shape, full3),
        pl.BlockSpec(params["b_qkv"].shape, full3),
        pl.BlockSpec(params["w_out"].shape, full3),
        pl.BlockSpec(params["b_out"].shape, full3),
        pl.BlockSpec(params["ln2_w"].shape, full3),
        pl.BlockSpec(params["ln2_b"].shape, full3),
        pl.BlockSpec(params["w_fc"].shape, full3),
        pl.BlockSpec(params["b_fc"].shape, full3),
        pl.BlockSpec(params["w_proj"].shape, full3),
        pl.BlockSpec(params["b_proj"].shape, full3),
        pl.BlockSpec(params["lnf_w"].shape, full2),
        pl.BlockSpec(params["lnf_b"].shape, full2),
        pl.BlockSpec(params["text_projection"].shape, full2),
    ]
    out_specs = pl.BlockSpec((tb, P), lambda i, eot_ref: (i, 0))

    L = params["ln1_w"].shape[0]
    # advisory cost estimate (pure f32 numbers; flops dominated by the matmuls)
    flops_layer = (2 * B * S * D * (3 * D)          # qkv proj
                   + 2 * 2 * B * S * S * D          # qk^T and p@v
                   + 2 * B * S * D * D              # out proj
                   + 2 * 2 * B * S * D * (4 * D))   # mlp fc + proj
    flops = L * flops_layer + 2 * B * D * P
    transcendentals = L * (B * S * 4 * D + B * n_heads * S * S)
    param_bytes = sum(int(x.size) * x.dtype.itemsize
                      for x in jax.tree_util.tree_leaves(params))
    bytes_accessed = (param_bytes + prompts.size * prompts.dtype.itemsize
                      + eot.size * 4 + B * P * jnp.dtype(dtype).itemsize)

    grid_spec = pltpu.PrefetchScalarGridSpec(
        num_scalar_prefetch=1,
        grid=(num_tiles,),
        in_specs=in_specs,
        out_specs=out_specs,
    )

    kernel = functools.partial(_text_encoder_kernel, n_heads=n_heads)
    return pl.pallas_call(
        kernel,
        out_shape=jax.ShapeDtypeStruct((B, P), dtype),
        grid_spec=grid_spec,
        compiler_params=pltpu.CompilerParams(
            dimension_semantics=("parallel",),          # no cross-step carry
            vmem_limit_bytes=64 * 1024 * 1024),
        cost_estimate=pl.CostEstimate(
            flops=int(flops), transcendentals=int(transcendentals),
            bytes_accessed=int(bytes_accessed)),
    )(eot, prompts, params["pos"],
      params["ln1_w"], params["ln1_b"], params["w_qkv"], params["b_qkv"],
      params["w_out"], params["b_out"], params["ln2_w"], params["ln2_b"],
      params["w_fc"], params["b_fc"], params["w_proj"], params["b_proj"],
      params["lnf_w"], params["lnf_b"], params["text_projection"])


# ---------------- pure-JAX reference of the PyTorch module ----------------
def text_encoder_ref(prompts, tokenized_prompts, params, *, n_heads):
    HI = jax.lax.Precision.HIGHEST
    B, S, D = prompts.shape
    L = params["ln1_w"].shape[0]
    hd = D // n_heads
    scale = 1.0 / math.sqrt(hd)

    def ln(x, w, b):
        mu = jnp.mean(x, -1, keepdims=True)
        var = jnp.mean(jnp.square(x - mu), -1, keepdims=True)
        return (x - mu) * lax.rsqrt(var + _LN_EPS) * w + b

    x = prompts + params["pos"]
    qi = jnp.arange(S)[:, None]
    ki = jnp.arange(S)[None, :]
    mask = jnp.where(ki <= qi, 0.0, _NEG_INF).astype(jnp.float32)

    for l in range(L):
        h = ln(x, params["ln1_w"][l], params["ln1_b"][l])
        qkv = jnp.einsum('bsd,de->bse', h, params["w_qkv"][l],
                         precision=HI) + params["b_qkv"][l]
        q, k, v = jnp.split(qkv, 3, axis=-1)
        q = q.reshape(B, S, n_heads, hd)
        k = k.reshape(B, S, n_heads, hd)
        v = v.reshape(B, S, n_heads, hd)
        sc = jnp.einsum('bqhd,bkhd->bhqk', q, k, precision=HI) * scale + mask
        p = jax.nn.softmax(sc, axis=-1)
        attn = jnp.einsum('bhqk,bkhd->bqhd', p, v, precision=HI).reshape(B, S, D)
        x = x + (jnp.einsum('bsd,de->bse', attn, params["w_out"][l],
                            precision=HI) + params["b_out"][l])
        h = ln(x, params["ln2_w"][l], params["ln2_b"][l])
        g = jnp.einsum('bsd,de->bse', h, params["w_fc"][l],
                       precision=HI) + params["b_fc"][l]
        g = g * jax.nn.sigmoid(1.702 * g)
        x = x + (jnp.einsum('bse,ed->bsd', g, params["w_proj"][l],
                            precision=HI) + params["b_proj"][l])

    x = ln(x, params["lnf_w"], params["lnf_b"])
    eot = jnp.argmax(tokenized_prompts, axis=-1)
    pooled = x[jnp.arange(B), eot]
    return jnp.dot(pooled, params["text_projection"], precision=HI)


if __name__ == "__main__":
    key = jax.random.PRNGKey(0)

    # Small CLIP-text-tower-like config (real CLIP: S=77, D=512, L=12, H=8).
    B, S, D, H, L = 2, 16, 128, 4, 2           # D kept a multiple of 128 (lane aligned)
    P = 128                                    # text_projection output dim
    F = 4 * D                                  # MLP hidden

    keys = jax.random.split(key, 20)
    init = lambda k, shape, std=0.02: std * jax.random.normal(k, shape,
                                                              dtype=jnp.float32)

    params = dict(
        pos=init(keys[0], (S, D), std=0.01),
        ln1_w=1.0 + init(keys[1], (L, 1, D)),
        ln1_b=init(keys[2], (L, 1, D)),
        w_qkv=init(keys[3], (L, D, 3 * D)),
        b_qkv=init(keys[4], (L, 1, 3 * D)),
        w_out=init(keys[5], (L, D, D)),
        b_out=init(keys[6], (L, 1, D)),
        ln2_w=1.0 + init(keys[7], (L, 1, D)),
        ln2_b=init(keys[8], (L, 1, D)),
        w_fc=init(keys[9], (L, D, F)),
        b_fc=init(keys[10], (L, 1, F)),
        w_proj=init(keys[11], (L, F, D)),
        b_proj=init(keys[12], (L, 1, D)),
        lnf_w=1.0 + init(keys[13], (1, D)),
        lnf_b=init(keys[14], (1, D)),
        text_projection=init(keys[15], (D, P)),
    )

    # Assembled prompt embeddings (output of PromptLearner) and tokenized prompts.
    prompts = 0.1 * jax.random.normal(keys[16], (B, S, D), dtype=jnp.float32)
    tok = jax.random.randint(keys[17], (B, S), 1, 400, dtype=jnp.int32)
    eot_pos = jnp.array([S - 3, S // 2], dtype=jnp.int32)    # per-sample EOT position
    tok = tok.at[jnp.arange(B), eot_pos].set(49407)          # EOT has the largest id

    out = text_encoder_forward(prompts, tok, params, n_heads=H)
    out = jax.block_until_ready(out)

    ref = text_encoder_ref(prompts, tok, params, n_heads=H)
    assert out.shape == (B, P), out.shape
    max_err = float(jnp.max(jnp.abs(out - ref)))
    assert jnp.allclose(out, ref, rtol=2e-2, atol=2e-2), f"max abs err {max_err}"

    print("KERNEL_OK")
</pallas_src>

<mosaic_0001>
module attributes {stable_mosaic.version = 11 : i64} {
  func.func @_text_encoder_kernel(%arg0: i32, %arg1: memref<2xi32, #tpu.memory_space<smem>>, %arg2: memref<2x16x128xf32, #tpu.memory_space<vmem>>, %arg3: memref<16x128xf32, #tpu.memory_space<vmem>>, %arg4: memref<2x1x128xf32, #tpu.memory_space<vmem>>, %arg5: memref<2x1x128xf32, #tpu.memory_space<vmem>>, %arg6: memref<2x128x384xf32, #tpu.memory_space<vmem>>, %arg7: memref<2x1x384xf32, #tpu.memory_space<vmem>>, %arg8: memref<2x128x128xf32, #tpu.memory_space<vmem>>, %arg9: memref<2x1x128xf32, #tpu.memory_space<vmem>>, %arg10: memref<2x1x128xf32, #tpu.memory_space<vmem>>, %arg11: memref<2x1x128xf32, #tpu.memory_space<vmem>>, %arg12: memref<2x128x512xf32, #tpu.memory_space<vmem>>, %arg13: memref<2x1x512xf32, #tpu.memory_space<vmem>>, %arg14: memref<2x512x128xf32, #tpu.memory_space<vmem>>, %arg15: memref<2x1x128xf32, #tpu.memory_space<vmem>>, %arg16: memref<1x128xf32, #tpu.memory_space<vmem>>, %arg17: memref<1x128xf32, #tpu.memory_space<vmem>>, %arg18: memref<128x128xf32, #tpu.memory_space<vmem>>, %arg19: memref<2x128xf32, #tpu.memory_space<vmem>>) attributes {dimension_semantics = [#tpu.dimension_semantics<parallel>], iteration_bounds = array<i64: 1>, scalar_prefetch = 1 : i64, scratch_operands = 0 : i64, tpu.core_type = #tpu.core_type<tc>, window_params = [{transform_indices = @transform_0, window_bounds = array<i64: 2, 16, 128>}, {pipeline_mode = #tpu.pipeline_mode<synchronous>, transform_indices = @transform_1, window_bounds = array<i64: 16, 128>}, {pipeline_mode = #tpu.pipeline_mode<synchronous>, transform_indices = @transform_2, window_bounds = array<i64: 2, 1, 128>}, {pipeline_mode = #tpu.pipeline_mode<synchronous>, transform_indices = @transform_3, window_bounds = array<i64: 2, 1, 128>}, {pipeline_mode = #tpu.pipeline_mode<synchronous>, transform_indices = @transform_4, window_bounds = array<i64: 2, 128, 384>}, {pipeline_mode = #tpu.pipeline_mode<synchronous>, transform_indices = @transform_5, window_bounds = array<i64: 2, 1, 384>}, {pipeline_mode = #tpu.pipeline_mode<synchronous>, transform_indices = @transform_6, window_bounds = array<i64: 2, 128, 128>}, {pipeline_mode = #tpu.pipeline_mode<synchronous>, transform_indices = @transform_7, window_bounds = array<i64: 2, 1, 128>}, {pipeline_mode = #tpu.pipeline_mode<synchronous>, transform_indices = @transform_8, window_bounds = array<i64: 2, 1, 128>}, {pipeline_mode = #tpu.pipeline_mode<synchronous>, transform_indices = @transform_9, window_bounds = array<i64: 2, 1, 128>}, {pipeline_mode = #tpu.pipeline_mode<synchronous>, transform_indices = @transform_10, window_bounds = array<i64: 2, 128, 512>}, {pipeline_mode = #tpu.pipeline_mode<synchronous>, transform_indices = @transform_11, window_bounds = array<i64: 2, 1, 512>}, {pipeline_mode = #tpu.pipeline_mode<synchronous>, transform_indices = @transform_12, window_bounds = array<i64: 2, 512, 128>}, {pipeline_mode = #tpu.pipeline_mode<synchronous>, transform_indices = @transform_13, window_bounds = array<i64: 2, 1, 128>}, {pipeline_mode = #tpu.pipeline_mode<synchronous>, transform_indices = @transform_14, window_bounds = array<i64: 1, 128>}, {pipeline_mode = #tpu.pipeline_mode<synchronous>, transform_indices = @transform_15, window_bounds = array<i64: 1, 128>}, {pipeline_mode = #tpu.pipeline_mode<synchronous>, transform_indices = @transform_16, window_bounds = array<i64: 128, 128>}, {transform_indices = @transform_17, window_bounds = array<i64: 2, 128>}]} {
    %c0 = arith.constant 0 : index
    %c0_0 = arith.constant 0 : index
    %c0_1 = arith.constant 0 : index
    %0 = vector.load %arg2[%c0, %c0_0, %c0_1] : memref<2x16x128xf32, #tpu.memory_space<vmem>>, vector<2x16x128xf32>
    %c0_2 = arith.constant 0 : index
    %c0_3 = arith.constant 0 : index
    %1 = vector.load %arg3[%c0_2, %c0_3] : memref<16x128xf32, #tpu.memory_space<vmem>>, vector<16x128xf32>
    %2 = vector.shape_cast %1 : vector<16x128xf32> to vector<1x16x128xf32>
    %3 = vector.broadcast %2 : vector<1x16x128xf32> to vector<2x16x128xf32>
    %4 = arith.addf %0, %3 : vector<2x16x128xf32>
    %5 = tpu.iota {dimensions = array<i32: 0>} : vector<16x16xi32>
    %6 = tpu.iota {dimensions = array<i32: 1>} : vector<16x16xi32>
    %7 = arith.cmpi sle, %6, %5 : vector<16x16xi32>
    %cst = arith.constant 0.000000e+00 : f32
    %cst_4 = arith.constant -1.000000e+09 : f32
    %8 = vector.broadcast %cst : f32 to vector<16x16xf32>
    %9 = vector.broadcast %cst_4 : f32 to vector<16x16xf32>
    %10 = arith.select %7, %8, %9 : vector<16x16xi1>, vector<16x16xf32>
    %c0_5 = arith.constant 0 : index
    %c0_6 = arith.constant 0 : index
    %c0_7 = arith.constant 0 : index
    %11 = vector.load %arg4[%c0_5, %c0_6, %c0_7] : memref<2x1x128xf32, #tpu.memory_space<vmem>>, vector<1x1x128xf32>
    %12 = vector.shape_cast %11 : vector<1x1x128xf32> to vector<1x128xf32>
    %c0_8 = arith.constant 0 : index
    %c0_9 = arith.constant 0 : index
    %c0_10 = arith.constant 0 : index
    %13 = vector.load %arg5[%c0_8, %c0_9, %c0_10] : memref<2x1x128xf32, #tpu.memory_space<vmem>>, vector<1x1x128xf32>
    %14 = vector.shape_cast %13 : vector<1x1x128xf32> to vector<1x128xf32>
    %cst_11 = arith.constant dense<0.000000e+00> : vector<2x16xf32>
    %15 = vector.multi_reduction <add>, %4, %cst_11 [2] : vector<2x16x128xf32> to vector<2x16xf32>
    %16 = vector.shape_cast %15 : vector<2x16xf32> to vector<2x16x1xf32>
    %cst_12 = arith.constant 1.280000e+02 : f32
    %17 = vector.broadcast %cst_12 : f32 to vector<2x16x1xf32>
    %18 = arith.divf %16, %17 : vector<2x16x1xf32>
    %19 = vector.broadcast %18 : vector<2x16x1xf32> to vector<2x16x128xf32>
    %20 = arith.subf %4, %19 : vector<2x16x128xf32>
    %21 = arith.mulf %20, %20 : vector<2x16x128xf32>
    %cst_13 = arith.constant dense<0.000000e+00> : vector<2x16xf32>
    %22 = vector.multi_reduction <add>, %21, %cst_13 [2] : vector<2x16x128xf32> to vector<2x16xf32>
    %23 = vector.shape_cast %22 : vector<2x16xf32> to vector<2x16x1xf32>
    %cst_14 = arith.constant 1.280000e+02 : f32
    %24 = vector.broadcast %cst_14 : f32 to vector<2x16x1xf32>
    %25 = arith.divf %23, %24 : vector<2x16x1xf32>
    %26 = vector.broadcast %18 : vector<2x16x1xf32> to vector<2x16x128xf32>
    %27 = arith.subf %4, %26 : vector<2x16x128xf32>
    %cst_15 = arith.constant 9.99999974E-6 : f32
    %28 = vector.broadcast %cst_15 : f32 to vector<2x16x1xf32>
    %29 = arith.addf %25, %28 : vector<2x16x1xf32>
    %30 = math.rsqrt %29 : vector<2x16x1xf32>
    %31 = vector.broadcast %30 : vector<2x16x1xf32> to vector<2x16x128xf32>
    %32 = arith.mulf %27, %31 : vector<2x16x128xf32>
    %33 = vector.shape_cast %12 : vector<1x128xf32> to vector<1x1x128xf32>
    %34 = vector.broadcast %33 : vector<1x1x128xf32> to vector<2x16x128xf32>
    %35 = arith.mulf %32, %34 : vector<2x16x128xf32>
    %36 = vector.shape_cast %14 : vector<1x128xf32> to vector<1x1x128xf32>
    %37 = vector.broadcast %36 : vector<1x1x128xf32> to vector<2x16x128xf32>
    %38 = arith.addf %35, %37 : vector<2x16x128xf32>
    %c0_16 = arith.constant 0 : index
    %c0_17 = arith.constant 0 : index
    %c0_18 = arith.constant 0 : index
    %39 = vector.load %arg6[%c0_16, %c0_17, %c0_18] : memref<2x128x384xf32, #tpu.memory_space<vmem>>, vector<1x128x384xf32>
    %40 = vector.shape_cast %39 : vector<1x128x384xf32> to vector<128x384xf32>
    %c0_19 = arith.constant 0 : index
    %c0_20 = arith.constant 0 : index
    %c0_21 = arith.constant 0 : index
    %41 = vector.load %arg7[%c0_19, %c0_20, %c0_21] : memref<2x1x384xf32, #tpu.memory_space<vmem>>, vector<1x1x384xf32>
    %42 = vector.shape_cast %41 : vector<1x1x384xf32> to vector<1x384xf32>
    %43 = vector.shape_cast %38 : vector<2x16x128xf32> to vector<32x128xf32>
    %cst_22 = arith.constant dense<0.000000e+00> : vector<32x384xf32>
    %44 = tpu.matmul %43, %40, %cst_22 {dimension_numbers = #tpu.dot_dimension_numbers<[1], [0], [0], [1], [0, 0, 1, 1], [], []>} : vector<32x128xf32>, vector<128x384xf32>, vector<32x384xf32> -> vector<32x384xf32>
    %45 = vector.shape_cast %44 : vector<32x384xf32> to vector<2x16x384xf32>
    %46 = vector.shape_cast %42 : vector<1x384xf32> to vector<1x1x384xf32>
    %47 = vector.broadcast %46 : vector<1x1x384xf32> to vector<2x16x384xf32>
    %48 = arith.addf %45, %47 : vector<2x16x384xf32>
    %49 = vector.extract_strided_slice %48 {offsets = [0, 0, 0], sizes = [2, 16, 128], strides = [1, 1, 1]} : vector<2x16x384xf32> to vector<2x16x128xf32>
    %50 = vector.extract_strided_slice %48 {offsets = [0, 0, 128], sizes = [2, 16, 128], strides = [1, 1, 1]} : vector<2x16x384xf32> to vector<2x16x128xf32>
    %51 = vector.extract_strided_slice %48 {offsets = [0, 0, 256], sizes = [2, 16, 128], strides = [1, 1, 1]} : vector<2x16x384xf32> to vector<2x16x128xf32>
    %52 = vector.extract_strided_slice %49 {offsets = [0, 0, 0], sizes = [2, 16, 32], strides = [1, 1, 1]} : vector<2x16x128xf32> to vector<2x16x32xf32>
    %53 = vector.extract_strided_slice %50 {offsets = [0, 0, 0], sizes = [2, 16, 32], strides = [1, 1, 1]} : vector<2x16x128xf32> to vector<2x16x32xf32>
    %54 = vector.extract_strided_slice %51 {offsets = [0, 0, 0], sizes = [2, 16, 32], strides = [1, 1, 1]} : vector<2x16x128xf32> to vector<2x16x32xf32>
    "tpu.trace_start"() <{level = 10 : i32, message = "bqd,bkd->bqk"}> : () -> ()
    %cst_23 = arith.constant dense<0.000000e+00> : vector<2x16x16xf32>
    %55 = tpu.matmul %52, %53, %cst_23 {dimension_numbers = #tpu.dot_dimension_numbers<[2], [2], [1], [1], [0, 0, 0, 1, 1, 1], [0], [0]>} : vector<2x16x32xf32>, vector<2x16x32xf32>, vector<2x16x16xf32> -> vector<2x16x16xf32>
    "tpu.trace_stop"() : () -> ()
    %cst_24 = arith.constant 0.176776692 : f32
    %56 = vector.broadcast %cst_24 : f32 to vector<2x16x16xf32>
    %57 = arith.mulf %55, %56 : vector<2x16x16xf32>
    %58 = vector.shape_cast %10 : vector<16x16xf32> to vector<1x16x16xf32>
    %59 = vector.broadcast %58 : vector<1x16x16xf32> to vector<2x16x16xf32>
    %60 = arith.addf %57, %59 : vector<2x16x16xf32>
    %cst_25 = arith.constant dense<0xFF800000> : vector<2x16xf32>
    %61 = vector.multi_reduction <maximumf>, %60, %cst_25 [2] : vector<2x16x16xf32> to vector<2x16xf32>
    %62 = vector.shape_cast %61 : vector<2x16xf32> to vector<2x16x1xf32>
    %63 = vector.broadcast %62 : vector<2x16x1xf32> to vector<2x16x16xf32>
    %64 = arith.subf %60, %63 : vector<2x16x16xf32>
    %65 = math.exp %64 : vector<2x16x16xf32>
    %cst_26 = arith.constant dense<0.000000e+00> : vector<2x16xf32>
    %66 = vector.multi_reduction <add>, %65, %cst_26 [2] : vector<2x16x16xf32> to vector<2x16xf32>
    %67 = vector.shape_cast %66 : vector<2x16xf32> to vector<2x16x1xf32>
    %68 = vector.broadcast %67 : vector<2x16x1xf32> to vector<2x16x16xf32>
    %69 = arith.divf %65, %68 : vector<2x16x16xf32>
    "tpu.trace_start"() <{level = 10 : i32, message = "bqk,bkd->bqd"}> : () -> ()
    %cst_27 = arith.constant dense<0.000000e+00> : vector<2x16x32xf32>
    %70 = tpu.matmul %69, %54, %cst_27 {dimension_numbers = #tpu.dot_dimension_numbers<[2], [1], [1], [2], [0, 0, 0, 1, 1, 2], [0], [0]>} : vector<2x16x16xf32>, vector<2x16x32xf32>, vector<2x16x32xf32> -> vector<2x16x32xf32>
    "tpu.trace_stop"() : () -> ()
    %71 = vector.extract_strided_slice %49 {offsets = [0, 0, 32], sizes = [2, 16, 32], strides = [1, 1, 1]} : vector<2x16x128xf32> to vector<2x16x32xf32>
    %72 = vector.extract_strided_slice %50 {offsets = [0, 0, 32], sizes = [2, 16, 32], strides = [1, 1, 1]} : vector<2x16x128xf32> to vector<2x16x32xf32>
    %73 = vector.extract_strided_slice %51 {offsets = [0, 0, 32], sizes = [2, 16, 32], strides = [1, 1, 1]} : vector<2x16x128xf32> to vector<2x16x32xf32>
    "tpu.trace_start"() <{level = 10 : i32, message = "bqd,bkd->bqk"}> : () -> ()
    %cst_28 = arith.constant dense<0.000000e+00> : vector<2x16x16xf32>
    %74 = tpu.matmul %71, %72, %cst_28 {dimension_numbers = #tpu.dot_dimension_numbers<[2], [2], [1], [1], [0, 0, 0, 1, 1, 1], [0], [0]>} : vector<2x16x32xf32>, vector<2x16x32xf32>, vector<2x16x16xf32> -> vector<2x16x16xf32>
    "tpu.trace_stop"() : () -> ()
    %cst_29 = arith.constant 0.176776692 : f32
    %75 = vector.broadcast %cst_29 : f32 to vector<2x16x16xf32>
    %76 = arith.mulf %74, %75 : vector<2x16x16xf32>
    %77 = vector.shape_cast %10 : vector<16x16xf32> to vector<1x16x16xf32>
    %78 = vector.broadcast %77 : vector<1x16x16xf32> to vector<2x16x16xf32>
    %79 = arith.addf %76, %78 : vector<2x16x16xf32>
    %cst_30 = arith.constant dense<0xFF800000> : vector<2x16xf32>
    %80 = vector.multi_reduction <maximumf>, %79, %cst_30 [2] : vector<2x16x16xf32> to vector<2x16xf32>
    %81 = vector.shape_cast %80 : vector<2x16xf32> to vector<2x16x1xf32>
    %82 = vector.broadcast %81 : vector<2x16x1xf32> to vector<2x16x16xf32>
    %83 = arith.subf %79, %82 : vector<2x16x16xf32>
    %84 = math.exp %83 : vector<2x16x16xf32>
    %cst_31 = arith.constant dense<0.000000e+00> : vector<2x16xf32>
    %85 = vector.multi_reduction <add>, %84, %cst_31 [2] : vector<2x16x16xf32> to vector<2x16xf32>
    %86 = vector.shape_cast %85 : vector<2x16xf32> to vector<2x16x1xf32>
    %87 = vector.broadcast %86 : vector<2x16x1xf32> to vector<2x16x16xf32>
    %88 = arith.divf %84, %87 : vector<2x16x16xf32>
    "tpu.trace_start"() <{level = 10 : i32, message = "bqk,bkd->bqd"}> : () -> ()
    %cst_32 = arith.constant dense<0.000000e+00> : vector<2x16x32xf32>
    %89 = tpu.matmul %88, %73, %cst_32 {dimension_numbers = #tpu.dot_dimension_numbers<[2], [1], [1], [2], [0, 0, 0, 1, 1, 2], [0], [0]>} : vector<2x16x16xf32>, vector<2x16x32xf32>, vector<2x16x32xf32> -> vector<2x16x32xf32>
    "tpu.trace_stop"() : () -> ()
    %90 = vector.extract_strided_slice %49 {offsets = [0, 0, 64], sizes = [2, 16, 32], strides = [1, 1, 1]} : vector<2x16x128xf32> to vector<2x16x32xf32>
    %91 = vector.extract_strided_slice %50 {offsets = [0, 0, 64], sizes = [2, 16, 32], strides = [1, 1, 1]} : vector<2x16x128xf32> to vector<2x16x32xf32>
    %92 = vector.extract_strided_slice %51 {offsets = [0, 0, 64], sizes = [2, 16, 32], strides = [1, 1, 1]} : vector<2x16x128xf32> to vector<2x16x32xf32>
    "tpu.trace_start"() <{level = 10 : i32, message = "bqd,bkd->bqk"}> : () -> ()
    %cst_33 = arith.constant dense<0.000000e+00> : vector<2x16x16xf32>
    %93 = tpu.matmul %90, %91, %cst_33 {dimension_numbers = #tpu.dot_dimension_numbers<[2], [2], [1], [1], [0, 0, 0, 1, 1, 1], [0], [0]>} : vector<2x16x32xf32>, vector<2x16x32xf32>, vector<2x16x16xf32> -> vector<2x16x16xf32>
    "tpu.trace_stop"() : () -> ()
    %cst_34 = arith.constant 0.176776692 : f32
    %94 = vector.broadcast %cst_34 : f32 to vector<2x16x16xf32>
    %95 = arith.mulf %93, %94 : vector<2x16x16xf32>
    %96 = vector.shape_cast %10 : vector<16x16xf32> to vector<1x16x16xf32>
    %97 = vector.broadcast %96 : vector<1x16x16xf32> to vector<2x16x16xf32>
    %98 = arith.addf %95, %97 : vector<2x16x16xf32>
    %cst_35 = arith.constant dense<0xFF800000> : vector<2x16xf32>
    %99 = vector.multi_reduction <maximumf>, %98, %cst_35 [2] : vector<2x16x16xf32> to vector<2x16xf32>
    %100 = vector.shape_cast %99 : vector<2x16xf32> to vector<2x16x1xf32>
    %101 = vector.broadcast %100 : vector<2x16x1xf32> to vector<2x16x16xf32>
    %102 = arith.subf %98, %101 : vector<2x16x16xf32>
    %103 = math.exp %102 : vector<2x16x16xf32>
    %cst_36 = arith.constant dense<0.000000e+00> : vector<2x16xf32>
    %104 = vector.multi_reduction <add>, %103, %cst_36 [2] : vector<2x16x16xf32> to vector<2x16xf32>
    %105 = vector.shape_cast %104 : vector<2x16xf32> to vector<2x16x1xf32>
    %106 = vector.broadcast %105 : vector<2x16x1xf32> to vector<2x16x16xf32>
    %107 = arith.divf %103, %106 : vector<2x16x16xf32>
    "tpu.trace_start"() <{level = 10 : i32, message = "bqk,bkd->bqd"}> : () -> ()
    %cst_37 = arith.constant dense<0.000000e+00> : vector<2x16x32xf32>
    %108 = tpu.matmul %107, %92, %cst_37 {dimension_numbers = #tpu.dot_dimension_numbers<[2], [1], [1], [2], [0, 0, 0, 1, 1, 2], [0], [0]>} : vector<2x16x16xf32>, vector<2x16x32xf32>, vector<2x16x32xf32> -> vector<2x16x32xf32>
    "tpu.trace_stop"() : () -> ()
    %109 = vector.extract_strided_slice %49 {offsets = [0, 0, 96], sizes = [2, 16, 32], strides = [1, 1, 1]} : vector<2x16x128xf32> to vector<2x16x32xf32>
    %110 = vector.extract_strided_slice %50 {offsets = [0, 0, 96], sizes = [2, 16, 32], strides = [1, 1, 1]} : vector<2x16x128xf32> to vector<2x16x32xf32>
    %111 = vector.extract_strided_slice %51 {offsets = [0, 0, 96], sizes = [2, 16, 32], strides = [1, 1, 1]} : vector<2x16x128xf32> to vector<2x16x32xf32>
    "tpu.trace_start"() <{level = 10 : i32, message = "bqd,bkd->bqk"}> : () -> ()
    %cst_38 = arith.constant dense<0.000000e+00> : vector<2x16x16xf32>
    %112 = tpu.matmul %109, %110, %cst_38 {dimension_numbers = #tpu.dot_dimension_numbers<[2], [2], [1], [1], [0, 0, 0, 1, 1, 1], [0], [0]>} : vector<2x16x32xf32>, vector<2x16x32xf32>, vector<2x16x16xf32> -> vector<2x16x16xf32>
    "tpu.trace_stop"() : () -> ()
    %cst_39 = arith.constant 0.176776692 : f32
    %113 = vector.broadcast %cst_39 : f32 to vector<2x16x16xf32>
    %114 = arith.mulf %112, %113 : vector<2x16x16xf32>
    %115 = vector.shape_cast %10 : vector<16x16xf32> to vector<1x16x16xf32>
    %116 = vector.broadcast %115 : vector<1x16x16xf32> to vector<2x16x16xf32>
    %117 = arith.addf %114, %116 : vector<2x16x16xf32>
    %cst_40 = arith.constant dense<0xFF800000> : vector<2x16xf32>
    %118 = vector.multi_reduction <maximumf>, %117, %cst_40 [2] : vector<2x16x16xf32> to vector<2x16xf32>
    %119 = vector.shape_cast %118 : vector<2x16xf32> to vector<2x16x1xf32>
    %120 = vector.broadcast %119 : vector<2x16x1xf32> to vector<2x16x16xf32>
    %121 = arith.subf %117, %120 : vector<2x16x16xf32>
    %122 = math.exp %121 : vector<2x16x16xf32>
    %cst_41 = arith.constant dense<0.000000e+00> : vector<2x16xf32>
    %123 = vector.multi_reduction <add>, %122, %cst_41 [2] : vector<2x16x16xf32> to vector<2x16xf32>
    %124 = vector.shape_cast %123 : vector<2x16xf32> to vector<2x16x1xf32>
    %125 = vector.broadcast %124 : vector<2x16x1xf32> to vector<2x16x16xf32>
    %126 = arith.divf %122, %125 : vector<2x16x16xf32>
    "tpu.trace_start"() <{level = 10 : i32, message = "bqk,bkd->bqd"}> : () -> ()
    %cst_42 = arith.constant dense<0.000000e+00> : vector<2x16x32xf32>
    %127 = tpu.matmul %126, %111, %cst_42 {dimension_numbers = #tpu.dot_dimension_numbers<[2], [1], [1], [2], [0, 0, 0, 1, 1, 2], [0], [0]>} : vector<2x16x16xf32>, vector<2x16x32xf32>, vector<2x16x32xf32> -> vector<2x16x32xf32>
    "tpu.trace_stop"() : () -> ()
    %128 = tpu.concatenate %70, %89, %108, %127 in 2 : vector<2x16x32xf32>, vector<2x16x32xf32>, vector<2x16x32xf32>, vector<2x16x32xf32> -> vector<2x16x128xf32>
    %c0_43 = arith.constant 0 : index
    %c0_44 = arith.constant 0 : index
    %c0_45 = arith.constant 0 : index
    %129 = vector.load %arg8[%c0_43, %c0_44, %c0_45] : memref<2x128x128xf32, #tpu.memory_space<vmem>>, vector<1x128x128xf32>
    %130 = vector.shape_cast %129 : vector<1x128x128xf32> to vector<128x128xf32>
    %c0_46 = arith.constant 0 : index
    %c0_47 = arith.constant 0 : index
    %c0_48 = arith.constant 0 : index
    %131 = vector.load %arg9[%c0_46, %c0_47, %c0_48] : memref<2x1x128xf32, #tpu.memory_space<vmem>>, vector<1x1x128xf32>
    %132 = vector.shape_cast %131 : vector<1x1x128xf32> to vector<1x128xf32>
    %133 = vector.shape_cast %128 : vector<2x16x128xf32> to vector<32x128xf32>
    %cst_49 = arith.constant dense<0.000000e+00> : vector<32x128xf32>
    %134 = tpu.matmul %133, %130, %cst_49 {dimension_numbers = #tpu.dot_dimension_numbers<[1], [0], [0], [1], [0, 0, 1, 1], [], []>} : vector<32x128xf32>, vector<128x128xf32>, vector<32x128xf32> -> vector<32x128xf32>
    %135 = vector.shape_cast %134 : vector<32x128xf32> to vector<2x16x128xf32>
    %136 = vector.shape_cast %132 : vector<1x128xf32> to vector<1x1x128xf32>
    %137 = vector.broadcast %136 : vector<1x1x128xf32> to vector<2x16x128xf32>
    %138 = arith.addf %135, %137 : vector<2x16x128xf32>
    %139 = arith.addf %4, %138 : vector<2x16x128xf32>
    %c0_50 = arith.constant 0 : index
    %c0_51 = arith.constant 0 : index
    %c0_52 = arith.constant 0 : index
    %140 = vector.load %arg10[%c0_50, %c0_51, %c0_52] : memref<2x1x128xf32, #tpu.memory_space<vmem>>, vector<1x1x128xf32>
    %141 = vector.shape_cast %140 : vector<1x1x128xf32> to vector<1x128xf32>
    %c0_53 = arith.constant 0 : index
    %c0_54 = arith.constant 0 : index
    %c0_55 = arith.constant 0 : index
    %142 = vector.load %arg11[%c0_53, %c0_54, %c0_55] : memref<2x1x128xf32, #tpu.memory_space<vmem>>, vector<1x1x128xf32>
    %143 = vector.shape_cast %142 : vector<1x1x128xf32> to vector<1x128xf32>
    %cst_56 = arith.constant dense<0.000000e+00> : vector<2x16xf32>
    %144 = vector.multi_reduction <add>, %139, %cst_56 [2] : vector<2x16x128xf32> to vector<2x16xf32>
    %145 = vector.shape_cast %144 : vector<2x16xf32> to vector<2x16x1xf32>
    %cst_57 = arith.constant 1.280000e+02 : f32
    %146 = vector.broadcast %cst_57 : f32 to vector<2x16x1xf32>
    %147 = arith.divf %145, %146 : vector<2x16x1xf32>
    %148 = vector.broadcast %147 : vector<2x16x1xf32> to vector<2x16x128xf32>
    %149 = arith.subf %139, %148 : vector<2x16x128xf32>
    %150 = arith.mulf %149, %149 : vector<2x16x128xf32>
    %cst_58 = arith.constant dense<0.000000e+00> : vector<2x16xf32>
    %151 = vector.multi_reduction <add>, %150, %cst_58 [2] : vector<2x16x128xf32> to vector<2x16xf32>
    %152 = vector.shape_cast %151 : vector<2x16xf32> to vector<2x16x1xf32>
    %cst_59 = arith.constant 1.280000e+02 : f32
    %153 = vector.broadcast %cst_59 : f32 to vector<2x16x1xf32>
    %154 = arith.divf %152, %153 : vector<2x16x1xf32>
    %155 = vector.broadcast %147 : vector<2x16x1xf32> to vector<2x16x128xf32>
    %156 = arith.subf %139, %155 : vector<2x16x128xf32>
    %cst_60 = arith.constant 9.99999974E-6 : f32
    %157 = vector.broadcast %cst_60 : f32 to vector<2x16x1xf32>
    %158 = arith.addf %154, %157 : vector<2x16x1xf32>
    %159 = math.rsqrt %158 : vector<2x16x1xf32>
    %160 = vector.broadcast %159 : vector<2x16x1xf32> to vector<2x16x128xf32>
    %161 = arith.mulf %156, %160 : vector<2x16x128xf32>
    %162 = vector.shape_cast %141 : vector<1x128xf32> to vector<1x1x128xf32>
    %163 = vector.broadcast %162 : vector<1x1x128xf32> to vector<2x16x128xf32>
    %164 = arith.mulf %161, %163 : vector<2x16x128xf32>
    %165 = vector.shape_cast %143 : vector<1x128xf32> to vector<1x1x128xf32>
    %166 = vector.broadcast %165 : vector<1x1x128xf32> to vector<2x16x128xf32>
    %167 = arith.addf %164, %166 : vector<2x16x128xf32>
    %c0_61 = arith.constant 0 : index
    %c0_62 = arith.constant 0 : index
    %c0_63 = arith.constant 0 : index
    %168 = vector.load %arg12[%c0_61, %c0_62, %c0_63] : memref<2x128x512xf32, #tpu.memory_space<vmem>>, vector<1x128x512xf32>
    %169 = vector.shape_cast %168 : vector<1x128x512xf32> to vector<128x512xf32>
    %c0_64 = arith.constant 0 : index
    %c0_65 = arith.constant 0 : index
    %c0_66 = arith.constant 0 : index
    %170 = vector.load %arg13[%c0_64, %c0_65, %c0_66] : memref<2x1x512xf32, #tpu.memory_space<vmem>>, vector<1x1x512xf32>
    %171 = vector.shape_cast %170 : vector<1x1x512xf32> to vector<1x512xf32>
    %172 = vector.shape_cast %167 : vector<2x16x128xf32> to vector<32x128xf32>
    %cst_67 = arith.constant dense<0.000000e+00> : vector<32x512xf32>
    %173 = tpu.matmul %172, %169, %cst_67 {dimension_numbers = #tpu.dot_dimension_numbers<[1], [0], [0], [1], [0, 0, 1, 1], [], []>} : vector<32x128xf32>, vector<128x512xf32>, vector<32x512xf32> -> vector<32x512xf32>
    %174 = vector.shape_cast %173 : vector<32x512xf32> to vector<2x16x512xf32>
    %175 = vector.shape_cast %171 : vector<1x512xf32> to vector<1x1x512xf32>
    %176 = vector.broadcast %175 : vector<1x1x512xf32> to vector<2x16x512xf32>
    %177 = arith.addf %174, %176 : vector<2x16x512xf32>
    %cst_68 = arith.constant 1.702000e+00 : f32
    %178 = vector.broadcast %cst_68 : f32 to vector<2x16x512xf32>
    %179 = arith.mulf %178, %177 : vector<2x16x512xf32>
    %180 = arith.negf %179 : vector<2x16x512xf32>
    %181 = math.exp %180 : vector<2x16x512xf32>
    %cst_69 = arith.constant 1.000000e+00 : f32
    %182 = vector.broadcast %cst_69 : f32 to vector<2x16x512xf32>
    %183 = arith.addf %182, %181 : vector<2x16x512xf32>
    %184 = arith.divf %182, %183 : vector<2x16x512xf32>
    %185 = arith.mulf %177, %184 : vector<2x16x512xf32>
    %c0_70 = arith.constant 0 : index
    %c0_71 = arith.constant 0 : index
    %c0_72 = arith.constant 0 : index
    %186 = vector.load %arg14[%c0_70, %c0_71, %c0_72] : memref<2x512x128xf32, #tpu.memory_space<vmem>>, vector<1x512x128xf32>
    %187 = vector.shape_cast %186 : vector<1x512x128xf32> to vector<512x128xf32>
    %c0_73 = arith.constant 0 : index
    %c0_74 = arith.constant 0 : index
    %c0_75 = arith.constant 0 : index
    %188 = vector.load %arg15[%c0_73, %c0_74, %c0_75] : memref<2x1x128xf32, #tpu.memory_space<vmem>>, vector<1x1x128xf32>
    %189 = vector.shape_cast %188 : vector<1x1x128xf32> to vector<1x128xf32>
    %190 = vector.shape_cast %185 : vector<2x16x512xf32> to vector<32x512xf32>
    %cst_76 = arith.constant dense<0.000000e+00> : vector<32x128xf32>
    %191 = tpu.matmul %190, %187, %cst_76 {dimension_numbers = #tpu.dot_dimension_numbers<[1], [0], [0], [1], [0, 0, 1, 1], [], []>} : vector<32x512xf32>, vector<512x128xf32>, vector<32x128xf32> -> vector<32x128xf32>
    %192 = vector.shape_cast %191 : vector<32x128xf32> to vector<2x16x128xf32>
    %193 = vector.shape_cast %189 : vector<1x128xf32> to vector<1x1x128xf32>
    %194 = vector.broadcast %193 : vector<1x1x128xf32> to vector<2x16x128xf32>
    %195 = arith.addf %192, %194 : vector<2x16x128xf32>
    %196 = arith.addf %139, %195 : vector<2x16x128xf32>
    %c1 = arith.constant 1 : index
    %c0_77 = arith.constant 0 : index
    %c0_78 = arith.constant 0 : index
    %197 = vector.load %arg4[%c1, %c0_77, %c0_78] : memref<2x1x128xf32, #tpu.memory_space<vmem>>, vector<1x1x128xf32>
    %198 = vector.shape_cast %197 : vector<1x1x128xf32> to vector<1x128xf32>
    %c1_79 = arith.constant 1 : index
    %c0_80 = arith.constant 0 : index
    %c0_81 = arith.constant 0 : index
    %199 = vector.load %arg5[%c1_79, %c0_80, %c0_81] : memref<2x1x128xf32, #tpu.memory_space<vmem>>, vector<1x1x128xf32>
    %200 = vector.shape_cast %199 : vector<1x1x128xf32> to vector<1x128xf32>
    %cst_82 = arith.constant dense<0.000000e+00> : vector<2x16xf32>
    %201 = vector.multi_reduction <add>, %196, %cst_82 [2] : vector<2x16x128xf32> to vector<2x16xf32>
    %202 = vector.shape_cast %201 : vector<2x16xf32> to vector<2x16x1xf32>
    %cst_83 = arith.constant 1.280000e+02 : f32
    %203 = vector.broadcast %cst_83 : f32 to vector<2x16x1xf32>
    %204 = arith.divf %202, %203 : vector<2x16x1xf32>
    %205 = vector.broadcast %204 : vector<2x16x1xf32> to vector<2x16x128xf32>
    %206 = arith.subf %196, %205 : vector<2x16x128xf32>
    %207 = arith.mulf %206, %206 : vector<2x16x128xf32>
    %cst_84 = arith.constant dense<0.000000e+00> : vector<2x16xf32>
    %208 = vector.multi_reduction <add>, %207, %cst_84 [2] : vector<2x16x128xf32> to vector<2x16xf32>
    %209 = vector.shape_cast %208 : vector<2x16xf32> to vector<2x16x1xf32>
    %cst_85 = arith.constant 1.280000e+02 : f32
    %210 = vector.broadcast %cst_85 : f32 to vector<2x16x1xf32>
    %211 = arith.divf %209, %210 : vector<2x16x1xf32>
    %212 = vector.broadcast %204 : vector<2x16x1xf32> to vector<2x16x128xf32>
    %213 = arith.subf %196, %212 : vector<2x16x128xf32>
    %cst_86 = arith.constant 9.99999974E-6 : f32
    %214 = vector.broadcast %cst_86 : f32 to vector<2x16x1xf32>
    %215 = arith.addf %211, %214 : vector<2x16x1xf32>
    %216 = math.rsqrt %215 : vector<2x16x1xf32>
    %217 = vector.broadcast %216 : vector<2x16x1xf32> to vector<2x16x128xf32>
    %218 = arith.mulf %213, %217 : vector<2x16x128xf32>
    %219 = vector.shape_cast %198 : vector<1x128xf32> to vector<1x1x128xf32>
    %220 = vector.broadcast %219 : vector<1x1x128xf32> to vector<2x16x128xf32>
    %221 = arith.mulf %218, %220 : vector<2x16x128xf32>
    %222 = vector.shape_cast %200 : vector<1x128xf32> to vector<1x1x128xf32>
    %223 = vector.broadcast %222 : vector<1x1x128xf32> to vector<2x16x128xf32>
    %224 = arith.addf %221, %223 : vector<2x16x128xf32>
    %c1_87 = arith.constant 1 : index
    %c0_88 = arith.constant 0 : index
    %c0_89 = arith.constant 0 : index
    %225 = vector.load %arg6[%c1_87, %c0_88, %c0_89] : memref<2x128x384xf32, #tpu.memory_space<vmem>>, vector<1x128x384xf32>
    %226 = vector.shape_cast %225 : vector<1x128x384xf32> to vector<128x384xf32>
    %c1_90 = arith.constant 1 : index
    %c0_91 = arith.constant 0 : index
    %c0_92 = arith.constant 0 : index
    %227 = vector.load %arg7[%c1_90, %c0_91, %c0_92] : memref<2x1x384xf32, #tpu.memory_space<vmem>>, vector<1x1x384xf32>
    %228 = vector.shape_cast %227 : vector<1x1x384xf32> to vector<1x384xf32>
    %229 = vector.shape_cast %224 : vector<2x16x128xf32> to vector<32x128xf32>
    %cst_93 = arith.constant dense<0.000000e+00> : vector<32x384xf32>
    %230 = tpu.matmul %229, %226, %cst_93 {dimension_numbers = #tpu.dot_dimension_numbers<[1], [0], [0], [1], [0, 0, 1, 1], [], []>} : vector<32x128xf32>, vector<128x384xf32>, vector<32x384xf32> -> vector<32x384xf32>
    %231 = vector.shape_cast %230 : vector<32x384xf32> to vector<2x16x384xf32>
    %232 = vector.shape_cast %228 : vector<1x384xf32> to vector<1x1x384xf32>
    %233 = vector.broadcast %232 : vector<1x1x384xf32> to vector<2x16x384xf32>
    %234 = arith.addf %231, %233 : vector<2x16x384xf32>
    %235 = vector.extract_strided_slice %234 {offsets = [0, 0, 0], sizes = [2, 16, 128], strides = [1, 1, 1]} : vector<2x16x384xf32> to vector<2x16x128xf32>
    %236 = vector.extract_strided_slice %234 {offsets = [0, 0, 128], sizes = [2, 16, 128], strides = [1, 1, 1]} : vector<2x16x384xf32> to vector<2x16x128xf32>
    %237 = vector.extract_strided_slice %234 {offsets = [0, 0, 256], sizes = [2, 16, 128], strides = [1, 1, 1]} : vector<2x16x384xf32> to vector<2x16x128xf32>
    %238 = vector.extract_strided_slice %235 {offsets = [0, 0, 0], sizes = [2, 16, 32], strides = [1, 1, 1]} : vector<2x16x128xf32> to vector<2x16x32xf32>
    %239 = vector.extract_strided_slice %236 {offsets = [0, 0, 0], sizes = [2, 16, 32], strides = [1, 1, 1]} : vector<2x16x128xf32> to vector<2x16x32xf32>
    %240 = vector.extract_strided_slice %237 {offsets = [0, 0, 0], sizes = [2, 16, 32], strides = [1, 1, 1]} : vector<2x16x128xf32> to vector<2x16x32xf32>
    "tpu.trace_start"() <{level = 10 : i32, message = "bqd,bkd->bqk"}> : () -> ()
    %cst_94 = arith.constant dense<0.000000e+00> : vector<2x16x16xf32>
    %241 = tpu.matmul %238, %239, %cst_94 {dimension_numbers = #tpu.dot_dimension_numbers<[2], [2], [1], [1], [0, 0, 0, 1, 1, 1], [0], [0]>} : vector<2x16x32xf32>, vector<2x16x32xf32>, vector<2x16x16xf32> -> vector<2x16x16xf32>
    "tpu.trace_stop"() : () -> ()
    %cst_95 = arith.constant 0.176776692 : f32
    %242 = vector.broadcast %cst_95 : f32 to vector<2x16x16xf32>
    %243 = arith.mulf %241, %242 : vector<2x16x16xf32>
    %244 = vector.shape_cast %10 : vector<16x16xf32> to vector<1x16x16xf32>
    %245 = vector.broadcast %244 : vector<1x16x16xf32> to vector<2x16x16xf32>
    %246 = arith.addf %243, %245 : vector<2x16x16xf32>
    %cst_96 = arith.constant dense<0xFF800000> : vector<2x16xf32>
    %247 = vector.multi_reduction <maximumf>, %246, %cst_96 [2] : vector<2x16x16xf32> to vector<2x16xf32>
    %248 = vector.shape_cast %247 : vector<2x16xf32> to vector<2x16x1xf32>
    %249 = vector.broadcast %248 : vector<2x16x1xf32> to vector<2x16x16xf32>
    %250 = arith.subf %246, %249 : vector<2x16x16xf32>
    %251 = math.exp %250 : vector<2x16x16xf32>
    %cst_97 = arith.constant dense<0.000000e+00> : vector<2x16xf32>
    %252 = vector.multi_reduction <add>, %251, %cst_97 [2] : vector<2x16x16xf32> to vector<2x16xf32>
    %253 = vector.shape_cast %252 : vector<2x16xf32> to vector<2x16x1xf32>
    %254 = vector.broadcast %253 : vector<2x16x1xf32> to vector<2x16x16xf32>
    %255 = arith.divf %251, %254 : vector<2x16x16xf32>
    "tpu.trace_start"() <{level = 10 : i32, message = "bqk,bkd->bqd"}> : () -> ()
    %cst_98 = arith.constant dense<0.000000e+00> : vector<2x16x32xf32>
    %256 = tpu.matmul %255, %240, %cst_98 {dimension_numbers = #tpu.dot_dimension_numbers<[2], [1], [1], [2], [0, 0, 0, 1, 1, 2], [0], [0]>} : vector<2x16x16xf32>, vector<2x16x32xf32>, vector<2x16x32xf32> -> vector<2x16x32xf32>
    "tpu.trace_stop"() : () -> ()
    %257 = vector.extract_strided_slice %235 {offsets = [0, 0, 32], sizes = [2, 16, 32], strides = [1, 1, 1]} : vector<2x16x128xf32> to vector<2x16x32xf32>
    %258 = vector.extract_strided_slice %236 {offsets = [0, 0, 32], sizes = [2, 16, 32], strides = [1, 1, 1]} : vector<2x16x128xf32> to vector<2x16x32xf32>
    %259 = vector.extract_strided_slice %237 {offsets = [0, 0, 32], sizes = [2, 16, 32], strides = [1, 1, 1]} : vector<2x16x128xf32> to vector<2x16x32xf32>
    "tpu.trace_start"() <{level = 10 : i32, message = "bqd,bkd->bqk"}> : () -> ()
    %cst_99 = arith.constant dense<0.000000e+00> : vector<2x16x16xf32>
    %260 = tpu.matmul %257, %258, %cst_99 {dimension_numbers = #tpu.dot_dimension_numbers<[2], [2], [1], [1], [0, 0, 0, 1, 1, 1], [0], [0]>} : vector<2x16x32xf32>, vector<2x16x32xf32>, vector<2x16x16xf32> -> vector<2x16x16xf32>
    "tpu.trace_stop"() : () -> ()
    %cst_100 = arith.constant 0.176776692 : f32
    %261 = vector.broadcast %cst_100 : f32 to vector<2x16x16xf32>
    %262 = arith.mulf %260, %261 : vector<2x16x16xf32>
    %263 = vector.shape_cast %10 : vector<16x16xf32> to vector<1x16x16xf32>
    %264 = vector.broadcast %263 : vector<1x16x16xf32> to vector<2x16x16xf32>
    %265 = arith.addf %262, %264 : vector<2x16x16xf32>
    %cst_101 = arith.constant dense<0xFF800000> : vector<2x16xf32>
    %266 = vector.multi_reduction <maximumf>, %265, %cst_101 [2] : vector<2x16x16xf32> to vector<2x16xf32>
    %267 = vector.shape_cast %266 : vector<2x16xf32> to vector<2x16x1xf32>
    %268 = vector.broadcast %267 : vector<2x16x1xf32> to vector<2x16x16xf32>
    %269 = arith.subf %265, %268 : vector<2x16x16xf32>
    %270 = math.exp %269 : vector<2x16x16xf32>
    %cst_102 = arith.constant dense<0.000000e+00> : vector<2x16xf32>
    %271 = vector.multi_reduction <add>, %270, %cst_102 [2] : vector<2x16x16xf32> to vector<2x16xf32>
    %272 = vector.shape_cast %271 : vector<2x16xf32> to vector<2x16x1xf32>
    %273 = vector.broadcast %272 : vector<2x16x1xf32> to vector<2x16x16xf32>
    %274 = arith.divf %270, %273 : vector<2x16x16xf32>
    "tpu.trace_start"() <{level = 10 : i32, message = "bqk,bkd->bqd"}> : () -> ()
    %cst_103 = arith.constant dense<0.000000e+00> : vector<2x16x32xf32>
    %275 = tpu.matmul %274, %259, %cst_103 {dimension_numbers = #tpu.dot_dimension_numbers<[2], [1], [1], [2], [0, 0, 0, 1, 1, 2], [0], [0]>} : vector<2x16x16xf32>, vector<2x16x32xf32>, vector<2x16x32xf32> -> vector<2x16x32xf32>
    "tpu.trace_stop"() : () -> ()
    %276 = vector.extract_strided_slice %235 {offsets = [0, 0, 64], sizes = [2, 16, 32], strides = [1, 1, 1]} : vector<2x16x128xf32> to vector<2x16x32xf32>
    %277 = vector.extract_strided_slice %236 {offsets = [0, 0, 64], sizes = [2, 16, 32], strides = [1, 1, 1]} : vector<2x16x128xf32> to vector<2x16x32xf32>
    %278 = vector.extract_strided_slice %237 {offsets = [0, 0, 64], sizes = [2, 16, 32], strides = [1, 1, 1]} : vector<2x16x128xf32> to vector<2x16x32xf32>
    "tpu.trace_start"() <{level = 10 : i32, message = "bqd,bkd->bqk"}> : () -> ()
    %cst_104 = arith.constant dense<0.000000e+00> : vector<2x16x16xf32>
    %279 = tpu.matmul %276, %277, %cst_104 {dimension_numbers = #tpu.dot_dimension_numbers<[2], [2], [1], [1], [0, 0, 0, 1, 1, 1], [0], [0]>} : vector<2x16x32xf32>, vector<2x16x32xf32>, vector<2x16x16xf32> -> vector<2x16x16xf32>
    "tpu.trace_stop"() : () -> ()
    %cst_105 = arith.constant 0.176776692 : f32
    %280 = vector.broadcast %cst_105 : f32 to vector<2x16x16xf32>
    %281 = arith.mulf %279, %280 : vector<2x16x16xf32>
    %282 = vector.shape_cast %10 : vector<16x16xf32> to vector<1x16x16xf32>
    %283 = vector.broadcast %282 : vector<1x16x16xf32> to vector<2x16x16xf32>
    %284 = arith.addf %281, %283 : vector<2x16x16xf32>
    %cst_106 = arith.constant dense<0xFF800000> : vector<2x16xf32>
    %285 = vector.multi_reduction <maximumf>, %284, %cst_106 [2] : vector<2x16x16xf32> to vector<2x16xf32>
    %286 = vector.shape_cast %285 : vector<2x16xf32> to vector<2x16x1xf32>
    %287 = vector.broadcast %286 : vector<2x16x1xf32> to vector<2x16x16xf32>
    %288 = arith.subf %284, %287 : vector<2x16x16xf32>
    %289 = math.exp %288 : vector<2x16x16xf32>
    %cst_107 = arith.constant dense<0.000000e+00> : vector<2x16xf32>
    %290 = vector.multi_reduction <add>, %289, %cst_107 [2] : vector<2x16x16xf32> to vector<2x16xf32>
    %291 = vector.shape_cast %290 : vector<2x16xf32> to vector<2x16x1xf32>
    %292 = vector.broadcast %291 : vector<2x16x1xf32> to vector<2x16x16xf32>
    %293 = arith.divf %289, %292 : vector<2x16x16xf32>
    "tpu.trace_start"() <{level = 10 : i32, message = "bqk,bkd->bqd"}> : () -> ()
    %cst_108 = arith.constant dense<0.000000e+00> : vector<2x16x32xf32>
    %294 = tpu.matmul %293, %278, %cst_108 {dimension_numbers = #tpu.dot_dimension_numbers<[2], [1], [1], [2], [0, 0, 0, 1, 1, 2], [0], [0]>} : vector<2x16x16xf32>, vector<2x16x32xf32>, vector<2x16x32xf32> -> vector<2x16x32xf32>
    "tpu.trace_stop"() : () -> ()
    %295 = vector.extract_strided_slice %235 {offsets = [0, 0, 96], sizes = [2, 16, 32], strides = [1, 1, 1]} : vector<2x16x128xf32> to vector<2x16x32xf32>
    %296 = vector.extract_strided_slice %236 {offsets = [0, 0, 96], sizes = [2, 16, 32], strides = [1, 1, 1]} : vector<2x16x128xf32> to vector<2x16x32xf32>
    %297 = vector.extract_strided_slice %237 {offsets = [0, 0, 96], sizes = [2, 16, 32], strides = [1, 1, 1]} : vector<2x16x128xf32> to vector<2x16x32xf32>
    "tpu.trace_start"() <{level = 10 : i32, message = "bqd,bkd->bqk"}> : () -> ()
    %cst_109 = arith.constant dense<0.000000e+00> : vector<2x16x16xf32>
    %298 = tpu.matmul %295, %296, %cst_109 {dimension_numbers = #tpu.dot_dimension_numbers<[2], [2], [1], [1], [0, 0, 0, 1, 1, 1], [0], [0]>} : vector<2x16x32xf32>, vector<2x16x32xf32>, vector<2x16x16xf32> -> vector<2x16x16xf32>
    "tpu.trace_stop"() : () -> ()
    %cst_110 = arith.constant 0.176776692 : f32
    %299 = vector.broadcast %cst_110 : f32 to vector<2x16x16xf32>
    %300 = arith.mulf %298, %299 : vector<2x16x16xf32>
    %301 = vector.shape_cast %10 : vector<16x16xf32> to vector<1x16x16xf32>
    %302 = vector.broadcast %301 : vector<1x16x16xf32> to vector<2x16x16xf32>
    %303 = arith.addf %300, %302 : vector<2x16x16xf32>
    %cst_111 = arith.constant dense<0xFF800000> : vector<2x16xf32>
    %304 = vector.multi_reduction <maximumf>, %303, %cst_111 [2] : vector<2x16x16xf32> to vector<2x16xf32>
    %305 = vector.shape_cast %304 : vector<2x16xf32> to vector<2x16x1xf32>
    %306 = vector.broadcast %305 : vector<2x16x1xf32> to vector<2x16x16xf32>
    %307 = arith.subf %303, %306 : vector<2x16x16xf32>
    %308 = math.exp %307 : vector<2x16x16xf32>
    %cst_112 = arith.constant dense<0.000000e+00> : vector<2x16xf32>
    %309 = vector.multi_reduction <add>, %308, %cst_112 [2] : vector<2x16x16xf32> to vector<2x16xf32>
    %310 = vector.shape_cast %309 : vector<2x16xf32> to vector<2x16x1xf32>
    %311 = vector.broadcast %310 : vector<2x16x1xf32> to vector<2x16x16xf32>
    %312 = arith.divf %308, %311 : vector<2x16x16xf32>
    "tpu.trace_start"() <{level = 10 : i32, message = "bqk,bkd->bqd"}> : () -> ()
    %cst_113 = arith.constant dense<0.000000e+00> : vector<2x16x32xf32>
    %313 = tpu.matmul %312, %297, %cst_113 {dimension_numbers = #tpu.dot_dimension_numbers<[2], [1], [1], [2], [0, 0, 0, 1, 1, 2], [0], [0]>} : vector<2x16x16xf32>, vector<2x16x32xf32>, vector<2x16x32xf32> -> vector<2x16x32xf32>
    "tpu.trace_stop"() : () -> ()
    %314 = tpu.concatenate %256, %275, %294, %313 in 2 : vector<2x16x32xf32>, vector<2x16x32xf32>, vector<2x16x32xf32>, vector<2x16x32xf32> -> vector<2x16x128xf32>
    %c1_114 = arith.constant 1 : index
    %c0_115 = arith.constant 0 : index
    %c0_116 = arith.constant 0 : index
    %315 = vector.load %arg8[%c1_114, %c0_115, %c0_116] : memref<2x128x128xf32, #tpu.memory_space<vmem>>, vector<1x128x128xf32>
    %316 = vector.shape_cast %315 : vector<1x128x128xf32> to vector<128x128xf32>
    %c1_117 = arith.constant 1 : index
    %c0_118 = arith.constant 0 : index
    %c0_119 = arith.constant 0 : index
    %317 = vector.load %arg9[%c1_117, %c0_118, %c0_119] : memref<2x1x128xf32, #tpu.memory_space<vmem>>, vector<1x1x128xf32>
    %318 = vector.shape_cast %317 : vector<1x1x128xf32> to vector<1x128xf32>
    %319 = vector.shape_cast %314 : vector<2x16x128xf32> to vector<32x128xf32>
    %cst_120 = arith.constant dense<0.000000e+00> : vector<32x128xf32>
    %320 = tpu.matmul %319, %316, %cst_120 {dimension_numbers = #tpu.dot_dimension_numbers<[1], [0], [0], [1], [0, 0, 1, 1], [], []>} : vector<32x128xf32>, vector<128x128xf32>, vector<32x128xf32> -> vector<32x128xf32>
    %321 = vector.shape_cast %320 : vector<32x128xf32> to vector<2x16x128xf32>
    %322 = vector.shape_cast %318 : vector<1x128xf32> to vector<1x1x128xf32>
    %323 = vector.broadcast %322 : vector<1x1x128xf32> to vector<2x16x128xf32>
    %324 = arith.addf %321, %323 : vector<2x16x128xf32>
    %325 = arith.addf %196, %324 : vector<2x16x128xf32>
    %c1_121 = arith.constant 1 : index
    %c0_122 = arith.constant 0 : index
    %c0_123 = arith.constant 0 : index
    %326 = vector.load %arg10[%c1_121, %c0_122, %c0_123] : memref<2x1x128xf32, #tpu.memory_space<vmem>>, vector<1x1x128xf32>
    %327 = vector.shape_cast %326 : vector<1x1x128xf32> to vector<1x128xf32>
    %c1_124 = arith.constant 1 : index
    %c0_125 = arith.constant 0 : index
    %c0_126 = arith.constant 0 : index
    %328 = vector.load %arg11[%c1_124, %c0_125, %c0_126] : memref<2x1x128xf32, #tpu.memory_space<vmem>>, vector<1x1x128xf32>
    %329 = vector.shape_cast %328 : vector<1x1x128xf32> to vector<1x128xf32>
    %cst_127 = arith.constant dense<0.000000e+00> : vector<2x16xf32>
    %330 = vector.multi_reduction <add>, %325, %cst_127 [2] : vector<2x16x128xf32> to vector<2x16xf32>
    %331 = vector.shape_cast %330 : vector<2x16xf32> to vector<2x16x1xf32>
    %cst_128 = arith.constant 1.280000e+02 : f32
    %332 = vector.broadcast %cst_128 : f32 to vector<2x16x1xf32>
    %333 = arith.divf %331, %332 : vector<2x16x1xf32>
    %334 = vector.broadcast %333 : vector<2x16x1xf32> to vector<2x16x128xf32>
    %335 = arith.subf %325, %334 : vector<2x16x128xf32>
    %336 = arith.mulf %335, %335 : vector<2x16x128xf32>
    %cst_129 = arith.constant dense<0.000000e+00> : vector<2x16xf32>
    %337 = vector.multi_reduction <add>, %336, %cst_129 [2] : vector<2x16x128xf32> to vector<2x16xf32>
    %338 = vector.shape_cast %337 : vector<2x16xf32> to vector<2x16x1xf32>
    %cst_130 = arith.constant 1.280000e+02 : f32
    %339 = vector.broadcast %cst_130 : f32 to vector<2x16x1xf32>
    %340 = arith.divf %338, %339 : vector<2x16x1xf32>
    %341 = vector.broadcast %333 : vector<2x16x1xf32> to vector<2x16x128xf32>
    %342 = arith.subf %325, %341 : vector<2x16x128xf32>
    %cst_131 = arith.constant 9.99999974E-6 : f32
    %343 = vector.broadcast %cst_131 : f32 to vector<2x16x1xf32>
    %344 = arith.addf %340, %343 : vector<2x16x1xf32>
    %345 = math.rsqrt %344 : vector<2x16x1xf32>
    %346 = vector.broadcast %345 : vector<2x16x1xf32> to vector<2x16x128xf32>
    %347 = arith.mulf %342, %346 : vector<2x16x128xf32>
    %348 = vector.shape_cast %327 : vector<1x128xf32> to vector<1x1x128xf32>
    %349 = vector.broadcast %348 : vector<1x1x128xf32> to vector<2x16x128xf32>
    %350 = arith.mulf %347, %349 : vector<2x16x128xf32>
    %351 = vector.shape_cast %329 : vector<1x128xf32> to vector<1x1x128xf32>
    %352 = vector.broadcast %351 : vector<1x1x128xf32> to vector<2x16x128xf32>
    %353 = arith.addf %350, %352 : vector<2x16x128xf32>
    %c1_132 = arith.constant 1 : index
    %c0_133 = arith.constant 0 : index
    %c0_134 = arith.constant 0 : index
    %354 = vector.load %arg12[%c1_132, %c0_133, %c0_134] : memref<2x128x512xf32, #tpu.memory_space<vmem>>, vector<1x128x512xf32>
    %355 = vector.shape_cast %354 : vector<1x128x512xf32> to vector<128x512xf32>
    %c1_135 = arith.constant 1 : index
    %c0_136 = arith.constant 0 : index
    %c0_137 = arith.constant 0 : index
    %356 = vector.load %arg13[%c1_135, %c0_136, %c0_137] : memref<2x1x512xf32, #tpu.memory_space<vmem>>, vector<1x1x512xf32>
    %357 = vector.shape_cast %356 : vector<1x1x512xf32> to vector<1x512xf32>
    %358 = vector.shape_cast %353 : vector<2x16x128xf32> to vector<32x128xf32>
    %cst_138 = arith.constant dense<0.000000e+00> : vector<32x512xf32>
    %359 = tpu.matmul %358, %355, %cst_138 {dimension_numbers = #tpu.dot_dimension_numbers<[1], [0], [0], [1], [0, 0, 1, 1], [], []>} : vector<32x128xf32>, vector<128x512xf32>, vector<32x512xf32> -> vector<32x512xf32>
    %360 = vector.shape_cast %359 : vector<32x512xf32> to vector<2x16x512xf32>
    %361 = vector.shape_cast %357 : vector<1x512xf32> to vector<1x1x512xf32>
    %362 = vector.broadcast %361 : vector<1x1x512xf32> to vector<2x16x512xf32>
    %363 = arith.addf %360, %362 : vector<2x16x512xf32>
    %cst_139 = arith.constant 1.702000e+00 : f32
    %364 = vector.broadcast %cst_139 : f32 to vector<2x16x512xf32>
    %365 = arith.mulf %364, %363 : vector<2x16x512xf32>
    %366 = arith.negf %365 : vector<2x16x512xf32>
    %367 = math.exp %366 : vector<2x16x512xf32>
    %cst_140 = arith.constant 1.000000e+00 : f32
    %368 = vector.broadcast %cst_140 : f32 to vector<2x16x512xf32>
    %369 = arith.addf %368, %367 : vector<2x16x512xf32>
    %370 = arith.divf %368, %369 : vector<2x16x512xf32>
    %371 = arith.mulf %363, %370 : vector<2x16x512xf32>
    %c1_141 = arith.constant 1 : index
    %c0_142 = arith.constant 0 : index
    %c0_143 = arith.constant 0 : index
    %372 = vector.load %arg14[%c1_141, %c0_142, %c0_143] : memref<2x512x128xf32, #tpu.memory_space<vmem>>, vector<1x512x128xf32>
    %373 = vector.shape_cast %372 : vector<1x512x128xf32> to vector<512x128xf32>
    %c1_144 = arith.constant 1 : index
    %c0_145 = arith.constant 0 : index
    %c0_146 = arith.constant 0 : index
    %374 = vector.load %arg15[%c1_144, %c0_145, %c0_146] : memref<2x1x128xf32, #tpu.memory_space<vmem>>, vector<1x1x128xf32>
    %375 = vector.shape_cast %374 : vector<1x1x128xf32> to vector<1x128xf32>
    %376 = vector.shape_cast %371 : vector<2x16x512xf32> to vector<32x512xf32>
    %cst_147 = arith.constant dense<0.000000e+00> : vector<32x128xf32>
    %377 = tpu.matmul %376, %373, %cst_147 {dimension_numbers = #tpu.dot_dimension_numbers<[1], [0], [0], [1], [0, 0, 1, 1], [], []>} : vector<32x512xf32>, vector<512x128xf32>, vector<32x128xf32> -> vector<32x128xf32>
    %378 = vector.shape_cast %377 : vector<32x128xf32> to vector<2x16x128xf32>
    %379 = vector.shape_cast %375 : vector<1x128xf32> to vector<1x1x128xf32>
    %380 = vector.broadcast %379 : vector<1x1x128xf32> to vector<2x16x128xf32>
    %381 = arith.addf %378, %380 : vector<2x16x128xf32>
    %382 = arith.addf %325, %381 : vector<2x16x128xf32>
    %c0_148 = arith.constant 0 : index
    %c0_149 = arith.constant 0 : index
    %383 = vector.load %arg16[%c0_148, %c0_149] : memref<1x128xf32, #tpu.memory_space<vmem>>, vector<1x128xf32>
    %c0_150 = arith.constant 0 : index
    %c0_151 = arith.constant 0 : index
    %384 = vector.load %arg17[%c0_150, %c0_151] : memref<1x128xf32, #tpu.memory_space<vmem>>, vector<1x128xf32>
    %cst_152 = arith.constant dense<0.000000e+00> : vector<2x16xf32>
    %385 = vector.multi_reduction <add>, %382, %cst_152 [2] : vector<2x16x128xf32> to vector<2x16xf32>
    %386 = vector.shape_cast %385 : vector<2x16xf32> to vector<2x16x1xf32>
    %cst_153 = arith.constant 1.280000e+02 : f32
    %387 = vector.broadcast %cst_153 : f32 to vector<2x16x1xf32>
    %388 = arith.divf %386, %387 : vector<2x16x1xf32>
    %389 = vector.broadcast %388 : vector<2x16x1xf32> to vector<2x16x128xf32>
    %390 = arith.subf %382, %389 : vector<2x16x128xf32>
    %391 = arith.mulf %390, %390 : vector<2x16x128xf32>
    %cst_154 = arith.constant dense<0.000000e+00> : vector<2x16xf32>
    %392 = vector.multi_reduction <add>, %391, %cst_154 [2] : vector<2x16x128xf32> to vector<2x16xf32>
    %393 = vector.shape_cast %392 : vector<2x16xf32> to vector<2x16x1xf32>
    %cst_155 = arith.constant 1.280000e+02 : f32
    %394 = vector.broadcast %cst_155 : f32 to vector<2x16x1xf32>
    %395 = arith.divf %393, %394 : vector<2x16x1xf32>
    %396 = vector.broadcast %388 : vector<2x16x1xf32> to vector<2x16x128xf32>
    %397 = arith.subf %382, %396 : vector<2x16x128xf32>
    %cst_156 = arith.constant 9.99999974E-6 : f32
    %398 = vector.broadcast %cst_156 : f32 to vector<2x16x1xf32>
    %399 = arith.addf %395, %398 : vector<2x16x1xf32>
    %400 = math.rsqrt %399 : vector<2x16x1xf32>
    %401 = vector.broadcast %400 : vector<2x16x1xf32> to vector<2x16x128xf32>
    %402 = arith.mulf %397, %401 : vector<2x16x128xf32>
    %403 = vector.shape_cast %383 : vector<1x128xf32> to vector<1x1x128xf32>
    %404 = vector.broadcast %403 : vector<1x1x128xf32> to vector<2x16x128xf32>
    %405 = arith.mulf %402, %404 : vector<2x16x128xf32>
    %406 = vector.shape_cast %384 : vector<1x128xf32> to vector<1x1x128xf32>
    %407 = vector.broadcast %406 : vector<1x1x128xf32> to vector<2x16x128xf32>
    %408 = arith.addf %405, %407 : vector<2x16x128xf32>
    %c2_i32 = arith.constant 2 : i32
    %409 = arith.muli %arg0, %c2_i32 : i32
    %c0_i32 = arith.constant 0 : i32
    %410 = arith.addi %409, %c0_i32 : i32
    %411 = arith.index_cast %410 : i32 to index
    %412 = memref.load %arg1[%411] : memref<2xi32, #tpu.memory_space<smem>>
    %413 = tpu.iota {dimensions = array<i32: 1>} : vector<1x16xi32>
    %414 = vector.broadcast %412 : i32 to vector<1x16xi32>
    %415 = arith.cmpi eq, %413, %414 : vector<1x16xi32>
    %416 = arith.extui %415 : vector<1x16xi1> to vector<1x16xi32>
    %417 = arith.sitofp %416 : vector<1x16xi32> to vector<1x16xf32>
    %c1_i32 = arith.constant 1 : i32
    %418 = arith.addi %409, %c1_i32 : i32
    %419 = arith.index_cast %418 : i32 to index
    %420 = memref.load %arg1[%419] : memref<2xi32, #tpu.memory_space<smem>>
    %421 = tpu.iota {dimensions = array<i32: 1>} : vector<1x16xi32>
    %422 = vector.broadcast %420 : i32 to vector<1x16xi32>
    %423 = arith.cmpi eq, %421, %422 : vector<1x16xi32>
    %424 = arith.extui %423 : vector<1x16xi1> to vector<1x16xi32>
    %425 = arith.sitofp %424 : vector<1x16xi32> to vector<1x16xf32>
    %426 = tpu.concatenate %417, %425 in 0 : vector<1x16xf32>, vector<1x16xf32> -> vector<2x16xf32>
    %427 = vector.shape_cast %426 : vector<2x16xf32> to vector<2x16x1xf32>
    %428 = vector.broadcast %427 : vector<2x16x1xf32> to vector<2x16x128xf32>
    %429 = arith.mulf %428, %408 : vector<2x16x128xf32>
    %cst_157 = arith.constant dense<0.000000e+00> : vector<2x128xf32>
    %430 = vector.multi_reduction <add>, %429, %cst_157 [1] : vector<2x16x128xf32> to vector<2x128xf32>
    %c0_158 = arith.constant 0 : index
    %c0_159 = arith.constant 0 : index
    %431 = vector.load %arg18[%c0_158, %c0_159] : memref<128x128xf32, #tpu.memory_space<vmem>>, vector<128x128xf32>
    %cst_160 = arith.constant dense<0.000000e+00> : vector<2x128xf32>
    %432 = tpu.matmul %430, %431, %cst_160 {dimension_numbers = #tpu.dot_dimension_numbers<[1], [0], [0], [1], [0, 0, 1, 1], [], []>} : vector<2x128xf32>, vector<128x128xf32>, vector<2x128xf32> -> vector<2x128xf32>
    %c0_161 = arith.constant 0 : index
    %c0_162 = arith.constant 0 : index
    %433 = vector.load %arg19[%c0_161, %c0_162] : memref<2x128xf32, #tpu.memory_space<vmem>>, vector<2x128xf32>
    tpu.vector_store %arg19[%c0_161, %c0_162], %432 {strides = array<i32>} : memref<2x128xf32, #tpu.memory_space<vmem>>, vector<2x128xf32>,
    return
  }
  func.func @transform_0(%arg0: i32, %arg1: memref<2xi32, #tpu.memory_space<smem>>) -> (i32, i32, i32) {
    %c0_i32 = arith.constant 0 : i32
    %c0_i32_0 = arith.constant 0 : i32
    %c0_i32_1 = arith.constant 0 : i32
    return %arg0, %c0_i32, %c0_i32_0 : i32, i32, i32
  }
  func.func @transform_1(%arg0: i32, %arg1: memref<2xi32, #tpu.memory_space<smem>>) -> (i32, i32) {
    %c0_i32 = arith.constant 0 : i32
    %c0_i32_0 = arith.constant 0 : i32
    %c0_i32_1 = arith.constant 0 : i32
    return %c0_i32, %c0_i32_0 : i32, i32
  }
  func.func @transform_2(%arg0: i32, %arg1: memref<2xi32, #tpu.memory_space<smem>>) -> (i32, i32, i32) {
    %c0_i32 = arith.constant 0 : i32
    %c0_i32_0 = arith.constant 0 : i32
    %c0_i32_1 = arith.constant 0 : i32
    %c0_i32_2 = arith.constant 0 : i32
    return %c0_i32, %c0_i32_0, %c0_i32_1 : i32, i32, i32
  }
  func.func @transform_3(%arg0: i32, %arg1: memref<2xi32, #tpu.memory_space<smem>>) -> (i32, i32, i32) {
    %c0_i32 = arith.constant 0 : i32
    %c0_i32_0 = arith.constant 0 : i32
    %c0_i32_1 = arith.constant 0 : i32
    %c0_i32_2 = arith.constant 0 : i32
    return %c0_i32, %c0_i32_0, %c0_i32_1 : i32, i32, i32
  }
  func.func @transform_4(%arg0: i32, %arg1: memref<2xi32, #tpu.memory_space<smem>>) -> (i32, i32, i32) {
    %c0_i32 = arith.constant 0 : i32
    %c0_i32_0 = arith.constant 0 : i32
    %c0_i32_1 = arith.constant 0 : i32
    %c0_i32_2 = arith.constant 0 : i32
    return %c0_i32, %c0_i32_0, %c0_i32_1 : i32, i32, i32
  }
  func.func @transform_5(%arg0: i32, %arg1: memref<2xi32, #tpu.memory_space<smem>>) -> (i32, i32, i32) {
    %c0_i32 = arith.constant 0 : i32
    %c0_i32_0 = arith.constant 0 : i32
    %c0_i32_1 = arith.constant 0 : i32
    %c0_i32_2 = arith.constant 0 : i32
    return %c0_i32, %c0_i32_0, %c0_i32_1 : i32, i32, i32
  }
  func.func @transform_6(%arg0: i32, %arg1: memref<2xi32, #tpu.memory_space<smem>>) -> (i32, i32, i32) {
    %c0_i32 = arith.constant 0 : i32
    %c0_i32_0 = arith.constant 0 : i32
    %c0_i32_1 = arith.constant 0 : i32
    %c0_i32_2 = arith.constant 0 : i32
    return %c0_i32, %c0_i32_0, %c0_i32_1 : i32, i32, i32
  }
  func.func @transform_7(%arg0: i32, %arg1: memref<2xi32, #tpu.memory_space<smem>>) -> (i32, i32, i32) {
    %c0_i32 = arith.constant 0 : i32
    %c0_i32_0 = arith.constant 0 : i32
    %c0_i32_1 = arith.constant 0 : i32
    %c0_i32_2 = arith.constant 0 : i32
    return %c0_i32, %c0_i32_0, %c0_i32_1 : i32, i32, i32
  }
  func.func @transform_8(%arg0: i32, %arg1: memref<2xi32, #tpu.memory_space<smem>>) -> (i32, i32, i32) {
    %c0_i32 = arith.constant 0 : i32
    %c0_i32_0 = arith.constant 0 : i32
    %c0_i32_1 = arith.constant 0 : i32
    %c0_i32_2 = arith.constant 0 : i32
    return %c0_i32, %c0_i32_0, %c0_i32_1 : i32, i32, i32
  }
  func.func @transform_9(%arg0: i32, %arg1: memref<2xi32, #tpu.memory_space<smem>>) -> (i32, i32, i32) {
    %c0_i32 = arith.constant 0 : i32
    %c0_i32_0 = arith.constant 0 : i32
    %c0_i32_1 = arith.constant 0 : i32
    %c0_i32_2 = arith.constant 0 : i32
    return %c0_i32, %c0_i32_0, %c0_i32_1 : i32, i32, i32
  }
  func.func @transform_10(%arg0: i32, %arg1: memref<2xi32, #tpu.memory_space<smem>>) -> (i32, i32, i32) {
    %c0_i32 = arith.constant 0 : i32
    %c0_i32_0 = arith.constant 0 : i32
    %c0_i32_1 = arith.constant 0 : i32
    %c0_i32_2 = arith.constant 0 : i32
    return %c0_i32, %c0_i32_0, %c0_i32_1 : i32, i32, i32
  }
  func.func @transform_11(%arg0: i32, %arg1: memref<2xi32, #tpu.memory_space<smem>>) -> (i32, i32, i32) {
    %c0_i32 = arith.constant 0 : i32
    %c0_i32_0 = arith.constant 0 : i32
    %c0_i32_1 = arith.constant 0 : i32
    %c0_i32_2 = arith.constant 0 : i32
    return %c0_i32, %c0_i32_0, %c0_i32_1 : i32, i32, i32
  }
  func.func @transform_12(%arg0: i32, %arg1: memref<2xi32, #tpu.memory_space<smem>>) -> (i32, i32, i32) {
    %c0_i32 = arith.constant 0 : i32
    %c0_i32_0 = arith.constant 0 : i32
    %c0_i32_1 = arith.constant 0 : i32
    %c0_i32_2 = arith.constant 0 : i32
    return %c0_i32, %c0_i32_0, %c0_i32_1 : i32, i32, i32
  }
  func.func @transform_13(%arg0: i32, %arg1: memref<2xi32, #tpu.memory_space<smem>>) -> (i32, i32, i32) {
    %c0_i32 = arith.constant 0 : i32
    %c0_i32_0 = arith.constant 0 : i32
    %c0_i32_1 = arith.constant 0 : i32
    %c0_i32_2 = arith.constant 0 : i32
    return %c0_i32, %c0_i32_0, %c0_i32_1 : i32, i32, i32
  }
  func.func @transform_14(%arg0: i32, %arg1: memref<2xi32, #tpu.memory_space<smem>>) -> (i32, i32) {
    %c0_i32 = arith.constant 0 : i32
    %c0_i32_0 = arith.constant 0 : i32
    %c0_i32_1 = arith.constant 0 : i32
    return %c0_i32, %c0_i32_0 : i32, i32
  }
  func.func @transform_15(%arg0: i32, %arg1: memref<2xi32, #tpu.memory_space<smem>>) -> (i32, i32) {
    %c0_i32 = arith.constant 0 : i32
    %c0_i32_0 = arith.constant 0 : i32
    %c0_i32_1 = arith.constant 0 : i32
    return %c0_i32, %c0_i32_0 : i32, i32
  }
  func.func @transform_16(%arg0: i32, %arg1: memref<2xi32, #tpu.memory_space<smem>>) -> (i32, i32) {
    %c0_i32 = arith.constant 0 : i32
    %c0_i32_0 = arith.constant 0 : i32
    %c0_i32_1 = arith.constant 0 : i32
    return %c0_i32, %c0_i32_0 : i32, i32
  }
  func.func @transform_17(%arg0: i32, %arg1: memref<2xi32, #tpu.memory_space<smem>>) -> (i32, i32) {
    %c0_i32 = arith.constant 0 : i32
    %c0_i32_0 = arith.constant 0 : i32
    return %arg0, %c0_i32 : i32, i32
  }
}

</mosaic_0001>

<bundles_post_ra>
// kernel: tpu_custom_call.1
= control target key start
LH: loop header
LB: loop body
LE: loop exit
PB: predicated region body
PF: predicated region fallthrough
CT: control target
= control target key end

     0   :  { %s10067_s0 = inlined_call_operand.hbm [shape: s32[2], index: 0, kind: input, shape index: {}]   ;;  %s10068_s1 = inlined_call_operand.hbm [shape: f32[2,16,128], index: 1, kind: input, shape index: {}]   ;;  %s10069_s2 = inlined_call_operand.hbm [shape: f32[16,128], index: 2, kind: input, shape index: {}]   ;;  %s10070_s3 = inlined_call_operand.hbm [shape: f32[2,1,128], index: 3, kind: input, shape index: {}]   ;;  %s10071_s4 = inlined_call_operand.hbm [shape: f32[2,1,128], index: 4, kind: input, shape index: {}]   ;;  %s10072_s5 = inlined_call_operand.hbm [shape: f32[2,128,384], index: 5, kind: input, shape index: {}]   ;;  %s10073_s6 = inlined_call_operand.hbm [shape: f32[2,1,384], index: 6, kind: input, shape index: {}]   ;;  %s10074_s7 = inlined_call_operand.hbm [shape: f32[2,128,128], index: 7, kind: input, shape index: {}]   ;;  %s10075_s8 = inlined_call_operand.hbm [shape: f32[2,1,128], index: 8, kind: input, shape index: {}]   ;;  %s10076_s9 = inlined_call_operand.hbm [shape: f32[2,1,128], index: 9, kind: input, shape index: {}]   ;;  %s10077_s10 = inlined_call_operand.hbm [shape: f32[2,1,128], index: 10, kind: input, shape index: {}]   ;;  %s10078_s11 = inlined_call_operand.hbm [shape: f32[2,128,512], index: 11, kind: input, shape index: {}]   ;;  %s10079_s12 = inlined_call_operand.hbm [shape: f32[2,1,512], index: 12, kind: input, shape index: {}]   ;;  %s10080_s13 = inlined_call_operand.hbm [shape: f32[2,512,128], index: 13, kind: input, shape index: {}]   ;;  %s10081_s14 = inlined_call_operand.hbm [shape: f32[2,1,128], index: 14, kind: input, shape index: {}]   ;;  %s10082_s15 = inlined_call_operand.hbm [shape: f32[1,128], index: 15, kind: input, shape index: {}]   ;;  %s10083_s16 = inlined_call_operand.hbm [shape: f32[1,128], index: 16, kind: input, shape index: {}]   ;;  %s10084_s17 = inlined_call_operand.hbm [shape: f32[128,128], index: 17, kind: input, shape index: {}]   ;;  %s10085_s18 = inlined_call_operand.hbm [shape: f32[2,128], index: 18, kind: output, shape index: {}]  }
   0x1   :  { %10095 = sst [smem:[#allocation43_spill]] %s10067_s0 }
   0x2   :  { %10096 = sst [smem:[#allocation44_spill]] %s10068_s1  ;;  %s10100_s29 = sld [smem:[#allocation43_spill]] }
   0x3   :  { %10097 = sst [smem:[#allocation45_spill]] %s10069_s2 }
   0x4   :  { %10098 = sst [smem:[#allocation46_spill]] %s10078_s11 }
   0x5   :  { %10099 = sst [smem:[#allocation47_spill]] %s10085_s18 }
   0x8   :  { %s8324_s11 = scalar_lea.hbm %s10100_s29, 16 }
   0x9   :  { %p8325_p0 = scmp.ne.s32.totalorder %s10100_s29, %s8324_s11  ;;  %p8328_p1 = scmp.lt.u32.totalorder %s8324_s11, %s10100_s29 }
   0xb   :  { %p8330_p2 = pnand %p8328_p1, %p8325_p0 }
   0xd   :  { %8333 = shalt.err (!%p8330_p2)  }
   0xe   :  { %s8752_s20 = smov [#allocation3]  }
   0xf   :  { %24 = dma.hbm_to_smem %s10100_s29, 16, %s8752_s20, [#allocation2] }
  0x10   :  { %8730 = dma.done.wait [#allocation2], 16 }
  0x11   :  { %8731 = vsyncadd [#allocation2], 4294967280 }
  0x12   :  { %26 = sfence }
  0x13   :  { %27 = vsyncpa [#allocation5], 0 }
  0x14   :  { %28 = vsyncpa [#allocation8], 0 }
  0x15   :  { %29 = vsyncpa [#allocation11], 0 }
  0x16   :  { %30 = vsyncpa [#allocation14], 0 }
  0x17   :  { %31 = vsyncpa [#allocation17], 0 }
  0x18   :  { %32 = vsyncpa [#allocation20], 0 }
  0x19   :  { %33 = vsyncpa [#allocation23], 0 }
  0x1a   :  { %34 = vsyncpa [#allocation26], 0 }
  0x1b   :  { %35 = vsyncpa [#allocation29], 0 }
  0x1c   :  { %36 = vsyncpa [#allocation6], 0  ;;  %s8753_s11 = smov [#allocation7]   ;;  %s10101_s25 = sld [smem:[#allocation45_spill]] }
  0x1d   :  { %s54_s2 = sshll.u32 %s8753_s11, 4  ;;  %s55_s2 = int_to_ptr.vmem [resolvable:$true] %s54_s2 }
  0x22   :  { %s8334_s26 = scalar_lea.hbm %s10101_s25, 256 }
  0x23   :  { %p8335_p3 = scmp.ne.s32.totalorder %s10101_s25, %s8334_s26  ;;  %p8338_p4 = scmp.lt.u32.totalorder %s8334_s26, %s10101_s25 }
  0x25   :  { %p8340_p5 = pnand %p8338_p4, %p8335_p3 }
  0x27   :  { %8343 = shalt.err (!%p8340_p5)
}
  0x28   :  { %s8344_s0 = scalar_lea.vmem %s55_s2, 256  ;;  %p8349_p7 = scmp.lt.s32.totalorder %s55_s2, %s55_s2 }
  0x29   :  { %p8345_p6 = scmp.ne.s32.totalorder %s55_s2, %s8344_s0  ;;  %p8350_p8 = scmp.lt.s32.totalorder %s8344_s0, %s8344_s0 }
  0x2b   :  { %p8351_p9 = por %p8350_p8, %p8349_p7 }
  0x2d   :  { %p8352_p10 = pnand %p8351_p9, %p8345_p6 }
  0x2f   :  { %8355 = shalt.err (!%p8352_p10)
}
  0x30   :  { %s10091_s19 = smov 128   ;;  %s10093_s1 = smov 8  }
  0x31   :  { %60 = dma.hbm_to_vmem [thread:$0]  %s10101_s25, 256, %s55_s2, [#allocation8], %s10091_s19, %s10091_s19, %s10093_s1  }
  0x32   :  { %s8756_s22 = smov [#allocation10]   ;;  %s8757_s23 = smov [#allocation13]  }
  0x33   :  { %s78_s11 = sshll.u32 %s8756_s22, 4  ;;  %s102_s24 = sshll.u32 %s8757_s23, 4  ;;  %s79_s11 = int_to_ptr.vmem [resolvable:$true] %s78_s11  ;;  %s103_s24 = int_to_ptr.vmem [resolvable:$true] %s102_s24 }
  0x34   :  { %s8356_s28 = scalar_lea.hbm %s10071_s4, 32 }
  0x35   :  { %p8357_p11 = scmp.ne.s32.totalorder %s10071_s4, %s8356_s28  ;;  %p8360_p12 = scmp.lt.u32.totalorder %s8356_s28, %s10071_s4 }
  0x37   :  { %p8362_p13 = pnand %p8360_p12, %p8357_p11 }
  0x39   :  { %8365 = shalt.err (!%p8362_p13)
}
  0x3a   :  { %s8366_s2 = scalar_lea.vmem %s79_s11, 32  ;;  %p8371_p1 = scmp.lt.s32.totalorder %s79_s11, %s79_s11 }
  0x3b   :  { %p8367_p0 = scmp.ne.s32.totalorder %s79_s11, %s8366_s2  ;;  %p8372_p2 = scmp.lt.s32.totalorder %s8366_s2, %s8366_s2 }
  0x3d   :  { %p8373_p3 = por %p8372_p2, %p8371_p1 }
  0x3f   :  { %p8374_p4 = pnand %p8373_p3, %p8367_p0 }
  0x41   :  { %8377 = shalt.err (!%p8374_p4)
}
  0x42   :  { %s8758_s25 = smov 16   ;;  %s8759_s20 = smov 1  }
  0x43   :  { %84 = dma.hbm_to_vmem [thread:$0]  %s10071_s4, 32, %s79_s11, [#allocation11], %s8758_s25, %s8758_s25, %s8759_s20  }
  0x44   :  { %s8378_s26 = scalar_lea.hbm %s10073_s6, 96 }
  0x45   :  { %p8379_p5 = scmp.ne.s32.totalorder %s10073_s6, %s8378_s26  ;;  %p8382_p6 = scmp.lt.u32.totalorder %s8378_s26, %s10073_s6 }
  0x47   :  { %p8384_p7 = pnand %p8382_p6, %p8379_p5 }
  0x49   :  { %8387 = shalt.err (!%p8384_p7)
}
  0x4a   :  { %s8388_s0 = scalar_lea.vmem %s103_s24, 96  ;;  %p8393_p9 = scmp.lt.s32.totalorder %s103_s24, %s103_s24 }
  0x4b   :  { %p8389_p8 = scmp.ne.s32.totalorder %s103_s24, %s8388_s0  ;;  %p8394_p10 = scmp.lt.s32.totalorder %s8388_s0, %s8388_s0 }
  0x4d   :  { %p8395_p11 = por %p8394_p10, %p8393_p9 }
  0x4f   :  { %p8396_p12 = pnand %p8395_p11, %p8389_p8 }
  0x51   :  { %8399 = shalt.err (!%p8396_p12)
}
  0x52   :  { %s8760_s4 = smov 48   ;;  %s8761_s11 = smov 3  }
  0x53   :  { %108 = dma.hbm_to_vmem [thread:$0]  %s10073_s6, 96, %s103_s24, [#allocation14], %s8760_s4, %s8760_s4, %s8761_s11  }
  0x54   :  { %s8762_s22 = smov [#allocation16]   ;;  %s8763_s23 = smov [#allocation19]  }
  0x55   :  { %s126_s18 = sshll.u32 %s8762_s22, 4  ;;  %s150_s26 = sshll.u32 %s8763_s23, 4  ;;  %s127_s18 = int_to_ptr.vmem [resolvable:$true] %s126_s18  ;;  %s151_s26 = int_to_ptr.vmem [resolvable:$true] %s150_s26 }
  0x56   :  { %s8400_s29 = scalar_lea.hbm %s10075_s8, 32 }
  0x57   :  { %p8401_p13 = scmp.ne.s32.totalorder %s10075_s8, %s8400_s29  ;;  %p8404_p0 = scmp.lt.u32.totalorder %s8400_s29, %s10075_s8 }
  0x59   :  { %p8406_p1 = pnand %p8404_p0, %p8401_p13 }
  0x5b   :  { %8409 = shalt.err (!%p8406_p1)
}
  0x5c   :  { %s8410_s6 = scalar_lea.vmem %s127_s18, 32  ;;  %p8415_p3 = scmp.lt.s32.totalorder %s127_s18, %s127_s18 }
  0x5d   :  { %p8411_p2 = scmp.ne.s32.totalorder %s127_s18, %s8410_s6  ;;  %p8416_p4 = scmp.lt.s32.totalorder %s8410_s6, %s8410_s6 }
  0x5f   :  { %p8417_p5 = por %p8416_p4, %p8415_p3 }
  0x61   :  { %p8418_p6 = pnand %p8417_p5, %p8411_p2 }
  0x63   :  { %8421 = shalt.err (!%p8418_p6)
}
  0x64   :  { %132 = dma.hbm_to_vmem [thread:$0]  %s10075_s8, 32, %s127_s18, [#allocation17], %s8758_s25, %s8758_s25, %s8759_s20  }
  0x65   :  { %s8422_s1 = scalar_lea.hbm %s10077_s10, 32 }
  0x66   :  { %p8423_p7 = scmp.ne.s32.totalorder %s10077_s10, %s8422_s1  ;;  %p8426_p8 = scmp.lt.u32.totalorder %s8422_s1, %s10077_s10 }
  0x68   :  { %p8428_p9 = pnand %p8426_p8, %p8423_p7 }
  0x6a   :  { %8431 = shalt.err (!%p8428_p9)
}
  0x6b   :  { %s8432_s27 = scalar_lea.vmem %s151_s26, 32  ;;  %p8437_p11 = scmp.lt.s32.totalorder %s151_s26, %s151_s26 }
  0x6c   :  { %p8433_p10 = scmp.ne.s32.totalorder %s151_s26, %s8432_s27  ;;  %p8438_p12 = scmp.lt.s32.totalorder %s8432_s27, %s8432_s27 }
  0x6e   :  { %p8439_p13 = por %p8438_p12, %p8437_p11 }
  0x70   :  { %p8440_p0 = pnand %p8439_p13, %p8433_p10 }
  0x72   :  { %8443 = shalt.err (!%p8440_p0)
}
  0x73   :  { %156 = dma.hbm_to_vmem [thread:$0]  %s10077_s10, 32, %s151_s26, [#allocation20], %s8758_s25, %s8758_s25, %s8759_s20  }
  0x74   :  { %s8764_s28 = smov [#allocation22]   ;;  %s8444_s6 = scalar_lea.hbm %s10079_s12, 128 }
  0x75   :  { %s174_s29 = sshll.u32 %s8764_s28, 4  ;;  %p8445_p1 = scmp.ne.s32.totalorder %s10079_s12, %s8444_s6  ;;  %s175_s29 = int_to_ptr.vmem [resolvable:$true] %s174_s29 }
  0x76   :  { %p8448_p2 = scmp.lt.u32.totalorder %s8444_s6, %s10079_s12 }
  0x78   :  { %p8450_p3 = pnand %p8448_p2, %p8445_p1 }
  0x7a   :  { %8453 = shalt.err (!%p8450_p3)
}
  0x7b   :  { %s8454_s1 = scalar_lea.vmem %s175_s29, 128  ;;  %p8459_p5 = scmp.lt.s32.totalorder %s175_s29, %s175_s29 }
  0x7c   :  { %p8455_p4 = scmp.ne.s32.totalorder %s175_s29, %s8454_s1  ;;  %p8460_p6 = scmp.lt.s32.totalorder %s8454_s1, %s8454_s1 }
  0x7e   :  { %p8461_p7 = por %p8460_p6, %p8459_p5 }
  0x80   :  { %p8462_p8 = pnand %p8461_p7, %p8455_p4 }
  0x82   :  { %8465 = shalt.err (!%p8462_p8)
}
  0x83   :  { %s8765_s10 = smov 64   ;;  %s8766_s26 = smov 4  }
  0x84   :  { %180 = dma.hbm_to_vmem [thread:$0]  %s10079_s12, 128, %s175_s29, [#allocation23], %s8765_s10, %s8765_s10, %s8766_s26  }
  0x85   :  { %s8767_s22 = smov [#allocation25]   ;;  %s8768_s27 = smov [#allocation28]  }
  0x86   :  { %s198_s23 = sshll.u32 %s8767_s22, 4  ;;  %s221_s8 = sshll.u32 %s8768_s27, 4  ;;  %s199_s23 = int_to_ptr.vmem [resolvable:$true] %s198_s23  ;;  %s222_s8 = int_to_ptr.vmem [resolvable:$true] %s221_s8 }
  0x87   :  { %s8466_s30 = scalar_lea.hbm %s10081_s14, 32 }
  0x88   :  { %p8467_p9 = scmp.ne.s32.totalorder %s10081_s14, %s8466_s30  ;;  %p8470_p10 = scmp.lt.u32.totalorder %s8466_s30, %s10081_s14 }
  0x8a   :  { %p8472_p11 = pnand %p8470_p10, %p8467_p9 }
  0x8c   :  { %8475 = shalt.err (!%p8472_p11)
}
  0x8d   :  { %s8476_s12 = scalar_lea.vmem %s199_s23, 32  ;;  %p8481_p13 = scmp.lt.s32.totalorder %s199_s23, %s199_s23 }
  0x8e   :  { %p8477_p12 = scmp.ne.s32.totalorder %s199_s23, %s8476_s12  ;;  %p8482_p0 = scmp.lt.s32.totalorder %s8476_s12, %s8476_s12 }
  0x90   :  { %p8483_p1 = por %p8482_p0, %p8481_p13 }
  0x92   :  { %p8484_p2 = pnand %p8483_p1, %p8477_p12 }
  0x94   :  { %8487 = shalt.err (!%p8484_p2)
}
  0x95   :  { %204 = dma.hbm_to_vmem [thread:$0]  %s10081_s14, 32, %s199_s23, [#allocation26], %s8758_s25, %s8758_s25, %s8759_s20  }
  0x96   :  { %s8488_s26 = scalar_lea.hbm %s10083_s16, 16 }
  0x97   :  { %p8489_p3 = scmp.ne.s32.totalorder %s10083_s16, %s8488_s26  ;;  %p8492_p4 = scmp.lt.u32.totalorder %s8488_s26, %s10083_s16 }
  0x99   :  { %p8494_p5 = pnand %p8492_p4, %p8489_p3 }
  0x9b   :  { %8497 = shalt.err (!%p8494_p5)
}
  0x9c   :  { %s8498_s18 = scalar_lea.vmem %s222_s8, 16  ;;  %s8502_s28 = scalar_lea.vmem %s222_s8, 32 }
  0x9d   :  { %p8499_p6 = scmp.ne.s32.totalorder %s222_s8, %s8498_s18  ;;  %p8503_p7 = scmp.lt.s32.totalorder %s222_s8, %s222_s8 }
  0x9e   :  { %p8504_p8 = scmp.lt.s32.totalorder %s8502_s28, %s8498_s18 }
  0xa0   :  { %p8505_p9 = por %p8504_p8, %p8503_p7 }
  0xa2   :  { %p8506_p10 = pnand %p8505_p9, %p8499_p6 }
  0xa4   :  { %8509 = shalt.err (!%p8506_p10)
}
  0xa5   :  { %224 = dma.hbm_to_vmem [thread:$0]  %s10083_s16, 16, %s222_s8, [#allocation29]  }
  0xa6   :  { %s8769_s30 = smov [#allocation4]   ;;  %s8770_s6 = smov [#allocation9]  }
  0xa7   :  { %s42_s0 = sshll.u32 %s8769_s30, 4  ;;  %s66_s24 = sshll.u32 %s8770_s6, 4  ;;  %s43_s0 = int_to_ptr.vmem [resolvable:$true] %s42_s0  ;;  %s9008_s24 = int_to_ptr.vmem [resolvable:$true] %s66_s24 }
  0xa8   :  { %s10102_s29 = sld [smem:[#allocation44_spill]] }
  0xae   :  { %s8510_s11 = scalar_lea.hbm %s10102_s29, 512 }
  0xaf   :  { %p8511_p11 = scmp.ne.s32.totalorder %s10102_s29, %s8510_s11  ;;  %p8514_p12 = scmp.lt.u32.totalorder %s8510_s11, %s10102_s29 }
  0xb1   :  { %p8516_p13 = pnand %p8514_p12, %p8511_p11 }
  0xb3   :  { %8519 = shalt.err (!%p8516_p13)
}
  0xb4   :  { %s8520_s16 = scalar_lea.vmem %s43_s0, 512  ;;  %p8525_p1 = scmp.lt.s32.totalorder %s43_s0, %s43_s0 }
  0xb5   :  { %p8521_p0 = scmp.ne.s32.totalorder %s43_s0, %s8520_s16  ;;  %p8526_p2 = scmp.lt.s32.totalorder %s8520_s16, %s8520_s16 }
  0xb7   :  { %p8527_p3 = por %p8526_p2, %p8525_p1 }
  0xb9   :  { %p8528_p4 = pnand %p8527_p3, %p8521_p0 }
  0xbb   :  { %8531 = shalt.err (!%p8528_p4)
}
  0xbc   :  { %s10103_s8 = smov 8   ;;  %s10104_s21 = smov 128  }
  0xbd   :  { %48 = dma.hbm_to_vmem [thread:$0]  %s10102_s29, 512, %s43_s0, [#allocation5], %s10104_s21, %s10104_s21, %s10103_s8  }
  0xbe   :  { %s8532_s14 = scalar_lea.hbm %s10070_s3, 32 }
  0xbf   :  { %p8533_p5 = scmp.ne.s32.totalorder %s10070_s3, %s8532_s14  ;;  %p8536_p6 = scmp.lt.u32.totalorder %s8532_s14, %s10070_s3 }
  0xc1   :  { %p8538_p7 = pnand %p8536_p6, %p8533_p5 }
  0xc3   :  { %8541 = shalt.err (!%p8538_p7)
}
  0xc4   :  { %s8542_s12 = scalar_lea.vmem %s9008_s24, 32  ;;  %p8547_p9 = scmp.lt.s32.totalorder %s9008_s24, %s9008_s24 }
  0xc5   :  { %p8543_p8 = scmp.ne.s32.totalorder %s9008_s24, %s8542_s12  ;;  %p8548_p10 = scmp.lt.s32.totalorder %s8542_s12, %s8542_s12 }
  0xc7   :  { %p8549_p11 = por %p8548_p10, %p8547_p9 }
  0xc9   :  { %p8550_p12 = pnand %p8549_p11, %p8543_p8 }
  0xcb   :  { %8553 = shalt.err (!%p8550_p12)
}
  0xcc   :  { %72 = dma.hbm_to_vmem [thread:$0]  %s10070_s3, 32, %s9008_s24, [#allocation8], %s8758_s25, %s8758_s25, %s8759_s20  }
  0xcd   :  { %s8771_s11 = smov [#allocation12]   ;;  %s8554_s2 = scalar_lea.hbm %s10072_s5, 12288 }
  0xce   :  { %s90_s19 = sshll.u32 %s8771_s11, 4  ;;  %p8555_p13 = scmp.ne.s32.totalorder %s10072_s5, %s8554_s2  ;;  %s91_s19 = int_to_ptr.vmem [resolvable:$true] %s90_s19 }
  0xcf   :  { %p8558_p0 = scmp.lt.u32.totalorder %s8554_s2, %s10072_s5 }
  0xd1   :  { %p8560_p1 = pnand %p8558_p0, %p8555_p13 }
  0xd3   :  { %8563 = shalt.err (!%p8560_p1)
}
  0xd4   :  { %s8564_s28 = scalar_lea.vmem %s91_s19, 12288  ;;  %p8569_p3 = scmp.lt.s32.totalorder %s91_s19, %s91_s19 }
  0xd5   :  { %p8565_p2 = scmp.ne.s32.totalorder %s91_s19, %s8564_s28  ;;  %p8570_p4 = scmp.lt.s32.totalorder %s8564_s28, %s8564_s28 }
  0xd7   :  { %p8571_p5 = por %p8570_p4, %p8569_p3 }
  0xd9   :  { %p8572_p6 = pnand %p8571_p5, %p8565_p2 }
  0xdb   :  { %8575 = shalt.err (!%p8572_p6)
}
  0xdc   :  { %s8772_s3 = smov 384   ;;  %s8773_s24 = smov 24  }
  0xdd   :  { %96 = dma.hbm_to_vmem [thread:$0]  %s10072_s5, 12288, %s91_s19, [#allocation11], %s8772_s3, %s8772_s3, %s8773_s24  }
  0xde   :  { %s8774_s30 = smov [#allocation15]   ;;  %s8775_s4 = smov [#allocation18]  }
  0xdf   :  { %s114_s6 = sshll.u32 %s8774_s30, 4  ;;  %s138_s12 = sshll.u32 %s8775_s4, 4  ;;  %s115_s6 = int_to_ptr.vmem [resolvable:$true] %s114_s6  ;;  %s139_s12 = int_to_ptr.vmem [resolvable:$true] %s138_s12 }
  0xe0   :  { %s8576_s11 = scalar_lea.hbm %s10074_s7, 4096 }
  0xe1   :  { %p8577_p7 = scmp.ne.s32.totalorder %s10074_s7, %s8576_s11  ;;  %p8580_p8 = scmp.lt.u32.totalorder %s8576_s11, %s10074_s7 }
  0xe3   :  { %p8582_p9 = pnand %p8580_p8, %p8577_p7 }
  0xe5   :  { %8585 = shalt.err (!%p8582_p9)
}
  0xe6   :  { %s8586_s5 = scalar_lea.vmem %s115_s6, 4096  ;;  %p8591_p11 = scmp.lt.s32.totalorder %s115_s6, %s115_s6 }
  0xe7   :  { %p8587_p10 = scmp.ne.s32.totalorder %s115_s6, %s8586_s5  ;;  %p8592_p12 = scmp.lt.s32.totalorder %s8586_s5, %s8586_s5 }
  0xe9   :  { %p8593_p13 = por %p8592_p12, %p8591_p11 }
  0xeb   :  { %p8594_p0 = pnand %p8593_p13, %p8587_p10 }
  0xed   :  { %8597 = shalt.err (!%p8594_p0)
}
  0xee   :  { %120 = dma.hbm_to_vmem [thread:$0]  %s10074_s7, 4096, %s115_s6, [#allocation14], %s10104_s21, %s10104_s21, %s10103_s8  }
  0xef   :  { %s8598_s28 = scalar_lea.hbm %s10076_s9, 32 }
  0xf0   :  { %p8599_p1 = scmp.ne.s32.totalorder %s10076_s9, %s8598_s28  ;;  %p8602_p2 = scmp.lt.u32.totalorder %s8598_s28, %s10076_s9 }
  0xf2   :  { %p8604_p3 = pnand %p8602_p2, %p8599_p1 }
  0xf4   :  { %8607 = shalt.err (!%p8604_p3)
}
  0xf5   :  { %s8608_s30 = scalar_lea.vmem %s139_s12, 32  ;;  %p8613_p5 = scmp.lt.s32.totalorder %s139_s12, %s139_s12 }
  0xf6   :  { %p8609_p4 = scmp.ne.s32.totalorder %s139_s12, %s8608_s30  ;;  %p8614_p6 = scmp.lt.s32.totalorder %s8608_s30, %s8608_s30 }
  0xf8   :  { %p8615_p7 = por %p8614_p6, %p8613_p5 }
  0xfa   :  { %p8616_p8 = pnand %p8615_p7, %p8609_p4 }
  0xfc   :  { %8619 = shalt.err (!%p8616_p8)
}
  0xfd   :  { %144 = dma.hbm_to_vmem [thread:$0]  %s10076_s9, 32, %s139_s12, [#allocation17], %s8758_s25, %s8758_s25, %s8759_s20  }
  0xfe   :  { %s8776_s4 = smov [#allocation21]   ;;  %s10105_s1 = sld [smem:[#allocation46_spill]] }
  0xff   :  { %s162_s0 = sshll.u32 %s8776_s4, 4  ;;  %s163_s0 = int_to_ptr.vmem [resolvable:$true] %s162_s0 }
 0x104   :  { %s8620_s26 = scalar_lea.hbm %s10105_s1, 16384 }
 0x105   :  { %p8621_p9 = scmp.ne.s32.totalorder %s10105_s1, %s8620_s26  ;;  %p8624_p10 = scmp.lt.u32.totalorder %s8620_s26, %s10105_s1 }
 0x107   :  { %p8626_p11 = pnand %p8624_p10, %p8621_p9 }
 0x109   :  { %8629 = shalt.err (!%p8626_p11)
}
 0x10a   :  { %s8630_s22 = scalar_lea.vmem %s163_s0, 16384  ;;  %p8635_p13 = scmp.lt.s32.totalorder %s163_s0, %s163_s0 }
 0x10b   :  { %p8631_p12 = scmp.ne.s32.totalorder %s163_s0, %s8630_s22  ;;  %p8636_p0 = scmp.lt.s32.totalorder %s8630_s22, %s8630_s22 }
 0x10d   :  { %p8637_p1 = por %p8636_p0, %p8635_p13 }
 0x10f   :  { %p8638_p2 = pnand %p8637_p1, %p8631_p12 }
 0x111   :  { %8641 = shalt.err (!%p8638_p2)
}
 0x112   :  { %s8777_s9 = smov 512   ;;  %s8778_s25 = smov 32  }
 0x113   :  { %168 = dma.hbm_to_vmem [thread:$0]  %s10105_s1, 16384, %s163_s0, [#allocation20], %s8777_s9, %s8777_s9, %s8778_s25  }
 0x114   :  { %s8779_s27 = smov [#allocation24]   ;;  %s8780_s28 = smov [#allocation27]  }
 0x115   :  { %s186_s18 = sshll.u32 %s8779_s27, 4  ;;  %s211_s3 = sshll.u32 %s8780_s28, 4  ;;  %s187_s18 = int_to_ptr.vmem [resolvable:$true] %s186_s18  ;;  %s212_s3 = int_to_ptr.vmem [resolvable:$true] %s211_s3 }
 0x116   :  { %s8642_s23 = scalar_lea.hbm %s10080_s13, 16384 }
 0x117   :  { %p8643_p3 = scmp.ne.s32.totalorder %s10080_s13, %s8642_s23  ;;  %p8646_p4 = scmp.lt.u32.totalorder %s8642_s23, %s10080_s13 }
 0x119   :  { %p8648_p5 = pnand %p8646_p4, %p8643_p3 }
 0x11b   :  { %8651 = shalt.err (!%p8648_p5)
}
 0x11c   :  { %s8652_s0 = scalar_lea.vmem %s187_s18, 16384  ;;  %p8657_p7 = scmp.lt.s32.totalorder %s187_s18, %s187_s18 }
 0x11d   :  { %p8653_p6 = scmp.ne.s32.totalorder %s187_s18, %s8652_s0  ;;  %p8658_p8 = scmp.lt.s32.totalorder %s8652_s0, %s8652_s0 }
 0x11f   :  { %p8659_p9 = por %p8658_p8, %p8657_p7 }
 0x121   :  { %p8660_p10 = pnand %p8659_p9, %p8653_p6 }
 0x123   :  { %8663 = shalt.err (!%p8660_p10)
}
 0x124   :  { %192 = dma.hbm_to_vmem [thread:$0]  %s10080_s13, 16384, %s187_s18, [#allocation23], %s10104_s21, %s10104_s21, %s10103_s8  }
 0x125   :  { %s8664_s2 = scalar_lea.hbm %s10082_s15, 16 }
 0x126   :  { %p8665_p11 = scmp.ne.s32.totalorder %s10082_s15, %s8664_s2  ;;  %p8668_p12 = scmp.lt.u32.totalorder %s8664_s2, %s10082_s15 }
 0x128   :  { %p8670_p13 = pnand %p8668_p12, %p8665_p11 }
 0x12a   :  { %8673 = shalt.err (!%p8670_p13)
}
 0x12b   :  { %s8674_s9 = scalar_lea.vmem %s212_s3, 16  ;;  %s8678_s20 = scalar_lea.vmem %s212_s3, 32 }
 0x12c   :  { %p8675_p0 = scmp.ne.s32.totalorder %s212_s3, %s8674_s9  ;;  %p8679_p1 = scmp.lt.s32.totalorder %s212_s3, %s212_s3 }
 0x12d   :  { %p8680_p2 = scmp.lt.s32.totalorder %s8678_s20, %s8674_s9 }
 0x12f   :  { %p8681_p3 = por %p8680_p2, %p8679_p1 }
 0x131   :  { %p8682_p4 = pnand %p8681_p3, %p8675_p0 }
 0x133   :  { %8685 = shalt.err (!%p8682_p4)
}
 0x134   :  { %214 = dma.hbm_to_vmem [thread:$0]  %s10082_s15, 16, %s212_s3, [#allocation26]  }
 0x135   :  { %s8781_s27 = smov [#allocation30]   ;;  %s8686_s14 = scalar_lea.hbm %s10084_s17, 2048 }
 0x136   :  { %s230_s18 = sshll.u32 %s8781_s27, 4  ;;  %p8687_p5 = scmp.ne.s32.totalorder %s10084_s17, %s8686_s14  ;;  %s231_s18 = int_to_ptr.vmem [resolvable:$true] %s230_s18 }
 0x137   :  { %p8690_p6 = scmp.lt.u32.totalorder %s8686_s14, %s10084_s17 }
 0x139   :  { %p8692_p7 = pnand %p8690_p6, %p8687_p5 }
 0x13b   :  { %8695 = shalt.err (!%p8692_p7)
}
 0x13c   :  { %s8696_s4 = scalar_lea.vmem %s231_s18, 2048  ;;  %p8701_p9 = scmp.lt.s32.totalorder %s231_s18, %s231_s18 }
 0x13d   :  { %p8697_p8 = scmp.ne.s32.totalorder %s231_s18, %s8696_s4  ;;  %p8702_p10 = scmp.lt.s32.totalorder %s8696_s4, %s8696_s4 }
 0x13f   :  { %p8703_p11 = por %p8702_p10, %p8701_p9 }
 0x141   :  { %p8704_p12 = pnand %p8703_p11, %p8697_p8 }
 0x143   :  { %8707 = shalt.err (!%p8704_p12)
}
 0x144   :  { %236 = dma.hbm_to_vmem [thread:$0]  %s10084_s17, 2048, %s231_s18, [#allocation29], %s10104_s21, %s10104_s21, %s10103_s8  }
 0x145   :  { %8732 = dma.done.wait [#allocation5], 512  }
 0x146   :  { %8733 = vsyncadd [#allocation5], 4294966784 }
 0x147   :  { %8734 = dma.done.wait [#allocation8], 288  }
 0x148   :  { %8735 = vsyncadd [#allocation8], 4294967008 }
 0x149   :  { %8736 = dma.done.wait [#allocation11], 12320  }
 0x14a   :  { %8737 = vsyncadd [#allocation11], 4294954976 }
 0x14b   :  { %8738 = dma.done.wait [#allocation14], 4192  }
 0x14c   :  { %8739 = vsyncadd [#allocation14], 4294963104 }
 0x14d   :  { %8740 = dma.done.wait [#allocation17], 64  }
 0x14e   :  { %8741 = vsyncadd [#allocation17], 4294967232 }
 0x14f   :  { %8742 = dma.done.wait [#allocation20], 16416  }
 0x150   :  { %8743 = vsyncadd [#allocation20], 4294950880 }
 0x151   :  { %8744 = dma.done.wait [#allocation23], 16512  }
 0x152   :  { %8745 = vsyncadd [#allocation23], 4294950784 }
 0x153   :  { %8746 = dma.done.wait [#allocation26], 48  }
 0x154   :  { %8747 = vsyncadd [#allocation26], 4294967248 }
 0x155   :  { %8748 = dma.done.wait [#allocation29], 2064  }
 0x156   :  { %8749 = vsyncadd [#allocation29], 4294965232  ;;  %v288_v0 = vld [vmem:[#allocation4] sm:$0xff]  ;;  %v290_v2 = vld [vmem:[#allocation4 + $0x10] sm:$0xff]  ;;  %vm625_vm0 = vcmask 261120   ;;  %vm808_vm4 = vcmask 130048  }
 0x157   :  { %v292_v1 = vld [vmem:[#allocation7] sm:$0xff]  ;;  %v289_v5 = vld [vmem:[#allocation4 + $0x8] sm:$0xff]  ;;  %v291_v7 = vld [vmem:[#allocation4 + $0x18] sm:$0xff]  ;;  %s8784_s17 = smov 96   ;;  %vm2295_vm5 = vcmask 523264   ;;  %vm2300_vm6 = vcmask 785408  }
 0x158   :  { %v9142_v3 = vadd.f32 %v292_v1, %v288_v0  ;;  %v9144_v4 = vadd.f32 %v292_v1, %v290_v2  ;;  %v293_v6 = vld [vmem:[#allocation7 + $0x8] sm:$0xff]  ;;  %v375_v10 = vld [vmem:[#allocation12 + $0x8] sm:$0xff]  ;;  %v378_v11 = vld [vmem:[#allocation12 + $0x20] sm:$0xff]  ;;  %s6366_s8 = sld [smem:[#allocation3 + $0x1]]  ;;  %vm6066_vm9 = vcmask 1040384   ;;  %vm8786_vm10 = vmmov 0  }
 0x159   :  { %v9148_v8 = vadd.f32 %v293_v6, %v289_v5  ;;  %v9150_v9 = vadd.f32 %v293_v6, %v291_v7  ;;  %v374_v12 = vld [vmem:[#allocation12] sm:$0xff]  ;;  %v7180_v13 = vpack.c.bf16 %v378_v11, %v375_v10  ;;  %v377_v14 = vld [vmem:[#allocation12 + $0x18] sm:$0xff]  ;;  %v384_v16 = vld [vmem:[#allocation12 + $0x50] sm:$0xff]  ;;  %vm6126_vm11 = vcmask 1041409   ;;  %s8787_s21 = smov [#allocation31]  }
 0x15a   :  { %309 = vadd.xlane.f32.xlu0 %v9142_v3  ;;  %313 = vadd.xlane.f32.xlu1 %v9144_v4  ;;  %v381_v15 = vld [vmem:[#allocation12 + $0x38] sm:$0xff]  ;;  %v7182_v17 = vpack.c.bf16 %v377_v14, %v374_v12  ;;  %v376_v19 = vld [vmem:[#allocation12 + $0x10] sm:$0xff]  ;;  %v379_v20 = vld [vmem:[#allocation12 + $0x28] sm:$0xff] }
 0x15b   :  { %v7184_v18 = vpack.c.bf16 %v384_v16, %v381_v15  ;;  %v380_v21 = vld [vmem:[#allocation12 + $0x30] sm:$0xff]  ;;  %7181 = vmatprep.subr.bf16.mxu0 %v7180_v13  ;;  %v7212_v22 = vpack.c.bf16 %v379_v20, %v376_v19  ;;  %v383_v23 = vld [vmem:[#allocation12 + $0x48] sm:$0xff]  ;;  %v390_v25 = vld [vmem:[#allocation12 + $0x80] sm:$0xff] }
 0x15c   :  { %v387_v24 = vld [vmem:[#allocation12 + $0x68] sm:$0xff]  ;;  %7183 = vmatpush1.bf16.msra.mxu0 %v7182_v17  ;;  %v7186_v26 = vpack.c.bf16 %v383_v23, %v380_v21  ;;  %v382_v27 = vld [vmem:[#allocation12 + $0x40] sm:$0xff]  ;;  %v385_v28 = vld [vmem:[#allocation12 + $0x58] sm:$0xff] }
 0x15d   :  { %7185 = vmatprep.subr.bf16.mxu0 %v7184_v18  ;;  %7213 = vmatprep.subr.bf16.mxu1 %v7212_v22  ;;  %v7188_v29 = vpack.c.bf16 %v390_v25, %v387_v24  ;;  %v7216_v30 = vpack.c.bf16 %v385_v28, %v382_v27  ;;  %v386_v31 = vld [vmem:[#allocation12 + $0x60] sm:$0xff]  ;;  %v389_v32 = vld [vmem:[#allocation12 + $0x78] sm:$0xff]  ;;  %v396_v51 = vld [vmem:[#allocation12 + $0xb0] sm:$0xff] }
 0x15e   :  { %311 = vadd.xlane.f32.xlu0 %v9148_v8  ;;  %315 = vadd.xlane.f32.xlu1 %v9150_v9  ;;  %v7190_v33 = vpack.c.bf16 %v389_v32, %v386_v31  ;;  %v393_v50 = vld [vmem:[#allocation12 + $0x98] sm:$0xff]  ;;  %v388_v52 = vld [vmem:[#allocation12 + $0x70] sm:$0xff]  ;;  %v391_v54 = vld [vmem:[#allocation12 + $0x88] sm:$0xff] }
 0x15f   :  { %7215 = vmatpush3.bf16.msra.mxu1 %v7212_v22  ;;  %v7192_v53 = vpack.c.bf16 %v396_v51, %v393_v50  ;;  %v392_v55 = vld [vmem:[#allocation12 + $0x90] sm:$0xff]  ;;  %v395_v56 = vld [vmem:[#allocation12 + $0xa8] sm:$0xff]  ;;  %v7220_v57 = vpack.c.bf16 %v391_v54, %v388_v52  ;;  %v402_v60 = vld [vmem:[#allocation12 + $0xe0] sm:$0xff] }
 0x160   :  { %7217 = vmatprep.subr.bf16.mxu1 %v7216_v30  ;;  %7187 = vmatpush1.bf16.msra.mxu0 %v7186_v26  ;;  %v7194_v58 = vpack.c.bf16 %v395_v56, %v392_v55  ;;  %v399_v59 = vld [vmem:[#allocation12 + $0xc8] sm:$0xff]  ;;  %v394_v61 = vld [vmem:[#allocation12 + $0xa0] sm:$0xff]  ;;  %v397_v63 = vld [vmem:[#allocation12 + $0xb8] sm:$0xff] }
 0x161   :  { %7189 = vmatprep.subr.bf16.mxu0 %v7188_v29  ;;  %v7196_v62 = vpack.c.bf16 %v402_v60, %v399_v59  ;;  %v398_v0 = vld [vmem:[#allocation12 + $0xc0] sm:$0xff]  ;;  %v401_v1 = vld [vmem:[#allocation12 + $0xd8] sm:$0xff]  ;;  %v7224_v2 = vpack.c.bf16 %v397_v63, %v394_v61  ;;  %v408_v7 = vld [vmem:[#allocation12 + $0x110] sm:$0xff]  ;;  %v8782_v29 = vmov 0.0  }
 0x162   :  { %v7198_v5 = vpack.c.bf16 %v401_v1, %v398_v0  ;;  %v405_v6 = vld [vmem:[#allocation12 + $0xf8] sm:$0xff]  ;;  %v400_v10 = vld [vmem:[#allocation12 + $0xd0] sm:$0xff]  ;;  %v403_v12 = vld [vmem:[#allocation12 + $0xe8] sm:$0xff]  ;;  %487 = vmatprep.mubr.f32.mxu0 %v8782_v29 }
 0x163   :  { %7219 = vmatpush3.bf16.msra.mxu1 %v7216_v30  ;;  %v7200_v11 = vpack.c.bf16 %v408_v7, %v405_v6  ;;  %v404_v13 = vld [vmem:[#allocation12 + $0xf0] sm:$0xff]  ;;  %v407_v14 = vld [vmem:[#allocation12 + $0x108] sm:$0xff]  ;;  %v7228_v15 = vpack.c.bf16 %v403_v12, %v400_v10  ;;  %v414_v18 = vld [vmem:[#allocation12 + $0x140] sm:$0xff] }
 0x164   :  { %7191 = vmatpush1.bf16.msra.mxu0 %v7190_v33  ;;  %7221 = vmatprep.subr.bf16.mxu1 %v7220_v57  ;;  %v7202_v16 = vpack.c.bf16 %v407_v14, %v404_v13  ;;  %v411_v17 = vld [vmem:[#allocation12 + $0x128] sm:$0xff]  ;;  %v406_v19 = vld [vmem:[#allocation12 + $0x100] sm:$0xff]  ;;  %v409_v21 = vld [vmem:[#allocation12 + $0x118] sm:$0xff] }
 0x165   :  { %7193 = vmatprep.subr.bf16.mxu0 %v7192_v53  ;;  %v7204_v20 = vpack.c.bf16 %v414_v18, %v411_v17  ;;  %v410_v22 = vld [vmem:[#allocation12 + $0x120] sm:$0xff]  ;;  %v413_v23 = vld [vmem:[#allocation12 + $0x138] sm:$0xff]  ;;  %v7232_v24 = vpack.c.bf16 %v409_v21, %v406_v19  ;;  %v420_v27 = vld [vmem:[#allocation12 + $0x170] sm:$0xff] }
 0x166   :  { %v7206_v25 = vpack.c.bf16 %v413_v23, %v410_v22  ;;  %v417_v26 = vld [vmem:[#allocation12 + $0x158] sm:$0xff]  ;;  %v412_v28 = vld [vmem:[#allocation12 + $0x130] sm:$0xff]  ;;  %v415_v31 = vld [vmem:[#allocation12 + $0x148] sm:$0xff] }
 0x167   :  { %7223 = vmatpush3.bf16.msra.mxu1 %v7220_v57  ;;  %v7208_v30 = vpack.c.bf16 %v420_v27, %v417_v26  ;;  %v416_v32 = vld [vmem:[#allocation12 + $0x150] sm:$0xff]  ;;  %v419_v33 = vld [vmem:[#allocation12 + $0x168] sm:$0xff]  ;;  %v6223_v56 = vld [vmem:[#allocation9] ss:$0 sm:$0xff] }
 0x168   :  { %7195 = vmatpush1.bf16.msra.mxu0 %v7194_v58  ;;  %7225 = vmatprep.subr.bf16.mxu1 %v7224_v2  ;;  %v6224_v58 = vld [vmem:[#allocation10] ss:$0 sm:$0xff]  ;;  %vm9202_vm1 = vmpackc.low %vm625_vm0, %vm625_vm0 }
 0x169   :  { %7197 = vmatprep.subr.bf16.mxu0 %v7196_v62 }
 0x16b   :  { %7227 = vmatpush3.bf16.msra.mxu1 %v7224_v2 }
 0x16c   :  { %7199 = vmatpush1.bf16.msra.mxu0 %v7198_v5  ;;  %7229 = vmatprep.subr.bf16.mxu1 %v7228_v15 }
 0x16d   :  { %7201 = vmatprep.subr.bf16.mxu0 %v7200_v11 }
 0x16f   :  { %7231 = vmatpush3.bf16.msra.mxu1 %v7228_v15 }
 0x170   :  { %7203 = vmatpush1.bf16.msra.mxu0 %v7202_v16  ;;  %7233 = vmatprep.subr.bf16.mxu1 %v7232_v24 }
 0x171   :  { %7205 = vmatprep.subr.bf16.mxu0 %v7204_v20 }
 0x173   :  { %7235 = vmatpush3.bf16.msra.mxu1 %v7232_v24 }
 0x174   :  { %7207 = vmatpush1.bf16.msra.mxu0 %v7206_v25 }
 0x175   :  { %7209 = vmatprep.subr.bf16.mxu0 %v7208_v30 }
 0x1e7   :  { %v310_v34 = vpop.xlane.xlu0 %309  ;;  %v314_v35 = vpop.xlane.xlu1 %313 }
 0x1e8   :  { %v318_v36 = vmul.f32 0.0078125, %v310_v34  ;;  %v320_v37 = vmul.f32 0.0078125, %v314_v35  ;;  %v7236_v34 = vpack.c.bf16 %v415_v31, %v412_v28  ;;  %v7210_v35 = vpack.c.bf16 %v419_v33, %v416_v32 }
 0x1ea   :  { %v9155_v38 = vsub.f32 %v9142_v3, %v318_v36  ;;  %v9158_v39 = vsub.f32 %v9144_v4, %v320_v37  ;;  %7237 = vmatprep.subr.bf16.mxu1 %v7236_v34  ;;  %7211 = vmatpush1.bf16.msra.mxu0 %v7210_v35  ;;  %v418_v36 = vld [vmem:[#allocation12 + $0x160] sm:$0xff]  ;;  %v421_v37 = vld [vmem:[#allocation12 + $0x178] sm:$0xff] }
 0x1eb   :  { %v312_v40 = vpop.xlane.xlu0 %311  ;;  %v316_v41 = vpop.xlane.xlu1 %315  ;;  %7239 = vmatpush3.bf16.msra.mxu1 %v7236_v34 }
 0x1ec   :  { %v319_v42 = vmul.f32 0.0078125, %v312_v40  ;;  %v326_v43 = vmul.f32 %v9155_v38, %v9155_v38  ;;  %v321_v44 = vmul.f32 0.0078125, %v316_v41  ;;  %v328_v45 = vmul.f32 %v9158_v39, %v9158_v39 }
 0x1ed   :  { %v7240_v40 = vpack.c.bf16 %v421_v37, %v418_v36 }
 0x1ee   :  { %330 = vadd.xlane.f32.xlu0 %v326_v43  ;;  %v9165_v46 = vsub.f32 %v9148_v8, %v319_v42  ;;  %v9168_v47 = vsub.f32 %v9150_v9, %v321_v44 }
 0x1ef   :  { %7241 = vmatprep.subr.bf16.mxu1 %v7240_v40 }
 0x1f0   :  { %v327_v48 = vmul.f32 %v9165_v46, %v9165_v46  ;;  %v329_v49 = vmul.f32 %v9168_v47, %v9168_v47  ;;  %7243 = vmatpush3.bf16.msra.mxu1 %v7240_v40 }
 0x1f2   :  { %334 = vadd.xlane.f32.xlu0 %v328_v45  ;;  %332 = vadd.xlane.f32.xlu1 %v327_v48 }
 0x1f6   :  { %336 = vadd.xlane.f32.xlu1 %v329_v49 }
 0x27b   :  { %v331_v41 = vpop.xlane.xlu0 %330 }
 0x27c   :  { %v338_v42 = vmul.f32 0.0078125, %v331_v41 }
 0x27e   :  { %v342_v43 = vadd.f32 1e-05, %v338_v42 }
 0x27f   :  { %v333_v44 = vpop.xlane.xlu1 %332  ;;  %v335_v45 = vpop.xlane.xlu0 %334 }
 0x280   :  { %8028 = vrsqrt.f32 %v342_v43  ;;  %v339_v48 = vmul.f32 0.0078125, %v333_v44  ;;  %v340_v49 = vmul.f32 0.0078125, %v335_v45 }
 0x282   :  { %v343_v50 = vadd.f32 1e-05, %v339_v48  ;;  %v344_v51 = vadd.f32 1e-05, %v340_v49 }
 0x283   :  { %v337_v52 = vpop.xlane.xlu1 %336 }
 0x284   :  { %8030 = vrsqrt.f32 %v343_v50  ;;  %v341_v53 = vmul.f32 0.0078125, %v337_v52 }
 0x285   :  { %8032 = vrsqrt.f32 %v344_v51 }
 0x286   :  { %v345_v54 = vadd.f32 1e-05, %v341_v53 }
 0x288   :  { %8034 = vrsqrt.f32 %v345_v54 }
 0x28a   :  { %v8029_v55 = vpop.eup %8028 }
 0x28b   :  { %v350_v57 = vmul.f32 %v8029_v55, %v9155_v38 }
 0x28d   :  { %v360_v59 = vmul.f32 %v6223_v56, %v350_v57 }
 0x28e   :  { %v8031_v60 = vpop.eup %8030 }
 0x28f   :  { %v8033_v61 = vpop.eup %8032  ;;  %v370_v62 = vadd.f32 %v6224_v58, %v360_v59  ;;  %v351_v63 = vmul.f32 %v8031_v60, %v9165_v46 }
 0x290   :  { %v352_v0 = vmul.f32 %v8033_v61, %v9158_v39  ;;  %v298_v39 = vlaneseq }
 0x291   :  { %488 = vmatmul.mubr.f32.vlgmr.msra.gmra.mrb[0].mxu0 %v370_v62  ;;  %6801 = vmatprep.mubr.f32.mxu1 %v370_v62  ;;  %v361_v1 = vmul.f32 %v6223_v56, %v351_v63 }
 0x292   :  { %v8035_v2 = vpop.eup %8034  ;;  %493 = vmatprep.mubr.f32.mxu0 %v8782_v29  ;;  %v362_v5 = vmul.f32 %v6223_v56, %v352_v0  ;;  %v9182_v11 = vshrl.u32 %v298_v39, 7  ;;  %v9238_v57 = vand.u32 127, %v298_v39 }
 0x293   :  { %v371_v6 = vadd.f32 %v6224_v58, %v361_v1  ;;  %v353_v7 = vmul.f32 %v8035_v2, %v9168_v47  ;;  %v422_v47 = vld [vmem:[#allocation13] sm:$0x7] }
 0x294   :  { %v372_v38 = vadd.f32 %v6224_v58, %v362_v5  ;;  %v9185_v12 = vsub.s32 0, %v9182_v11  ;;  %v9189_v14 = vsub.s32 2, %v9182_v11  ;;  %v9192_v15 = vsub.s32 1, %v9182_v11 }
 0x295   :  { %494 = vmatmul.mubr.f32.gmra.mrb[2].mxu0 %v371_v6  ;;  %6802 = vmatmul.mubr.f32.vlgmr.msra.gmra.mrb[0].mxu1 %v371_v6  ;;  %v363_v10 = vmul.f32 %v6223_v56, %v353_v7  ;;  %v300_v56 = vadd.s32 8, %v9182_v11  ;;  %vm303_vm3 = vcmp.le.s32.totalorder %v9238_v57, %v9182_v11 }
 0x296   :  { %6804 = vmatprep.mubr.f32.mxu1 %v372_v38  ;;  %499 = vmatprep.mubr.f32.mxu0 %v8782_v29  ;;  %v601_v13 = vrot.slane %v422_v47, %v9185_v12  ;;  %v609_v19 = vrot.slane %v422_v47, %v9189_v14  ;;  %v605_v20 = vrot.slane %v422_v47, %v9192_v15 }
 0x297   :  { %v373_v46 = vadd.f32 %v6224_v58, %v363_v10  ;;  %vm304_vm2 = vcmp.le.s32.totalorder %v9238_v57, %v300_v56  ;;  %v8783_v58 = vmov -1e+09  }
 0x298   :  { %v9243_v59 = vsel %vm304_vm2, 0.0, %v8783_v58  ;;  %v9245_v61 = vsel %vm303_vm3, 0.0, %v8783_v58 }
 0x299   :  { %500 = vmatmul.mubr.f32.gmra.mrb[4].mxu0 %v372_v38  ;;  %6805 = vmatmul.mubr.f32.gmra.mrb[2].mxu1 %v373_v46 }
 0x29a   :  { %505 = vmatprep.mubr.f32.mxu0 %v8782_v29 }
 0x29d   :  { %506 = vmatmul.mubr.f32.gmra.mrb[6].mxu0 %v373_v46 }
 0x364   :  { %v489_v16 = vpop.f32.mrb[0].mxu0 }
 0x365   :  { %v9194_v17 = vadd.f32 %v601_v13, %v489_v16  ;;  %v491_v18 = vpop.f32.mrb[1].mxu0 }
 0x366   :  { %v614_v26 = vadd.f32 %v605_v20, %v491_v18 }
 0x367   :  { %6811 = vmatprep.mubr.msk.f32.mxu1 %vm625_vm0, %v9194_v17 }
 0x368   :  { %v495_v21 = vpop.f32.mrb[2].mxu0  ;;  %v6803_v22 = vpop.f32.mrb[0].mxu1 }
 0x369   :  { %v618_v23 = vadd.f32 %v6803_v22, %v609_v19  ;;  %v497_v24 = vpop.f32.mrb[3].mxu0  ;;  %v578_v25 = vpop.f32.mrb[1].mxu1  ;;  %v9218_v51 = vadd.f32 %v601_v13, %v495_v21 }
 0x36a   :  { %v617_v27 = vadd.f32 %v605_v20, %v497_v24  ;;  %v615_v28 = vadd.f32 %v609_v19, %v578_v25 }
 0x36c   :  { %v501_v31 = vpop.f32.mrb[4].mxu0  ;;  %v6806_v32 = vpop.f32.mrb[2].mxu1  ;;  %v7244_v33 = vpack.c.bf16 %v617_v27, %v614_v26  ;;  %v7256_v34 = vpack.c.bf16 %v618_v23, %v615_v28  ;;  %v9206_v35 = vpack.i.bf16 %v617_v27, %v614_v26  ;;  %v9208_v41 = vpack.i.bf16 %v618_v23, %v615_v28 }
 0x36d   :  { %v624_v36 = vadd.f32 %v6806_v32, %v609_v19  ;;  %v503_v37 = vpop.f32.mrb[5].mxu0  ;;  %v588_v40 = vpop.f32.mrb[3].mxu1  ;;  %v9222_v54 = vadd.f32 %v601_v13, %v501_v31 }
 0x36e   :  { %v621_v42 = vadd.f32 %v609_v19, %v588_v40  ;;  %7246 = vmatprep.subr.msk.bf16.mxu1 %vm9202_vm1, %v7244_v33  ;;  %v620_v49 = vadd.f32 %v605_v20, %v503_v37 }
 0x36f   :  { %7249 = vmatpush3.bf16.xpose.msk.msra.mxu1 %vm9202_vm1, %v7244_v33 }
 0x370   :  { %v507_v43 = vpop.f32.mrb[6].mxu0  ;;  %v9214_v44 = vpack.c.bf16 %v624_v36, %v621_v42  ;;  %v9216_v45 = vpack.i.bf16 %v624_v36, %v621_v42 }
 0x371   :  { %v509_v48 = vpop.f32.mrb[7].mxu0  ;;  %v9232_v55 = vadd.f32 %v601_v13, %v507_v43 }
 0x372   :  { %v623_v50 = vadd.f32 %v605_v20, %v509_v48 }
 0x374   :  { %v7250_v52 = vpack.c.bf16 %v623_v50, %v620_v49  ;;  %v9220_v53 = vpack.i.bf16 %v623_v50, %v620_v49 }
 0x376   :  { %6812 = vmatmul.mubr.msk.f32.vlgmr.msra.gmra.mrb[4].mxu1 %vm625_vm0, %v9218_v51  ;;  %7252 = vmatprep.subr.msk.bf16.mxu1 %vm9202_vm1, %v7250_v52 }
 0x377   :  { %7255 = vmatpush3.bf16.xpose.msk.msra.mxu1 %vm9202_vm1, %v7250_v52  ;;  %6818 = vmatprep.mubr.msk.f32.mxu1 %vm625_vm0, %v9222_v54 }
 0x378   :  { %7257 = vmatprep.subr.bf16.mxu1 %v7256_v34 }
 0x37e   :  { %6819 = vmatmul.mubr.msk.f32.vlgmr.msra.gmra.mrb[6].mxu1 %vm625_vm0, %v9232_v55 }
 0x37f   :  { %7259 = vmatpush3.bf16.msra.mxu1 %v7256_v34 }
 0x380   :  { %7261 = vmatprep.subr.bf16.mxu1 %v9214_v44 }
 0x449   :  { %v6813_v60 = vpop.f32.mrb[4].mxu1 }
 0x44a   :  { %v801_v62 = vmul.f32 0.17677669, %v6813_v60  ;;  %v704_v63 = vpop.f32.mrb[5].mxu1 }
 0x44b   :  { %v800_v0 = vmul.f32 0.17677669, %v704_v63 }
 0x44c   :  { %v805_v1 = vadd.f32 %v801_v62, %v9243_v59 }
 0x44d   :  { %v804_v2 = vadd.f32 %v800_v0, %v9245_v61 }
 0x44e   :  { %v812_v5 = vsel %vm808_vm4, %v805_v1, -inf }
 0x44f   :  { %813 = vmax.xlane.f32.xlu1 %v812_v5  ;;  %v809_v6 = vsel %vm808_vm4, %v804_v2, -inf }
 0x450   :  { %810 = vmax.xlane.f32.xlu0 %v809_v6 }
 0x451   :  { %v6820_v7 = vpop.f32.mrb[6].mxu1 }
 0x452   :  { %v803_v38 = vmul.f32 0.17677669, %v6820_v7  ;;  %v791_v10 = vpop.f32.mrb[7].mxu1 }
 0x453   :  { %v802_v46 = vmul.f32 0.17677669, %v791_v10 }
 0x454   :  { %v807_v39 = vadd.f32 %v803_v38, %v9243_v59 }
 0x455   :  { %v806_v47 = vadd.f32 %v802_v46, %v9245_v61 }
 0x456   :  { %v818_v13 = vsel %vm808_vm4, %v807_v39, -inf }
 0x457   :  { %819 = vmax.xlane.f32.xlu1 %v818_v13  ;;  %v815_v16 = vsel %vm808_vm4, %v806_v47, -inf }
 0x458   :  { %816 = vmax.xlane.f32.xlu0 %v815_v16 }
 0x4dc   :  { %v814_v18 = vpop.xlane.xlu1 %813 }
 0x4dd   :  { %v822_v19 = vsub.f32 %v805_v1, %v814_v18  ;;  %v811_v20 = vpop.xlane.xlu0 %810 }
 0x4de   :  { %v821_v21 = vsub.f32 %v804_v2, %v811_v20 }
 0x4df   :  { %v827_v22 = vmul.f32 1.442695, %v822_v19 }
 0x4e0   :  { %v825_v23 = vmul.f32 1.442695, %v821_v21 }
 0x4e1   :  { %8036 = vpow2.f32 %v827_v22 }
 0x4e2   :  { %8038 = vpow2.f32 %v825_v23 }
 0x4e4   :  { %v820_v24 = vpop.xlane.xlu1 %819 }
 0x4e5   :  { %v824_v25 = vsub.f32 %v807_v39, %v820_v24  ;;  %v817_v26 = vpop.xlane.xlu0 %816 }
 0x4e6   :  { %v823_v27 = vsub.f32 %v806_v47, %v817_v26 }
 0x4e7   :  { %v831_v28 = vmul.f32 1.442695, %v824_v25 }
 0x4e8   :  { %v829_v31 = vmul.f32 1.442695, %v823_v27 }
 0x4e9   :  { %8040 = vpow2.f32 %v831_v28 }
 0x4ea   :  { %8042 = vpow2.f32 %v829_v31 }
 0x4eb   :  { %v8037_v32 = vpop.eup %8036 }
 0x4ec   :  { %v8039_v33 = vpop.eup %8038  ;;  %v836_v34 = vsel %vm808_vm4, %v8037_v32, 0.0 }
 0x4ed   :  { %837 = vadd.xlane.f32.xlu1 %v836_v34  ;;  %v833_v36 = vsel %vm808_vm4, %v8039_v33, 0.0 }
 0x4ee   :  { %834 = vadd.xlane.f32.xlu0 %v833_v36 }
 0x4f3   :  { %v8041_v37 = vpop.eup %8040 }
 0x4f4   :  { %v8043_v40 = vpop.eup %8042  ;;  %v842_v42 = vsel %vm808_vm4, %v8041_v37, 0.0 }
 0x4f5   :  { %843 = vadd.xlane.f32.xlu1 %v842_v42  ;;  %v839_v43 = vsel %vm808_vm4, %v8043_v40, 0.0 }
 0x4f6   :  { %840 = vadd.xlane.f32.xlu0 %v839_v43 }
 0x506   :  { %1015 = vrot.lane.b32.xlu1 %v9194_v17, %s8784_s17 }
 0x50a   :  { %7854 = vrot.lane.b32.xlu1 %v9220_v53, %s8784_s17 }
 0x50c   :  { %7849 = vrot.lane.b32.xlu0 %v9206_v35, %s8784_s17 }
 0x50e   :  { %1017 = vrot.lane.b32.xlu1 %v9218_v51, %s8784_s17 }
 0x510   :  { %1106 = vrot.lane.b32.xlu0 %v9222_v54, %s8784_s17 }
 0x512   :  { %1108 = vrot.lane.b32.xlu1 %v9232_v55, %s8784_s17 }
 0x57a   :  { %v838_v48 = vpop.xlane.xlu1 %837 }
 0x57b   :  { %8044 = vrcp.f32 %v838_v48  ;;  %v835_v49 = vpop.xlane.xlu0 %834 }
 0x57c   :  { %8046 = vrcp.f32 %v835_v49 }
 0x582   :  { %v844_v50 = vpop.xlane.xlu1 %843 }
 0x583   :  { %8048 = vrcp.f32 %v844_v50  ;;  %v841_v52 = vpop.xlane.xlu0 %840 }
 0x584   :  { %8050 = vrcp.f32 %v841_v52 }
 0x585   :  { %v8045_v56 = vpop.eup %8044 }
 0x586   :  { %v8047_v58 = vpop.eup %8046  ;;  %v1016_v60 = vpop.permute.xlu1 %1015  ;;  %v848_v2 = vmul.f32 %v8045_v56, %v8037_v32 }
 0x587   :  { %6839 = vmatprep.mubr.msk.f32.mxu0 %vm625_vm0, %v1016_v60  ;;  %v7850_v62 = vpop.permute.xlu0 %7849  ;;  %v846_v63 = vmul.f32 %v8047_v58, %v8039_v33 }
 0x588   :  { %v7852_v0 = vunpack.i.h.bf16 %v7850_v62  ;;  %v7851_v1 = vunpack.i.l.bf16 %v7850_v62 }
 0x589   :  { %6825 = vmatprep.mubr.msk.f32.mxu1 %vm808_vm4, %v846_v63 }
 0x58a   :  { %v7264_v5 = vpack.c.bf16 %v7852_v0, %v7851_v1  ;;  %v7855_v6 = vpop.permute.xlu1 %7854  ;;  %6826 = vmatmul.mubr.msk.f32.vlgmr.msra.gmra.mrb[8].mxu1 %vm808_vm4, %v848_v2 }
 0x58b   :  { %v7857_v7 = vunpack.i.h.bf16 %v7855_v6  ;;  %v7856_v38 = vunpack.i.l.bf16 %v7855_v6  ;;  %7263 = vmatpush3.bf16.msra.mxu1 %v9214_v44  ;;  %v1107_v16 = vpop.permute.xlu0 %1106 }
 0x58c   :  { %7266 = vmatprep.subr.msk.bf16.mxu0 %vm9202_vm1, %v7264_v5 }
 0x58d   :  { %v8049_v10 = vpop.eup %8048  ;;  %v7270_v46 = vpack.c.bf16 %v7857_v7, %v7856_v38  ;;  %7269 = vmatpush3.bf16.xpose.msk.msra.mxu0 %vm9202_vm1, %v7264_v5 }
 0x58e   :  { %v8051_v39 = vpop.eup %8050  ;;  %v852_v13 = vmul.f32 %v8049_v10, %v8041_v37  ;;  %v1018_v44 = vpop.permute.xlu1 %1017 }
 0x58f   :  { %7272 = vmatprep.subr.msk.bf16.mxu1 %vm9202_vm1, %v7270_v46  ;;  %v850_v47 = vmul.f32 %v8051_v39, %v8043_v40 }
 0x591   :  { %6832 = vmatprep.mubr.msk.f32.mxu1 %vm808_vm4, %v850_v47 }
 0x592   :  { %6833 = vmatmul.mubr.msk.f32.vlgmr.msra.gmra.mrb[10].mxu1 %vm808_vm4, %v852_v13  ;;  %v1109_v18 = vpop.permute.xlu1 %1108 }
 0x593   :  { %6846 = vmatprep.mubr.msk.f32.mxu1 %vm625_vm0, %v1107_v16 }
 0x594   :  { %7275 = vmatpush3.bf16.xpose.msk.msra.mxu1 %vm9202_vm1, %v7270_v46  ;;  %6840 = vmatmul.mubr.msk.f32.vlgmr.msra.gmra.mrb[8].mxu0 %vm625_vm0, %v1018_v44 }
 0x59b   :  { %6847 = vmatmul.mubr.msk.f32.vlgmr.msra.gmra.mrb[12].mxu1 %vm625_vm0, %v1109_v18 }
 0x65d   :  { %v9288_v19 = vpop.f32.mrb[8].mxu1 }
 0x65e   :  { %v9290_v20 = vpop.f32.mrb[9].mxu1 }
 0x665   :  { %v9292_v21 = vpop.f32.mrb[10].mxu1 }
 0x666   :  { %v9294_v22 = vpop.f32.mrb[11].mxu1 }
 0x667   :  { %v6841_v23 = vpop.f32.mrb[8].mxu0 }
 0x668   :  { %v1198_v24 = vmul.f32 0.17677669, %v6841_v23  ;;  %v1097_v25 = vpop.f32.mrb[9].mxu0 }
 0x669   :  { %v1197_v26 = vmul.f32 0.17677669, %v1097_v25 }
 0x66a   :  { %v1202_v27 = vadd.f32 %v1198_v24, %v9243_v59 }
 0x66b   :  { %v1201_v28 = vadd.f32 %v1197_v26, %v9245_v61 }
 0x66c   :  { %v1208_v31 = vsel %vm808_vm4, %v1202_v27, -inf }
 0x66d   :  { %1209 = vmax.xlane.f32.xlu1 %v1208_v31  ;;  %v1205_v32 = vsel %vm808_vm4, %v1201_v28, -inf }
 0x66e   :  { %v6848_v33 = vpop.f32.mrb[12].mxu1  ;;  %1206 = vmax.xlane.f32.xlu0 %v1205_v32 }
 0x66f   :  { %v1188_v34 = vpop.f32.mrb[13].mxu1  ;;  %v1200_v36 = vmul.f32 0.17677669, %v6848_v33 }
 0x670   :  { %v1199_v37 = vmul.f32 0.17677669, %v1188_v34 }
 0x671   :  { %v1204_v43 = vadd.f32 %v1200_v36, %v9243_v59 }
 0x672   :  { %v1203_v40 = vadd.f32 %v1199_v37, %v9245_v61 }
 0x673   :  { %v1214_v48 = vsel %vm808_vm4, %v1204_v43, -inf }
 0x674   :  { %v1211_v42 = vsel %vm808_vm4, %v1203_v40, -inf }
 0x675   :  { %1212 = vmax.xlane.f32.xlu0 %v1211_v42 }
 0x679   :  { %1215 = vmax.xlane.f32.xlu0 %v1214_v48 }
 0x6fa   :  { %v1210_v49 = vpop.xlane.xlu1 %1209 }
 0x6fb   :  { %v1218_v50 = vsub.f32 %v1202_v27, %v1210_v49  ;;  %v1207_v52 = vpop.xlane.xlu0 %1206 }
 0x6fc   :  { %v1217_v56 = vsub.f32 %v1201_v28, %v1207_v52 }
 0x6fd   :  { %v1223_v58 = vmul.f32 1.442695, %v1218_v50 }
 0x6fe   :  { %v1221_v60 = vmul.f32 1.442695, %v1217_v56 }
 0x6ff   :  { %8052 = vpow2.f32 %v1223_v58 }
 0x700   :  { %8054 = vpow2.f32 %v1221_v60 }
 0x702   :  { %v1213_v2 = vpop.xlane.xlu0 %1212 }
 0x703   :  { %v1219_v5 = vsub.f32 %v1203_v40, %v1213_v2 }
 0x705   :  { %v1225_v6 = vmul.f32 1.442695, %v1219_v5 }
 0x706   :  { %v1216_v7 = vpop.xlane.xlu0 %1215 }
 0x707   :  { %v1220_v38 = vsub.f32 %v1204_v43, %v1216_v7  ;;  %8056 = vpow2.f32 %v1225_v6 }
 0x709   :  { %v8053_v62 = vpop.eup %8052  ;;  %v1227_v10 = vmul.f32 1.442695, %v1220_v38 }
 0x70a   :  { %v8055_v63 = vpop.eup %8054  ;;  %v1232_v0 = vsel %vm808_vm4, %v8053_v62, 0.0 }
 0x70b   :  { %1233 = vadd.xlane.f32.xlu1 %v1232_v0  ;;  %v1229_v1 = vsel %vm808_vm4, %v8055_v63, 0.0  ;;  %8058 = vpow2.f32 %v1227_v10 }
 0x70c   :  { %1230 = vadd.xlane.f32.xlu0 %v1229_v1 }
 0x711   :  { %v8057_v46 = vpop.eup %8056 }
 0x712   :  { %v1235_v39 = vsel %vm808_vm4, %v8057_v46, 0.0 }
 0x715   :  { %v8059_v47 = vpop.eup %8058 }
 0x716   :  { %v1238_v13 = vsel %vm808_vm4, %v8059_v47, 0.0 }
 0x71c   :  { %7864 = vrot.lane.b32.xlu1 %v9216_v45, %s8784_s17 }
 0x720   :  { %7869 = vrot.lane.b32.xlu1 %v9206_v35, %s8765_s10 }
 0x722   :  { %7859 = vrot.lane.b32.xlu0 %v9208_v41, %s8784_s17 }
 0x724   :  { %1427 = vrot.lane.b32.xlu1 %v9194_v17, %s8765_s10 }
 0x741   :  { %1236 = vadd.xlane.f32.xlu0 %v1235_v39 }
 0x748   :  { %1239 = vadd.xlane.f32.xlu1 %v1238_v13 }
 0x757   :  { %7874 = vrot.lane.b32.xlu0 %v9220_v53, %s8765_s10 }
 0x759   :  { %1429 = vrot.lane.b32.xlu1 %v9218_v51, %s8765_s10 }
 0x75b   :  { %1518 = vrot.lane.b32.xlu0 %v9222_v54, %s8765_s10 }
 0x75d   :  { %1520 = vrot.lane.b32.xlu1 %v9232_v55, %s8765_s10 }
 0x798   :  { %v1234_v16 = vpop.xlane.xlu1 %1233 }
 0x799   :  { %8060 = vrcp.f32 %v1234_v16  ;;  %v1231_v44 = vpop.xlane.xlu0 %1230 }
 0x79a   :  { %8062 = vrcp.f32 %v1231_v44 }
 0x79c   :  { %v7865_v18 = vpop.permute.xlu1 %7864 }
 0x79d   :  { %v7867_v23 = vunpack.i.h.bf16 %v7865_v18  ;;  %v7866_v24 = vunpack.i.l.bf16 %v7865_v18  ;;  %v7860_v25 = vpop.permute.xlu0 %7859 }
 0x79e   :  { %v7862_v26 = vunpack.i.h.bf16 %v7860_v25  ;;  %v7861_v27 = vunpack.i.l.bf16 %v7860_v25 }
 0x79f   :  { %v7280_v28 = vpack.c.bf16 %v7867_v23, %v7866_v24 }
 0x7a0   :  { %v7870_v31 = vpop.permute.xlu1 %7869  ;;  %v7276_v32 = vpack.c.bf16 %v7862_v26, %v7861_v27 }
 0x7a1   :  { %v7872_v33 = vunpack.i.h.bf16 %v7870_v31  ;;  %v7871_v34 = vunpack.i.l.bf16 %v7870_v31  ;;  %7281 = vmatprep.subr.bf16.mxu1 %v7280_v28 }
 0x7a2   :  { %7277 = vmatprep.subr.bf16.mxu0 %v7276_v32  ;;  %7283 = vmatpush3.bf16.msra.mxu1 %v7280_v28 }
 0x7a3   :  { %v8061_v36 = vpop.eup %8060  ;;  %v7284_v37 = vpack.c.bf16 %v7872_v33, %v7871_v34  ;;  %7279 = vmatpush3.bf16.msra.mxu0 %v7276_v32 }
 0x7a4   :  { %v8063_v40 = vpop.eup %8062  ;;  %v1244_v43 = vmul.f32 %v8061_v36, %v8053_v62  ;;  %v1428_v48 = vpop.permute.xlu1 %1427 }
 0x7a5   :  { %7286 = vmatprep.subr.msk.bf16.mxu0 %vm9202_vm1, %v7284_v37  ;;  %v1242_v42 = vmul.f32 %v8063_v40, %v8055_v63 }
 0x7a7   :  { %6853 = vmatprep.mubr.msk.f32.mxu0 %vm808_vm4, %v1242_v42 }
 0x7a8   :  { %6854 = vmatmul.mubr.msk.f32.vlgmr.msra.gmra.mrb[10].mxu0 %vm808_vm4, %v1244_v43 }
 0x7a9   :  { %6867 = vmatprep.mubr.msk.f32.mxu0 %vm625_vm0, %v1428_v48 }
 0x7ac   :  { %7289 = vmatpush3.bf16.xpose.msk.msra.mxu0 %vm9202_vm1, %v7284_v37 }
 0x7ce   :  { %v1237_v49 = vpop.xlane.xlu0 %1236 }
 0x7cf   :  { %8064 = vrcp.f32 %v1237_v49 }
 0x7d2   :  { %v7875_v50 = vpop.permute.xlu0 %7874 }
 0x7d3   :  { %v7877_v52 = vunpack.i.h.bf16 %v7875_v50  ;;  %v7876_v56 = vunpack.i.l.bf16 %v7875_v50 }
 0x7d5   :  { %v7290_v58 = vpack.c.bf16 %v7877_v52, %v7876_v56  ;;  %v1240_v60 = vpop.xlane.xlu1 %1239 }
 0x7d6   :  { %8066 = vrcp.f32 %v1240_v60  ;;  %v1519_v5 = vpop.permute.xlu0 %1518 }
 0x7d7   :  { %7292 = vmatprep.subr.msk.bf16.mxu1 %vm9202_vm1, %v7290_v58 }
 0x7d9   :  { %v8065_v62 = vpop.eup %8064  ;;  %v1430_v63 = vpop.permute.xlu1 %1429 }
 0x7da   :  { %6868 = vmatmul.mubr.msk.f32.vlgmr.msra.gmra.mrb[12].mxu0 %vm625_vm0, %v1430_v63  ;;  %v1246_v0 = vmul.f32 %v8065_v62, %v8057_v46 }
 0x7dc   :  { %6860 = vmatprep.mubr.msk.f32.mxu1 %vm808_vm4, %v1246_v0 }
 0x7dd   :  { %v1521_v6 = vpop.permute.xlu1 %1520 }
 0x7e0   :  { %v8067_v1 = vpop.eup %8066 }
 0x7e1   :  { %v1248_v2 = vmul.f32 %v8067_v1, %v8059_v47 }
 0x7e3   :  { %6861 = vmatmul.mubr.msk.f32.vlgmr.msra.gmra.mrb[14].mxu1 %vm808_vm4, %v1248_v2 }
 0x7e4   :  { %7295 = vmatpush3.bf16.xpose.msk.msra.mxu1 %vm9202_vm1, %v7290_v58  ;;  %6874 = vmatprep.mubr.msk.f32.mxu1 %vm625_vm0, %v1519_v5 }
 0x7eb   :  { %6875 = vmatmul.mubr.msk.f32.vlgmr.msra.gmra.mrb[16].mxu1 %vm625_vm0, %v1521_v6 }
 0x87b   :  { %v9340_v7 = vpop.f32.mrb[10].mxu0 }
 0x87c   :  { %v9342_v38 = vpop.f32.mrb[11].mxu0 }
 0x87d   :  { %v7908_v10 = vpack.i.bf16 %v9340_v7, %v9342_v38 }
 0x8ad   :  { %v6869_v46 = vpop.f32.mrb[12].mxu0 }
 0x8ae   :  { %v1610_v39 = vmul.f32 0.17677669, %v6869_v46  ;;  %v1509_v47 = vpop.f32.mrb[13].mxu0 }
 0x8af   :  { %v1609_v13 = vmul.f32 0.17677669, %v1509_v47 }
 0x8b0   :  { %v1614_v16 = vadd.f32 %v1610_v39, %v9243_v59 }
 0x8b1   :  { %v1613_v44 = vadd.f32 %v1609_v13, %v9245_v61 }
 0x8b2   :  { %v1620_v18 = vsel %vm808_vm4, %v1614_v16, -inf }
 0x8b3   :  { %1621 = vmax.xlane.f32.xlu1 %v1620_v18  ;;  %v1617_v23 = vsel %vm808_vm4, %v1613_v44, -inf }
 0x8b4   :  { %1618 = vmax.xlane.f32.xlu0 %v1617_v23 }
 0x8b6   :  { %v9350_v24 = vpop.f32.mrb[14].mxu1 }
 0x8b7   :  { %v9352_v25 = vpop.f32.mrb[15].mxu1 }
 0x8b8   :  { %v7923_v26 = vpack.i.bf16 %v9350_v24, %v9352_v25 }
 0x8be   :  { %v6876_v27 = vpop.f32.mrb[16].mxu1 }
 0x8bf   :  { %v1600_v28 = vpop.f32.mrb[17].mxu1  ;;  %v1612_v31 = vmul.f32 0.17677669, %v6876_v27 }
 0x8c0   :  { %v1611_v32 = vmul.f32 0.17677669, %v1600_v28 }
 0x8c1   :  { %v1616_v36 = vadd.f32 %v1612_v31, %v9243_v59 }
 0x8c2   :  { %v1615_v33 = vadd.f32 %v1611_v32, %v9245_v61 }
 0x8c3   :  { %v1626_v37 = vsel %vm808_vm4, %v1616_v36, -inf }
 0x8c4   :  { %v1623_v34 = vsel %vm808_vm4, %v1615_v33, -inf }
 0x8c5   :  { %1624 = vmax.xlane.f32.xlu0 %v1623_v34 }
 0x8c9   :  { %1627 = vmax.xlane.f32.xlu0 %v1626_v37 }
 0x940   :  { %v1622_v40 = vpop.xlane.xlu1 %1621 }
 0x941   :  { %v1630_v42 = vsub.f32 %v1614_v16, %v1622_v40  ;;  %v1619_v43 = vpop.xlane.xlu0 %1618 }
 0x942   :  { %v1629_v48 = vsub.f32 %v1613_v44, %v1619_v43 }
 0x943   :  { %v1635_v49 = vmul.f32 1.442695, %v1630_v42 }
 0x944   :  { %v1633_v50 = vmul.f32 1.442695, %v1629_v48 }
 0x945   :  { %8068 = vpow2.f32 %v1635_v49 }
 0x946   :  { %8070 = vpow2.f32 %v1633_v50 }
 0x94f   :  { %v8069_v52 = vpop.eup %8068 }
 0x950   :  { %v8071_v56 = vpop.eup %8070  ;;  %v1644_v58 = vsel %vm808_vm4, %v8069_v52, 0.0 }
 0x951   :  { %1645 = vadd.xlane.f32.xlu1 %v1644_v58  ;;  %v1641_v60 = vsel %vm808_vm4, %v8071_v56, 0.0 }
 0x952   :  { %1642 = vadd.xlane.f32.xlu0 %v1641_v60  ;;  %v1625_v62 = vpop.xlane.xlu0 %1624 }
 0x953   :  { %v1631_v63 = vsub.f32 %v1615_v33, %v1625_v62 }
 0x955   :  { %v1637_v0 = vmul.f32 1.442695, %v1631_v63 }
 0x956   :  { %v1628_v1 = vpop.xlane.xlu0 %1627 }
 0x957   :  { %v1632_v2 = vsub.f32 %v1616_v36, %v1628_v1  ;;  %8072 = vpow2.f32 %v1637_v0 }
 0x959   :  { %v1639_v5 = vmul.f32 1.442695, %v1632_v2 }
 0x95b   :  { %8074 = vpow2.f32 %v1639_v5 }
 0x961   :  { %v8073_v6 = vpop.eup %8072 }
 0x962   :  { %7884 = vrot.lane.b32.xlu1 %v9216_v45, %s8765_s10  ;;  %v1647_v46 = vsel %vm808_vm4, %v8073_v6, 0.0 }
 0x965   :  { %v8075_v39 = vpop.eup %8074 }
 0x966   :  { %7889 = vrot.lane.b32.xlu1 %v9206_v35, %s8778_s25  ;;  %v1650_v35 = vsel %vm808_vm4, %v8075_v39, 0.0 }
 0x968   :  { %7879 = vrot.lane.b32.xlu0 %v9208_v41, %s8765_s10 }
 0x96a   :  { %1835 = vrot.lane.b32.xlu1 %v9194_v17, %s8778_s25 }
 0x987   :  { %1648 = vadd.xlane.f32.xlu0 %v1647_v46 }
 0x98e   :  { %1651 = vadd.xlane.f32.xlu1 %v1650_v35 }
 0x99d   :  { %7894 = vrot.lane.b32.xlu0 %v9220_v53, %s8778_s25 }
 0x99f   :  { %1837 = vrot.lane.b32.xlu1 %v9218_v51, %s8778_s25 }
 0x9a1   :  { %1926 = vrot.lane.b32.xlu0 %v9222_v54, %s8778_s25 }
 0x9a3   :  { %1928 = vrot.lane.b32.xlu1 %v9232_v55, %s8778_s25 }
 0x9de   :  { %v1646_v17 = vpop.xlane.xlu1 %1645 }
 0x9df   :  { %8076 = vrcp.f32 %v1646_v17  ;;  %v1643_v47 = vpop.xlane.xlu0 %1642 }
 0x9e0   :  { %8078 = vrcp.f32 %v1643_v47 }
 0x9e2   :  { %v7885_v13 = vpop.permute.xlu1 %7884 }
 0x9e3   :  { %v7887_v16 = vunpack.i.h.bf16 %v7885_v13  ;;  %v7886_v44 = vunpack.i.l.bf16 %v7885_v13  ;;  %v7880_v18 = vpop.permute.xlu0 %7879 }
 0x9e4   :  { %v7882_v23 = vunpack.i.h.bf16 %v7880_v18  ;;  %v7881_v27 = vunpack.i.l.bf16 %v7880_v18 }
 0x9e5   :  { %v7300_v53 = vpack.c.bf16 %v7887_v16, %v7886_v44 }
 0x9e6   :  { %v7890_v28 = vpop.permute.xlu1 %7889  ;;  %v7296_v31 = vpack.c.bf16 %v7882_v23, %v7881_v27 }
 0x9e7   :  { %v7892_v51 = vunpack.i.h.bf16 %v7890_v28  ;;  %v7891_v32 = vunpack.i.l.bf16 %v7890_v28  ;;  %7301 = vmatprep.subr.bf16.mxu1 %v7300_v53 }
 0x9e8   :  { %7297 = vmatprep.subr.bf16.mxu0 %v7296_v31  ;;  %7303 = vmatpush3.bf16.msra.mxu1 %v7300_v53 }
 0x9e9   :  { %v8077_v54 = vpop.eup %8076  ;;  %v7304_v55 = vpack.c.bf16 %v7892_v51, %v7891_v32  ;;  %7299 = vmatpush3.bf16.msra.mxu0 %v7296_v31 }
 0x9ea   :  { %v8079_v33 = vpop.eup %8078  ;;  %v1656_v36 = vmul.f32 %v8077_v54, %v8069_v52  ;;  %v1836_v37 = vpop.permute.xlu1 %1835 }
 0x9eb   :  { %7306 = vmatprep.subr.msk.bf16.mxu0 %vm9202_vm1, %v7304_v55  ;;  %v1654_v34 = vmul.f32 %v8079_v33, %v8071_v56 }
 0x9ed   :  { %6881 = vmatprep.mubr.msk.f32.mxu0 %vm808_vm4, %v1654_v34 }
 0x9ee   :  { %6882 = vmatmul.mubr.msk.f32.vlgmr.msra.gmra.mrb[14].mxu0 %vm808_vm4, %v1656_v36 }
 0x9ef   :  { %6895 = vmatprep.mubr.msk.f32.mxu0 %vm625_vm0, %v1836_v37 }
 0x9f2   :  { %7309 = vmatpush3.bf16.xpose.msk.msra.mxu0 %vm9202_vm1, %v7304_v55 }
 0xa14   :  { %v1649_v40 = vpop.xlane.xlu0 %1648 }
 0xa15   :  { %8080 = vrcp.f32 %v1649_v40 }
 0xa18   :  { %v7895_v42 = vpop.permute.xlu0 %7894 }
 0xa19   :  { %v7897_v43 = vunpack.i.h.bf16 %v7895_v42  ;;  %v7896_v48 = vunpack.i.l.bf16 %v7895_v42 }
 0xa1b   :  { %v7310_v49 = vpack.c.bf16 %v7897_v43, %v7896_v48  ;;  %v1652_v50 = vpop.xlane.xlu1 %1651 }
 0xa1c   :  { %8082 = vrcp.f32 %v1652_v50  ;;  %v1927_v63 = vpop.permute.xlu0 %1926 }
 0xa1d   :  { %7312 = vmatprep.subr.msk.bf16.mxu1 %vm9202_vm1, %v7310_v49 }
 0xa1f   :  { %v8081_v52 = vpop.eup %8080  ;;  %v1838_v56 = vpop.permute.xlu1 %1837 }
 0xa20   :  { %6896 = vmatmul.mubr.msk.f32.vlgmr.msra.gmra.mrb[16].mxu0 %vm625_vm0, %v1838_v56  ;;  %v1658_v58 = vmul.f32 %v8081_v52, %v8073_v6 }
 0xa22   :  { %6888 = vmatprep.mubr.msk.f32.mxu1 %vm808_vm4, %v1658_v58 }
 0xa23   :  { %v1929_v0 = vpop.permute.xlu1 %1928 }
 0xa26   :  { %v8083_v60 = vpop.eup %8082 }
 0xa27   :  { %v1660_v62 = vmul.f32 %v8083_v60, %v8075_v39 }
 0xa29   :  { %6889 = vmatmul.mubr.msk.f32.vlgmr.msra.gmra.mrb[18].mxu1 %vm808_vm4, %v1660_v62 }
 0xa2a   :  { %7315 = vmatpush3.bf16.xpose.msk.msra.mxu1 %vm9202_vm1, %v7310_v49  ;;  %6902 = vmatprep.mubr.msk.f32.mxu1 %vm625_vm0, %v1927_v63 }
 0xa31   :  { %6903 = vmatmul.mubr.msk.f32.vlgmr.msra.gmra.mrb[20].mxu1 %vm625_vm0, %v1929_v0 }
 0xac1   :  { %v6883_v1 = vpop.f32.mrb[14].mxu0 }
 0xac2   :  { %v1739_v2 = vpop.f32.mrb[15].mxu0 }
 0xac3   :  { %v7913_v5 = vpack.i.bf16 %v6883_v1, %v1739_v2 }
 0xaf3   :  { %v6897_v46 = vpop.f32.mrb[16].mxu0 }
 0xaf4   :  { %v2018_v6 = vmul.f32 0.17677669, %v6897_v46  ;;  %v1917_v35 = vpop.f32.mrb[17].mxu0 }
 0xaf5   :  { %v2017_v17 = vmul.f32 0.17677669, %v1917_v35 }
 0xaf6   :  { %v2022_v39 = vadd.f32 %v2018_v6, %v9243_v59 }
 0xaf7   :  { %v2021_v47 = vadd.f32 %v2017_v17, %v9245_v61 }
 0xaf8   :  { %v2028_v13 = vsel %vm808_vm4, %v2022_v39, -inf }
 0xaf9   :  { %2029 = vmax.xlane.f32.xlu1 %v2028_v13  ;;  %v2025_v16 = vsel %vm808_vm4, %v2021_v47, -inf }
 0xafa   :  { %2026 = vmax.xlane.f32.xlu0 %v2025_v16 }
 0xafc   :  { %v9400_v44 = vpop.f32.mrb[18].mxu1 }
 0xafd   :  { %v9402_v18 = vpop.f32.mrb[19].mxu1 }
 0xafe   :  { %v7928_v23 = vpack.i.bf16 %v9400_v44, %v9402_v18 }
 0xb04   :  { %v6904_v27 = vpop.f32.mrb[20].mxu1 }
 0xb05   :  { %v2008_v53 = vpop.f32.mrb[21].mxu1  ;;  %v2020_v28 = vmul.f32 0.17677669, %v6904_v27 }
 0xb06   :  { %v2019_v31 = vmul.f32 0.17677669, %v2008_v53 }
 0xb07   :  { %v2024_v54 = vadd.f32 %v2020_v28, %v9243_v59 }
 0xb08   :  { %v2023_v51 = vadd.f32 %v2019_v31, %v9245_v61 }
 0xb09   :  { %v2034_v55 = vsel %vm808_vm4, %v2024_v54, -inf }
 0xb0a   :  { %v2031_v32 = vsel %vm808_vm4, %v2023_v51, -inf }
 0xb0b   :  { %2032 = vmax.xlane.f32.xlu0 %v2031_v32  ;;  %v2306_v32 = vld [vmem:[#allocation15 + $0x8] sm:$0xff] }
 0xb0f   :  { %2035 = vmax.xlane.f32.xlu0 %v2034_v55 }
 0xb86   :  { %v2030_v33 = vpop.xlane.xlu1 %2029 }
 0xb87   :  { %v2038_v34 = vsub.f32 %v2022_v39, %v2030_v33  ;;  %v2027_v36 = vpop.xlane.xlu0 %2026  ;;  %v2308_v33 = vld [vmem:[#allocation15 + $0x18] sm:$0xff] }
 0xb88   :  { %v2037_v37 = vsub.f32 %v2021_v47, %v2027_v36  ;;  %v2309_v36 = vld [vmem:[#allocation15 + $0x20] sm:$0xff] }
 0xb89   :  { %v2043_v40 = vmul.f32 1.442695, %v2038_v34 }
 0xb8a   :  { %v2041_v42 = vmul.f32 1.442695, %v2037_v37  ;;  %v2310_v37 = vld [vmem:[#allocation15 + $0x28] sm:$0xff] }
 0xb8b   :  { %8084 = vpow2.f32 %v2043_v40  ;;  %v7332_v40 = vpack.c.bf16 %v2310_v37, %v2309_v36 }
 0xb8c   :  { %8086 = vpow2.f32 %v2041_v42  ;;  %v2311_v42 = vld [vmem:[#allocation15 + $0x30] sm:$0xff] }
 0xb95   :  { %v8085_v43 = vpop.eup %8084 }
 0xb96   :  { %v8087_v48 = vpop.eup %8086  ;;  %v2052_v49 = vsel %vm808_vm4, %v8085_v43, 0.0 }
 0xb97   :  { %2053 = vadd.xlane.f32.xlu1 %v2052_v49  ;;  %v2049_v50 = vsel %vm808_vm4, %v8087_v48, 0.0  ;;  %v2313_v49 = vld [vmem:[#allocation15 + $0x40] sm:$0xff] }
 0xb98   :  { %v2033_v52 = vpop.xlane.xlu0 %2032  ;;  %2050 = vadd.xlane.f32.xlu0 %v2049_v50  ;;  %v2314_v50 = vld [vmem:[#allocation15 + $0x48] sm:$0xff] }
 0xb99   :  { %v2039_v56 = vsub.f32 %v2023_v51, %v2033_v52  ;;  %v2305_v51 = vld [vmem:[#allocation15] sm:$0xff]  ;;  %v7340_v52 = vpack.c.bf16 %v2314_v50, %v2313_v49 }
 0xb9a   :  { %v7324_v55 = vpack.c.bf16 %v2306_v32, %v2305_v51 }
 0xb9b   :  { %v2045_v58 = vmul.f32 1.442695, %v2039_v56  ;;  %v2315_v56 = vld [vmem:[#allocation15 + $0x50] sm:$0xff] }
 0xb9c   :  { %v2036_v60 = vpop.xlane.xlu0 %2035 }
 0xb9d   :  { %8088 = vpow2.f32 %v2045_v58  ;;  %v2040_v62 = vsub.f32 %v2024_v54, %v2036_v60  ;;  %v2307_v54 = vld [vmem:[#allocation15 + $0x10] sm:$0xff]  ;;  %v2316_v58 = vld [vmem:[#allocation15 + $0x58] sm:$0xff] }
 0xb9e   :  { %v7328_v34 = vpack.c.bf16 %v2308_v33, %v2307_v54  ;;  %v7344_v60 = vpack.c.bf16 %v2316_v58, %v2315_v56 }
 0xb9f   :  { %v2047_v63 = vmul.f32 1.442695, %v2040_v62  ;;  %v2317_v62 = vld [vmem:[#allocation15 + $0x60] sm:$0xff] }
 0xba1   :  { %8090 = vpow2.f32 %v2047_v63  ;;  %v2318_v63 = vld [vmem:[#allocation15 + $0x68] sm:$0xff] }
 0xba7   :  { %v8089_v0 = vpop.eup %8088 }
 0xba8   :  { %v2055_v1 = vsel %vm808_vm4, %v8089_v0, 0.0 }
 0xba9   :  { %2056 = vadd.xlane.f32.xlu0 %v2055_v1  ;;  %v2319_v1 = vld [vmem:[#allocation15 + $0x70] sm:$0xff] }
 0xbab   :  { %v8091_v2 = vpop.eup %8090 }
 0xbac   :  { %v2058_v46 = vsel %vm808_vm4, %v8091_v2, 0.0 }
 0xbad   :  { %2059 = vadd.xlane.f32.xlu1 %v2058_v46 }
 0xbbe   :  { %7904 = vrot.lane.b32.xlu1 %v9216_v45, %s8778_s25 }
 0xbbf   :  { %7899 = vrot.lane.b32.xlu0 %v9208_v41, %s8778_s25 }
 0xbc2   :  { %7909 = vrot.lane.b32.xlu1 %v7908_v10, %s8778_s25 }
 0xbc6   :  { %7914 = vrot.lane.b32.xlu1 %v7913_v5, %s8765_s10 }
 0xbca   :  { %7924 = vrot.lane.b32.xlu1 %v7923_v26, %s8778_s25 }
 0xc24   :  { %v2054_v17 = vpop.xlane.xlu1 %2053 }
 0xc25   :  { %v2051_v6 = vpop.xlane.xlu0 %2050 }
 0xc26   :  { %8092 = vrcp.f32 %v2051_v6 }
 0xc27   :  { %8094 = vrcp.f32 %v2054_v17 }
 0xc30   :  { %v8093_v35 = vpop.eup %8092 }
 0xc31   :  { %v2062_v45 = vmul.f32 %v8093_v35, %v8087_v48  ;;  %v8095_v47 = vpop.eup %8094 }
 0xc32   :  { %v2064_v16 = vmul.f32 %v8095_v47, %v8085_v43  ;;  %v2312_v43 = vld [vmem:[#allocation15 + $0x38] sm:$0xff] }
 0xc33   :  { %6909 = vmatprep.mubr.msk.f32.mxu0 %vm808_vm4, %v2062_v45  ;;  %v7336_v48 = vpack.c.bf16 %v2312_v43, %v2311_v42 }
 0xc36   :  { %v2057_v41 = vpop.xlane.xlu0 %2056 }
 0xc37   :  { %8096 = vrcp.f32 %v2057_v41 }
 0xc3a   :  { %v2060_v39 = vpop.xlane.xlu1 %2059  ;;  %v7900_v7 = vpop.permute.xlu0 %7899 }
 0xc3b   :  { %8098 = vrcp.f32 %v2060_v39  ;;  %v7902_v38 = vunpack.i.h.bf16 %v7900_v7  ;;  %v7901_v10 = vunpack.i.l.bf16 %v7900_v7 }
 0xc3d   :  { %v7316_v5 = vpack.c.bf16 %v7902_v38, %v7901_v10 }
 0xc3e   :  { %v7905_v13 = vpop.permute.xlu1 %7904 }
 0xc3f   :  { %v7907_v24 = vunpack.i.h.bf16 %v7905_v13  ;;  %v7906_v25 = vunpack.i.l.bf16 %v7905_v13  ;;  %7317 = vmatprep.subr.bf16.mxu0 %v7316_v5 }
 0xc40   :  { %7319 = vmatpush3.bf16.msra.mxu0 %v7316_v5 }
 0xc41   :  { %v8097_v26 = vpop.eup %8096  ;;  %v7320_v27 = vpack.c.bf16 %v7907_v24, %v7906_v25  ;;  %7325 = vmatprep.subr.bf16.mxu0 %v7324_v55 }
 0xc42   :  { %v2066_v53 = vmul.f32 %v8097_v26, %v8089_v0  ;;  %v7348_v0 = vpack.c.bf16 %v2318_v63, %v2317_v62  ;;  %v7910_v7 = vpop.permute.xlu1 %7909 }
 0xc43   :  { %6910 = vmatmul.mubr.msk.f32.vlgmr.msra.gmra.mrb[18].mxu0 %vm808_vm4, %v2064_v16  ;;  %7321 = vmatprep.subr.bf16.mxu1 %v7320_v27  ;;  %v7912_v10 = vunpack.i.h.bf16 %v7910_v7  ;;  %v7911_v5 = vunpack.i.l.bf16 %v7910_v7  ;;  %v2493_v7 = vld [vmem:[#allocation21 + $0x30] sm:$0xff] }
 0xc44   :  { %7323 = vmatpush3.bf16.msra.mxu1 %v7320_v27  ;;  %6916 = vmatprep.mubr.msk.f32.mxu1 %vm808_vm4, %v2066_v53 }
 0xc45   :  { %v8099_v28 = vpop.eup %8098  ;;  %7327 = vmatpush3.bf16.msra.mxu0 %v7324_v55  ;;  %v2291_v27 = vsel %vm625_vm0, %v9290_v20, %v7911_v5  ;;  %v2292_v44 = vsel %vm625_vm0, %v9288_v19, %v7912_v10  ;;  %v2500_v10 = vld [vmem:[#allocation21 + $0x68] sm:$0xff]  ;;  %v2498_v5 = vld [vmem:[#allocation21 + $0x58] sm:$0xff] }
 0xc46   :  { %v2068_v31 = vmul.f32 %v8099_v28, %v8091_v2  ;;  %7329 = vmatprep.subr.bf16.mxu0 %v7328_v34  ;;  %v2320_v2 = vld [vmem:[#allocation15 + $0x78] sm:$0xff]  ;;  %v7915_v38 = vpop.permute.xlu1 %7914 }
 0xc47   :  { %v7352_v46 = vpack.c.bf16 %v2320_v2, %v2319_v1  ;;  %v7917_v47 = vunpack.i.h.bf16 %v7915_v38  ;;  %v7916_v13 = vunpack.i.l.bf16 %v7915_v38  ;;  %v2490_v2 = vld [vmem:[#allocation21 + $0x18] sm:$0xff] }
 0xc48   :  { %6917 = vmatmul.mubr.msk.f32.vlgmr.msra.gmra.mrb[22].mxu1 %vm808_vm4, %v2068_v31 }
 0xc49   :  { %2616 = vmatprep.mubr.f32.mxu1 %v8782_v29  ;;  %7331 = vmatpush3.bf16.msra.mxu0 %v7328_v34  ;;  %v2296_v53 = vsel %vm2295_vm5, %v2291_v27, %v7916_v13  ;;  %v2297_v28 = vsel %vm2295_vm5, %v2292_v44, %v7917_v47  ;;  %v2501_v27 = vld [vmem:[#allocation21 + $0x70] sm:$0xff]  ;;  %v2504_v44 = vld [vmem:[#allocation21 + $0x88] sm:$0xff] }
 0xc4a   :  { %7333 = vmatprep.subr.bf16.mxu0 %v7332_v40  ;;  %v7925_v24 = vpop.permute.xlu1 %7924 }
 0xc4b   :  { %v7927_v18 = vunpack.i.h.bf16 %v7925_v24 }
 0xc4d   :  { %7335 = vmatpush3.bf16.msra.mxu0 %v7332_v40  ;;  %v2294_v36 = vsel %vm625_vm0, %v9292_v21, %v7927_v18  ;;  %v2508_v18 = vld [vmem:[#allocation21 + $0xa8] sm:$0xff] }
 0xc4e   :  { %7337 = vmatprep.subr.bf16.mxu0 %v7336_v48 }
 0xc51   :  { %7339 = vmatpush3.bf16.msra.mxu0 %v7336_v48  ;;  %v6273_v48 = vld [vmem:[#allocation16] ss:$0 sm:$0xff] }
 0xc52   :  { %7341 = vmatprep.subr.bf16.mxu0 %v7340_v52 }
 0xc55   :  { %7343 = vmatpush3.bf16.msra.mxu0 %v7340_v52 }
 0xc56   :  { %7345 = vmatprep.subr.bf16.mxu0 %v7344_v60 }
 0xc59   :  { %7347 = vmatpush3.bf16.msra.mxu0 %v7344_v60 }
 0xc5a   :  { %7349 = vmatprep.subr.bf16.mxu0 %v7348_v0 }
 0xc5d   :  { %7351 = vmatpush3.bf16.msra.mxu0 %v7348_v0 }
 0xc5e   :  { %7353 = vmatprep.subr.bf16.mxu0 %v7352_v46 }
 0xc61   :  { %7355 = vmatpush3.bf16.msra.mxu0 %v7352_v46 }
 0xd16   :  { %v6911_v6 = vpop.f32.mrb[18].mxu0 }
 0xd17   :  { %v2147_v35 = vpop.f32.mrb[19].mxu0 }
 0xd18   :  { %v7918_v17 = vpack.i.bf16 %v6911_v6, %v2147_v35  ;;  %v2494_v6 = vld [vmem:[#allocation21 + $0x38] sm:$0xff]  ;;  %v2487_v35 = vld [vmem:[#allocation21] sm:$0xff] }
 0xd1a   :  { %7919 = vrot.lane.b32.xlu0 %v7918_v17, %s8784_s17  ;;  %v2491_v17 = vld [vmem:[#allocation21 + $0x20] sm:$0xff] }
 0xd1b   :  { %v6918_v45 = vpop.f32.mrb[22].mxu1 }
 0xd1c   :  { %v2234_v41 = vpop.f32.mrb[23].mxu1 }
 0xd1d   :  { %v7933_v39 = vpack.i.bf16 %v6918_v45, %v2234_v41  ;;  %v7388_v45 = vpack.c.bf16 %v2494_v6, %v2490_v2  ;;  %v7358_v41 = vpack.c.bf16 %v2491_v17, %v2487_v35  ;;  %v2516_v2 = vld [vmem:[#allocation21 + $0xe8] sm:$0xff]  ;;  %v2518_v35 = vld [vmem:[#allocation21 + $0xf8] sm:$0xff]  ;;  %v2511_v17 = vld [vmem:[#allocation21 + $0xc0] sm:$0xff] }
 0xd1e   :  { %7929 = vrot.lane.b32.xlu0 %v7928_v23, %s8765_s10  ;;  %v7926_v23 = vunpack.i.l.bf16 %v7925_v24  ;;  %v2495_v24 = vld [vmem:[#allocation21 + $0x40] sm:$0xff] }
 0xd1f   :  { %7934 = vrot.lane.b32.xlu1 %v7933_v39, %s8784_s17  ;;  %v2489_v39 = vld [vmem:[#allocation21 + $0x10] sm:$0xff]  ;;  %7389 = vmatprep.subr.bf16.mxu0 %v7388_v45  ;;  %v2515_v45 = vld [vmem:[#allocation21 + $0xe0] sm:$0xff] }
 0xd20   :  { %v2293_v19 = vsel %vm625_vm0, %v9294_v22, %v7926_v23  ;;  %v7390_v38 = vpack.c.bf16 %v2493_v7, %v2489_v39  ;;  %v7370_v39 = vpack.c.bf16 %v2515_v45, %v2511_v17  ;;  %v2513_v7 = vld [vmem:[#allocation21 + $0xd0] sm:$0xff] }
 0xd8c   :  { %v7920_v25 = vpop.permute.xlu0 %7919 }
 0xd8d   :  { %v7922_v26 = vunpack.i.h.bf16 %v7920_v25  ;;  %v7921_v16 = vunpack.i.l.bf16 %v7920_v25  ;;  %v2499_v25 = vld [vmem:[#allocation21 + $0x60] sm:$0xff] }
 0xd8f   :  { %v2301_v31 = vsel %vm2300_vm6, %v2296_v53, %v7921_v16  ;;  %v2302_v51 = vsel %vm2300_vm6, %v2297_v28, %v7922_v26  ;;  %v2497_v26 = vld [vmem:[#allocation21 + $0x50] sm:$0xff]  ;;  %v7362_v16 = vpack.c.bf16 %v2499_v25, %v2495_v24  ;;  %v7364_v53 = vpack.c.bf16 %v2508_v18, %v2504_v44  ;;  %v2506_v28 = vld [vmem:[#allocation21 + $0x98] sm:$0xff]  ;;  %v2519_v24 = vld [vmem:[#allocation21 + $0x100] sm:$0xff] }
 0xd90   :  { %v7930_v32 = vpop.permute.xlu0 %7929  ;;  %6951 = vmatprep.mubr.f32.mxu0 %v2301_v31  ;;  %v7394_v23 = vpack.c.bf16 %v2501_v27, %v2497_v26  ;;  %v2510_v31 = vld [vmem:[#allocation21 + $0xb8] sm:$0xff]  ;;  %v2523_v25 = vld [vmem:[#allocation21 + $0x120] sm:$0xff]  ;;  %v2521_v27 = vld [vmem:[#allocation21 + $0x110] sm:$0xff] }
 0xd91   :  { %v7932_v54 = vunpack.i.h.bf16 %v7930_v32  ;;  %v7931_v55 = vunpack.i.l.bf16 %v7930_v32  ;;  %v7935_v33 = vpop.permute.xlu1 %7934  ;;  %6952 = vmatmul.mubr.f32.vlgmr.msra.gmra.mrb[20].mxu0 %v2302_v51  ;;  %v2503_v51 = vld [vmem:[#allocation21 + $0x80] sm:$0xff]  ;;  %v7396_v32 = vpack.c.bf16 %v2510_v31, %v2506_v28  ;;  %v2525_v44 = vld [vmem:[#allocation21 + $0x130] sm:$0xff]  ;;  %v2530_v28 = vld [vmem:[#allocation21 + $0x158] sm:$0xff] }
 0xd92   :  { %v7937_v20 = vunpack.i.h.bf16 %v7935_v33  ;;  %v7936_v34 = vunpack.i.l.bf16 %v7935_v33  ;;  %7391 = vmatpush1.bf16.msra.mxu0 %v7390_v38  ;;  %v2509_v33 = vld [vmem:[#allocation21 + $0xb0] sm:$0xff]  ;;  %v7406_v18 = vpack.c.bf16 %v2525_v44, %v2521_v27 }
 0xd93   :  { %v2298_v37 = vsel %vm2295_vm5, %v2293_v19, %v7931_v55  ;;  %v2299_v40 = vsel %vm2295_vm5, %v2294_v36, %v7932_v54  ;;  %v2507_v54 = vld [vmem:[#allocation21 + $0xa0] sm:$0xff]  ;;  %v2505_v55 = vld [vmem:[#allocation21 + $0x90] sm:$0xff] }
 0xd94   :  { %v2303_v42 = vsel %vm2300_vm6, %v2298_v37, %v7936_v34  ;;  %v2304_v43 = vsel %vm2300_vm6, %v2299_v40, %v7937_v20  ;;  %v7366_v20 = vpack.c.bf16 %v2507_v54, %v2503_v51  ;;  %v7398_v34 = vpack.c.bf16 %v2509_v33, %v2505_v55  ;;  %v2534_v51 = vld [vmem:[#allocation21 + $0x178] sm:$0xff]  ;;  %v2531_v54 = vld [vmem:[#allocation21 + $0x160] sm:$0xff] }
 0xd95   :  { %6954 = vmatprep.mubr.f32.mxu0 %v2303_v42  ;;  %v7408_v55 = vpack.c.bf16 %v2534_v51, %v2530_v28 }
 0xd96   :  { %6955 = vmatmul.mubr.f32.gmra.mrb[22].mxu0 %v2304_v43 }
 0xd97   :  { %2705 = vmatprep.mubr.f32.mxu0 %v8782_v29 }
 0xe64   :  { %v6953_v49 = vpop.f32.mrb[20].mxu0 }
 0xe65   :  { %v2414_v50 = vadd.f32 %v6953_v49, %v6273_v48  ;;  %v2388_v52 = vpop.f32.mrb[21].mxu0 }
 0xe66   :  { %v2413_v22 = vadd.f32 %v6273_v48, %v2388_v52 }
 0xe67   :  { %v9456_v56 = vadd.f32 %v2414_v50, %v9148_v8  ;;  %v2492_v8 = vld [vmem:[#allocation21 + $0x28] sm:$0xff] }
 0xe68   :  { %v9459_v21 = vadd.f32 %v2413_v22, %v9142_v3  ;;  %v2488_v3 = vld [vmem:[#allocation21 + $0x8] sm:$0xff] }
 0xe69   :  { %2425 = vadd.xlane.f32.xlu1 %v9456_v56  ;;  %v6956_v58 = vpop.f32.mrb[22].mxu0  ;;  %v7356_v46 = vpack.c.bf16 %v2492_v8, %v2488_v3  ;;  %v2512_v8 = vld [vmem:[#allocation21 + $0xc8] sm:$0xff] }
 0xe6a   :  { %2423 = vadd.xlane.f32.xlu0 %v9459_v21  ;;  %v2398_v60 = vpop.f32.mrb[23].mxu0  ;;  %v2416_v63 = vadd.f32 %v6956_v58, %v6273_v48  ;;  %v7368_v6 = vpack.c.bf16 %v2516_v2, %v2512_v8  ;;  %v2544_v8 = vld [vmem:[#allocation21 + $0x1c8] sm:$0xff] }
 0xe6b   :  { %v2415_v62 = vadd.f32 %v6273_v48, %v2398_v60  ;;  %7357 = vmatprep.subr.bf16.mxu1 %v7356_v46  ;;  %v2514_v46 = vld [vmem:[#allocation21 + $0xd8] sm:$0xff] }
 0xe6c   :  { %v9468_v1 = vadd.f32 %v2416_v63, %v9150_v9  ;;  %v2502_v9 = vld [vmem:[#allocation21 + $0x78] sm:$0xff]  ;;  %7359 = vmatpush1.bf16.msra.mxu1 %v7358_v41  ;;  %v7400_v41 = vpack.c.bf16 %v2518_v35, %v2514_v46  ;;  %v2548_v46 = vld [vmem:[#allocation21 + $0x1e8] sm:$0xff] }
 0xe6d   :  { %v9464_v0 = vadd.f32 %v2415_v62, %v9144_v4  ;;  %v2496_v4 = vld [vmem:[#allocation21 + $0x48] sm:$0xff]  ;;  %v7392_v13 = vpack.c.bf16 %v2502_v9, %v2498_v5  ;;  %v2522_v9 = vld [vmem:[#allocation21 + $0x118] sm:$0xff]  ;;  %v7384_v17 = vpack.c.bf16 %v2548_v46, %v2544_v8  ;;  %v2928_v46 = vld [vmem:[#allocation24 + $0x108] sm:$0xff] }
 0xe6e   :  { %v7360_v47 = vpack.c.bf16 %v2500_v10, %v2496_v4  ;;  %v2517_v4 = vld [vmem:[#allocation21 + $0xf0] sm:$0xff]  ;;  %v2520_v10 = vld [vmem:[#allocation21 + $0x108] sm:$0xff]  ;;  %v2550_v35 = vld [vmem:[#allocation21 + $0x1f8] sm:$0xff] }
 0xe6f   :  { %2427 = vadd.xlane.f32.xlu0 %v9464_v0  ;;  %7393 = vmatprep.subr.bf16.mxu0 %v7392_v13  ;;  %v7402_v38 = vpack.c.bf16 %v2517_v4, %v2513_v7  ;;  %v2524_v5 = vld [vmem:[#allocation21 + $0x128] sm:$0xff]  ;;  %v2526_v13 = vld [vmem:[#allocation21 + $0x138] sm:$0xff]  ;;  %v2545_v7 = vld [vmem:[#allocation21 + $0x1d0] sm:$0xff] }
 0xe70   :  { %7361 = vmatprep.subr.bf16.mxu1 %v7360_v47  ;;  %7395 = vmatpush1.bf16.msra.mxu0 %v7394_v23  ;;  %v7372_v47 = vpack.c.bf16 %v2524_v5, %v2520_v10  ;;  %v7404_v26 = vpack.c.bf16 %v2526_v13, %v2522_v9  ;;  %v2528_v23 = vld [vmem:[#allocation21 + $0x148] sm:$0xff] }
 0xe71   :  { %7363 = vmatpush1.bf16.msra.mxu1 %v7362_v16  ;;  %7397 = vmatprep.subr.bf16.mxu0 %v7396_v32  ;;  %v7374_v16 = vpack.c.bf16 %v2523_v25, %v2519_v24  ;;  %v2527_v32 = vld [vmem:[#allocation21 + $0x140] sm:$0xff] }
 0xe72   :  { %7365 = vmatprep.subr.bf16.mxu1 %v7364_v53  ;;  %v2532_v53 = vld [vmem:[#allocation21 + $0x168] sm:$0xff]  ;;  %v7378_v33 = vpack.c.bf16 %v2531_v54, %v2527_v32  ;;  %v6275_v54 = vld [vmem:[#allocation19] ss:$0 sm:$0xff] }
 0xe73   :  { %2429 = vadd.xlane.f32.xlu0 %v9468_v1  ;;  %v7376_v31 = vpack.c.bf16 %v2532_v53, %v2528_v23 }
 0xe74   :  { %7399 = vmatpush1.bf16.msra.mxu0 %v7398_v34  ;;  %v2533_v34 = vld [vmem:[#allocation21 + $0x170] sm:$0xff] }
 0xe75   :  { %7367 = vmatpush1.bf16.msra.mxu1 %v7366_v20  ;;  %7401 = vmatprep.subr.bf16.mxu0 %v7400_v41  ;;  %v2529_v20 = vld [vmem:[#allocation21 + $0x150] sm:$0xff]  ;;  %v2543_v41 = vld [vmem:[#allocation21 + $0x1c0] sm:$0xff] }
 0xe76   :  { %7369 = vmatprep.subr.bf16.mxu1 %v7368_v6  ;;  %v2546_v6 = vld [vmem:[#allocation21 + $0x1d8] sm:$0xff] }
 0xe77   :  { %v7416_v45 = vpack.c.bf16 %v2550_v35, %v2546_v6  ;;  %v2913_v35 = vld [vmem:[#allocation24 + $0x90] sm:$0xff] }
 0xe78   :  { %7403 = vmatpush1.bf16.msra.mxu0 %v7402_v38  ;;  %v2549_v38 = vld [vmem:[#allocation21 + $0x1f0] sm:$0xff] }
 0xe79   :  { %7371 = vmatpush1.bf16.msra.mxu1 %v7370_v39  ;;  %7405 = vmatprep.subr.bf16.mxu0 %v7404_v26  ;;  %v2547_v39 = vld [vmem:[#allocation21 + $0x1e0] sm:$0xff]  ;;  %v7418_v10 = vpack.c.bf16 %v2549_v38, %v2545_v7  ;;  %v2897_v7 = vld [vmem:[#allocation24 + $0x10] sm:$0xff] }
 0xe7a   :  { %7373 = vmatprep.subr.bf16.mxu1 %v7372_v47  ;;  %v7386_v4 = vpack.c.bf16 %v2547_v39, %v2543_v41  ;;  %v2946_v39 = vld [vmem:[#allocation24 + $0x198] sm:$0xff] }
 0xe7c   :  { %7407 = vmatpush1.bf16.msra.mxu0 %v7406_v18 }
 0xe7d   :  { %7375 = vmatpush1.bf16.msra.mxu1 %v7374_v16  ;;  %7409 = vmatprep.subr.bf16.mxu0 %v7408_v55 }
 0xe7e   :  { %7377 = vmatprep.subr.bf16.mxu1 %v7376_v31  ;;  %v6274_v31 = vld [vmem:[#allocation18] ss:$0 sm:$0xff] }
 0xe81   :  { %7379 = vmatpush1.bf16.msra.mxu1 %v7378_v33 }
 0xef6   :  { %v2426_v19 = vpop.xlane.xlu1 %2425 }
 0xef7   :  { %v2432_v36 = vmul.f32 0.0078125, %v2426_v19  ;;  %v2424_v37 = vpop.xlane.xlu0 %2423  ;;  %v7410_v19 = vpack.c.bf16 %v2533_v34, %v2529_v20 }
 0xef8   :  { %v2431_v40 = vmul.f32 0.0078125, %v2424_v37  ;;  %v2540_v37 = vld [vmem:[#allocation21 + $0x1a8] sm:$0xff] }
 0xef9   :  { %v9472_v42 = vsub.f32 %v9456_v56, %v2432_v36  ;;  %v2536_v36 = vld [vmem:[#allocation21 + $0x188] sm:$0xff]  ;;  %7411 = vmatpush1.bf16.msra.mxu0 %v7410_v19 }
 0xefa   :  { %v9475_v43 = vsub.f32 %v9459_v21, %v2431_v40  ;;  %v2538_v40 = vld [vmem:[#allocation21 + $0x198] sm:$0xff] }
 0xefb   :  { %v2440_v48 = vmul.f32 %v9472_v42, %v9472_v42 }
 0xefc   :  { %v2428_v49 = vpop.xlane.xlu0 %2427  ;;  %v2439_v50 = vmul.f32 %v9475_v43, %v9475_v43 }
 0xefd   :  { %v2433_v52 = vmul.f32 0.0078125, %v2428_v49  ;;  %2445 = vadd.xlane.f32.xlu1 %v2440_v48  ;;  %v7380_v48 = vpack.c.bf16 %v2540_v37, %v2536_v36  ;;  %v2542_v49 = vld [vmem:[#allocation21 + $0x1b8] sm:$0xff] }
 0xefe   :  { %2443 = vadd.xlane.f32.xlu0 %v2439_v50  ;;  %v2535_v50 = vld [vmem:[#allocation21 + $0x180] sm:$0xff] }
 0xeff   :  { %v9482_v22 = vsub.f32 %v9464_v0, %v2433_v52  ;;  %v2539_v52 = vld [vmem:[#allocation21 + $0x1a0] sm:$0xff]  ;;  %7381 = vmatprep.subr.bf16.mxu1 %v7380_v48 }
 0xf00   :  { %v2430_v58 = vpop.xlane.xlu0 %2429 }
 0xf01   :  { %v2434_v60 = vmul.f32 0.0078125, %v2430_v58  ;;  %v2441_v62 = vmul.f32 %v9482_v22, %v9482_v22  ;;  %v7412_v58 = vpack.c.bf16 %v2542_v49, %v2538_v40  ;;  %v2911_v49 = vld [vmem:[#allocation24 + $0x80] sm:$0xff] }
 0xf03   :  { %v9487_v63 = vsub.f32 %v9468_v1, %v2434_v60  ;;  %2447 = vadd.xlane.f32.xlu0 %v2441_v62  ;;  %v7382_v60 = vpack.c.bf16 %v2539_v52, %v2535_v50  ;;  %v2537_v62 = vld [vmem:[#allocation21 + $0x190] sm:$0xff]  ;;  %7413 = vmatprep.subr.bf16.mxu0 %v7412_v58 }
 0xf04   :  { %v2912_v50 = vld [vmem:[#allocation24 + $0x88] sm:$0xff] }
 0xf05   :  { %v2442_v3 = vmul.f32 %v9487_v63, %v9487_v63  ;;  %7383 = vmatpush1.bf16.msra.mxu1 %v7382_v60  ;;  %v7420_v52 = vpack.c.bf16 %v2912_v50, %v2911_v49  ;;  %v2944_v58 = vld [vmem:[#allocation24 + $0x188] sm:$0xff]  ;;  %v2895_v60 = vld [vmem:[#allocation24] sm:$0xff] }
 0xf06   :  { %7385 = vmatprep.subr.bf16.mxu1 %v7384_v17  ;;  %v2914_v17 = vld [vmem:[#allocation24 + $0x98] sm:$0xff]  ;;  %v2952_v50 = vld [vmem:[#allocation24 + $0x1c8] sm:$0xff] }
 0xf07   :  { %2449 = vadd.xlane.f32.xlu1 %v2442_v3  ;;  %v2541_v3 = vld [vmem:[#allocation21 + $0x1b0] sm:$0xff]  ;;  %v7424_v41 = vpack.c.bf16 %v2914_v17, %v2913_v35  ;;  %v2954_v17 = vld [vmem:[#allocation24 + $0x1d8] sm:$0xff] }
 0xf08   :  { %v7414_v2 = vpack.c.bf16 %v2541_v3, %v2537_v62  ;;  %v2896_v62 = vld [vmem:[#allocation24 + $0x8] sm:$0xff] }
 0xf09   :  { %7387 = vmatpush1.bf16.msra.mxu1 %v7386_v4  ;;  %v7422_v8 = vpack.c.bf16 %v2896_v62, %v2895_v60  ;;  %v2898_v4 = vld [vmem:[#allocation24 + $0x18] sm:$0xff]  ;;  %v2935_v62 = vld [vmem:[#allocation24 + $0x140] sm:$0xff] }
 0xf0a   :  { %7415 = vmatpush1.bf16.msra.mxu0 %v7414_v2  ;;  %v2927_v2 = vld [vmem:[#allocation24 + $0x100] sm:$0xff]  ;;  %7421 = vmatprep.subr.bf16.mxu1 %v7420_v52  ;;  %v2904_v52 = vld [vmem:[#allocation24 + $0x48] sm:$0xff] }
 0xf0b   :  { %7417 = vmatprep.subr.bf16.mxu0 %v7416_v45  ;;  %v7454_v6 = vpack.c.bf16 %v2928_v46, %v2927_v2  ;;  %v2945_v45 = vld [vmem:[#allocation24 + $0x190] sm:$0xff]  ;;  %v2922_v46 = vld [vmem:[#allocation24 + $0xd8] sm:$0xff] }
 0xf0c   :  { %v7456_v38 = vpack.c.bf16 %v2946_v39, %v2945_v45  ;;  %v2921_v2 = vld [vmem:[#allocation24 + $0xd0] sm:$0xff] }
 0xf0d   :  { %v7440_v35 = vpack.c.bf16 %v2922_v46, %v2921_v2  ;;  %v2905_v45 = vld [vmem:[#allocation24 + $0x50] sm:$0xff] }
 0xf0e   :  { %7419 = vmatpush1.bf16.msra.mxu0 %v7418_v10  ;;  %v7426_v10 = vpack.c.bf16 %v2898_v4, %v2897_v7  ;;  %v2937_v4 = vld [vmem:[#allocation24 + $0x150] sm:$0xff] }
 0xf8a   :  { %v2446_v5 = vpop.xlane.xlu1 %2445 }
 0xf8b   :  { %v2452_v9 = vmul.f32 0.0078125, %v2446_v5  ;;  %v2444_v47 = vpop.xlane.xlu0 %2443  ;;  %v2929_v5 = vld [vmem:[#allocation24 + $0x110] sm:$0xff] }
 0xf8c   :  { %v2451_v13 = vmul.f32 0.0078125, %v2444_v47 }
 0xf8d   :  { %v2456_v24 = vadd.f32 1e-05, %v2452_v9  ;;  %v2930_v9 = vld [vmem:[#allocation24 + $0x118] sm:$0xff] }
 0xf8e   :  { %v2455_v25 = vadd.f32 1e-05, %v2451_v13  ;;  %v7458_v47 = vpack.c.bf16 %v2930_v9, %v2929_v5  ;;  %v2915_v13 = vld [vmem:[#allocation24 + $0xa0] sm:$0xff]  ;;  %v2924_v9 = vld [vmem:[#allocation24 + $0xe8] sm:$0xff] }
 0xf8f   :  { %8100 = vrsqrt.f32 %v2456_v24  ;;  %v2916_v24 = vld [vmem:[#allocation24 + $0xa8] sm:$0xff]  ;;  %v2923_v5 = vld [vmem:[#allocation24 + $0xe0] sm:$0xff] }
 0xf90   :  { %8102 = vrsqrt.f32 %v2455_v25  ;;  %v2448_v26 = vpop.xlane.xlu0 %2447  ;;  %v2947_v25 = vld [vmem:[#allocation24 + $0x1a0] sm:$0xff] }
 0xf91   :  { %v2453_v16 = vmul.f32 0.0078125, %v2448_v26  ;;  %v7428_v26 = vpack.c.bf16 %v2916_v24, %v2915_v13  ;;  %v7444_v13 = vpack.c.bf16 %v2924_v9, %v2923_v5  ;;  %v2956_v24 = vld [vmem:[#allocation24 + $0x1e8] sm:$0xff] }
 0xf93   :  { %v2457_v27 = vadd.f32 1e-05, %v2453_v16  ;;  %v2948_v16 = vld [vmem:[#allocation24 + $0x1a8] sm:$0xff] }
 0xf94   :  { %v2450_v44 = vpop.xlane.xlu1 %2449 }
 0xf95   :  { %8104 = vrsqrt.f32 %v2457_v27  ;;  %v2454_v18 = vmul.f32 0.0078125, %v2450_v44  ;;  %v7460_v27 = vpack.c.bf16 %v2948_v16, %v2947_v25  ;;  %v2899_v44 = vld [vmem:[#allocation24 + $0x20] sm:$0xff] }
 0xf96   :  { %v2907_v25 = vld [vmem:[#allocation24 + $0x60] sm:$0xff] }
 0xf97   :  { %v2458_v23 = vadd.f32 1e-05, %v2454_v18  ;;  %v2900_v18 = vld [vmem:[#allocation24 + $0x28] sm:$0xff] }
 0xf99   :  { %v8101_v53 = vpop.eup %8100  ;;  %8106 = vrsqrt.f32 %v2458_v23  ;;  %v2931_v23 = vld [vmem:[#allocation24 + $0x120] sm:$0xff] }
 0xf9a   :  { %v8103_v28 = vpop.eup %8102  ;;  %v2464_v32 = vmul.f32 %v8101_v53, %v9472_v42  ;;  %v7430_v53 = vpack.c.bf16 %v2900_v18, %v2899_v44  ;;  %v2939_v44 = vld [vmem:[#allocation24 + $0x160] sm:$0xff]  ;;  %v2940_v18 = vld [vmem:[#allocation24 + $0x168] sm:$0xff] }
 0xf9b   :  { %v2463_v51 = vmul.f32 %v8103_v28, %v9475_v43  ;;  %v2932_v28 = vld [vmem:[#allocation24 + $0x128] sm:$0xff] }
 0xf9c   :  { %v2474_v34 = vmul.f32 %v6274_v31, %v2464_v32  ;;  %v2918_v32 = vld [vmem:[#allocation24 + $0xb8] sm:$0xff] }
 0xf9d   :  { %v2473_v55 = vmul.f32 %v6274_v31, %v2463_v51  ;;  %v2917_v51 = vld [vmem:[#allocation24 + $0xb0] sm:$0xff] }
 0xf9e   :  { %v2484_v37 = vadd.f32 %v6275_v54, %v2474_v34  ;;  %v2902_v34 = vld [vmem:[#allocation24 + $0x38] sm:$0xff] }
 0xf9f   :  { %v8105_v33 = vpop.eup %8104  ;;  %v2483_v20 = vadd.f32 %v6275_v54, %v2473_v55  ;;  %v7432_v55 = vpack.c.bf16 %v2918_v32, %v2917_v51  ;;  %v2958_v32 = vld [vmem:[#allocation24 + $0x1f8] sm:$0xff] }
 0xfa0   :  { %v2465_v19 = vmul.f32 %v8105_v33, %v9482_v22  ;;  %v2950_v33 = vld [vmem:[#allocation24 + $0x1b8] sm:$0xff] }
 0xfa1   :  { %2617 = vmatmul.mubr.f32.vlgmr.msra.gmra.mrb[24].mxu1 %v2483_v20  ;;  %2706 = vmatmul.mubr.f32.vlgmr.msra.gmra.mrb[24].mxu0 %v2483_v20  ;;  %v2901_v20 = vld [vmem:[#allocation24 + $0x30] sm:$0xff] }
 0xfa2   :  { %2622 = vmatprep.mubr.f32.mxu1 %v8782_v29  ;;  %2711 = vmatprep.mubr.f32.mxu0 %v8782_v29  ;;  %v2475_v40 = vmul.f32 %v6274_v31, %v2465_v19 }
 0xfa3   :  { %v8107_v36 = vpop.eup %8106  ;;  %7423 = vmatpush3.bf16.msra.mxu1 %v7422_v8 }
 0xfa4   :  { %v2466_v43 = vmul.f32 %v8107_v36, %v9487_v63  ;;  %v2485_v42 = vadd.f32 %v6275_v54, %v2475_v40  ;;  %v2943_v63 = vld [vmem:[#allocation24 + $0x180] sm:$0xff]  ;;  %7425 = vmatprep.subr.bf16.mxu1 %v7424_v41  ;;  %v7434_v36 = vpack.c.bf16 %v2902_v34, %v2901_v20  ;;  %v2934_v40 = vld [vmem:[#allocation24 + $0x138] sm:$0xff]  ;;  %v2941_v34 = vld [vmem:[#allocation24 + $0x170] sm:$0xff] }
 0xfa5   :  { %2623 = vmatmul.mubr.f32.gmra.mrb[26].mxu1 %v2484_v37  ;;  %2712 = vmatmul.mubr.f32.gmra.mrb[26].mxu0 %v2484_v37  ;;  %v7452_v3 = vpack.c.bf16 %v2944_v58, %v2943_v63  ;;  %v2933_v37 = vld [vmem:[#allocation24 + $0x130] sm:$0xff]  ;;  %v2903_v63 = vld [vmem:[#allocation24 + $0x40] sm:$0xff]  ;;  %v2906_v41 = vld [vmem:[#allocation24 + $0x58] sm:$0xff] }
 0xfa6   :  { %2628 = vmatprep.mubr.f32.mxu1 %v8782_v29  ;;  %2717 = vmatprep.mubr.f32.mxu0 %v8782_v29  ;;  %v2476_v48 = vmul.f32 %v6274_v31, %v2466_v43  ;;  %v7462_v31 = vpack.c.bf16 %v2932_v28, %v2931_v23  ;;  %v7466_v43 = vpack.c.bf16 %v2934_v40, %v2933_v37  ;;  %v2926_v28 = vld [vmem:[#allocation24 + $0xf8] sm:$0xff]  ;;  %v2745_v40 = vsub.s32 3, %v9182_v11 }
 0xfa7   :  { %7453 = vmatprep.subr.bf16.mxu0 %v7452_v3  ;;  %7427 = vmatpush3.bf16.msra.mxu1 %v7426_v10  ;;  %v7438_v60 = vpack.c.bf16 %v2904_v52, %v2903_v63  ;;  %v2936_v3 = vld [vmem:[#allocation24 + $0x148] sm:$0xff]  ;;  %v7442_v7 = vpack.c.bf16 %v2906_v41, %v2905_v45  ;;  %v7478_v23 = vpack.c.bf16 %v2940_v18, %v2939_v44  ;;  %v2551_v37 = vld [vmem:[#allocation22] sm:$0xf] }
 0xfa8   :  { %v2486_v22 = vadd.f32 %v6275_v54, %v2476_v48  ;;  %7455 = vmatpush3.bf16.msra.mxu0 %v7454_v6  ;;  %7429 = vmatprep.subr.bf16.mxu1 %v7428_v26  ;;  %v2949_v54 = vld [vmem:[#allocation24 + $0x1b0] sm:$0xff]  ;;  %v2920_v48 = vld [vmem:[#allocation24 + $0xc8] sm:$0xff]  ;;  %v7470_v8 = vpack.c.bf16 %v2936_v3, %v2935_v62 }
 0xfa9   :  { %2629 = vmatmul.mubr.f32.gmra.mrb[28].mxu1 %v2485_v42  ;;  %2718 = vmatmul.mubr.f32.gmra.mrb[28].mxu0 %v2485_v42  ;;  %v7464_v19 = vpack.c.bf16 %v2950_v33, %v2949_v54  ;;  %v2919_v42 = vld [vmem:[#allocation24 + $0xc0] sm:$0xff]  ;;  %v2953_v6 = vld [vmem:[#allocation24 + $0x1d0] sm:$0xff]  ;;  %v2908_v26 = vld [vmem:[#allocation24 + $0x68] sm:$0xff] }
 0xfaa   :  { %2634 = vmatprep.mubr.f32.mxu1 %v8782_v29  ;;  %2723 = vmatprep.mubr.f32.mxu0 %v8782_v29  ;;  %v7436_v49 = vpack.c.bf16 %v2920_v48, %v2919_v42  ;;  %v7472_v39 = vpack.c.bf16 %v2954_v17, %v2953_v6  ;;  %v2909_v54 = vld [vmem:[#allocation24 + $0x70] sm:$0xff]  ;;  %v9506_v42 = vrot.slane %v2551_v37, %v9189_v14 }
 0xfab   :  { %7457 = vmatprep.subr.bf16.mxu0 %v7456_v38  ;;  %7431 = vmatpush3.bf16.msra.mxu1 %v7430_v53  ;;  %v2938_v38 = vld [vmem:[#allocation24 + $0x158] sm:$0xff]  ;;  %v2925_v53 = vld [vmem:[#allocation24 + $0xf0] sm:$0xff]  ;;  %v9509_v48 = vrot.slane %v2551_v37, %v9192_v15 }
 0xfac   :  { %7459 = vmatpush3.bf16.msra.mxu0 %v7458_v47  ;;  %7433 = vmatprep.subr.bf16.mxu1 %v7432_v55  ;;  %v7474_v10 = vpack.c.bf16 %v2938_v38, %v2937_v4  ;;  %v2955_v47 = vld [vmem:[#allocation24 + $0x1e0] sm:$0xff]  ;;  %v7448_v51 = vpack.c.bf16 %v2926_v28, %v2925_v53  ;;  %v2910_v55 = vld [vmem:[#allocation24 + $0x78] sm:$0xff] }
 0xfad   :  { %2635 = vmatmul.mubr.f32.gmra.mrb[30].mxu1 %v2486_v22  ;;  %2724 = vmatmul.mubr.f32.gmra.mrb[30].mxu0 %v2486_v22  ;;  %v2951_v22 = vld [vmem:[#allocation24 + $0x1c0] sm:$0xff]  ;;  %v7476_v16 = vpack.c.bf16 %v2956_v24, %v2955_v47  ;;  %v7450_v20 = vpack.c.bf16 %v2910_v55, %v2909_v54 }
 0xfae   :  { %7461 = vmatprep.subr.bf16.mxu0 %v7460_v27  ;;  %v7468_v58 = vpack.c.bf16 %v2952_v50, %v2951_v22  ;;  %v7446_v27 = vpack.c.bf16 %v2908_v26, %v2907_v25  ;;  %v9513_v22 = vrot.slane %v2551_v37, %v2745_v40 }
 0xfaf   :  { %7435 = vmatpush3.bf16.msra.mxu1 %v7434_v36 }
 0xfb0   :  { %7463 = vmatpush3.bf16.msra.mxu0 %v7462_v31  ;;  %7437 = vmatprep.subr.bf16.mxu1 %v7436_v49  ;;  %v2957_v31 = vld [vmem:[#allocation24 + $0x1f0] sm:$0xff] }
 0xfb1   :  { %7465 = vmatprep.subr.bf16.mxu0 %v7464_v19  ;;  %v7480_v33 = vpack.c.bf16 %v2958_v32, %v2957_v31  ;;  %v2942_v19 = vld [vmem:[#allocation24 + $0x178] sm:$0xff] }
 0xfb2   :  { %v7482_v36 = vpack.c.bf16 %v2942_v19, %v2941_v34 }
 0xfb3   :  { %7439 = vmatpush3.bf16.msra.mxu1 %v7438_v60 }
 0xfb4   :  { %7467 = vmatpush3.bf16.msra.mxu0 %v7466_v43  ;;  %7441 = vmatprep.subr.bf16.mxu1 %v7440_v35  ;;  %v9503_v43 = vrot.slane %v2551_v37, %v9185_v12 }
 0xfb5   :  { %7469 = vmatprep.subr.bf16.mxu0 %v7468_v58 }
 0xfb7   :  { %7443 = vmatpush3.bf16.msra.mxu1 %v7442_v7 }
 0xfb8   :  { %7471 = vmatpush3.bf16.msra.mxu0 %v7470_v8  ;;  %7445 = vmatprep.subr.bf16.mxu1 %v7444_v13 }
 0xfb9   :  { %7473 = vmatprep.subr.bf16.mxu0 %v7472_v39 }
 0xfbb   :  { %7447 = vmatpush3.bf16.msra.mxu1 %v7446_v27 }
 0xfbc   :  { %7475 = vmatpush3.bf16.msra.mxu0 %v7474_v10  ;;  %7449 = vmatprep.subr.bf16.mxu1 %v7448_v51 }
 0xfbd   :  { %7477 = vmatprep.subr.bf16.mxu0 %v7476_v16 }
 0xfbf   :  { %7451 = vmatpush3.bf16.msra.mxu1 %v7450_v20 }
 0xfc0   :  { %7479 = vmatpush3.bf16.msra.mxu0 %v7478_v23 }
 0xfc1   :  { %7481 = vmatprep.subr.bf16.mxu0 %v7480_v33 }
 0xfc4   :  { %7483 = vmatpush3.bf16.msra.mxu0 %v7482_v36 }
0x1074   :  { %v2618_v49 = vpop.f32.mrb[24].mxu1  ;;  %v2707_v50 = vpop.f32.mrb[24].mxu0 }
0x1075   :  { %v9516_v63 = vadd.f32 %v9503_v43, %v2618_v49  ;;  %v9519_v52 = vadd.f32 %v9506_v42, %v2707_v50  ;;  %v2620_v58 = vpop.f32.mrb[25].mxu1  ;;  %v2709_v60 = vpop.f32.mrb[25].mxu0 }
0x1076   :  { %v9522_v62 = vadd.f32 %v9509_v48, %v2620_v58  ;;  %v9525_v3 = vadd.f32 %v9513_v22, %v2709_v60 }
0x1077   :  { %v6276_v8 = vmul.f32 -1.702, %v9516_v63  ;;  %v6278_v2 = vmul.f32 -1.702, %v9519_v52 }
0x1078   :  { %v6277_v46 = vmul.f32 -1.702, %v9522_v62  ;;  %v6279_v6 = vmul.f32 -1.702, %v9525_v3  ;;  %v2624_v35 = vpop.f32.mrb[26].mxu1  ;;  %v2713_v17 = vpop.f32.mrb[26].mxu0 }
0x1079   :  { %v2799_v45 = vmul.f32 1.442695, %v6276_v8  ;;  %v2803_v41 = vmul.f32 1.442695, %v6278_v2  ;;  %v9532_v39 = vadd.f32 %v9503_v43, %v2624_v35  ;;  %v9535_v7 = vadd.f32 %v9506_v42, %v2713_v17  ;;  %v2626_v4 = vpop.f32.mrb[27].mxu1  ;;  %v2715_v38 = vpop.f32.mrb[27].mxu0 }
0x107a   :  { %v2801_v10 = vmul.f32 1.442695, %v6277_v46  ;;  %v2805_v5 = vmul.f32 1.442695, %v6279_v6  ;;  %v9538_v9 = vadd.f32 %v9509_v48, %v2626_v4  ;;  %v9541_v47 = vadd.f32 %v9513_v22, %v2715_v38 }
0x107b   :  { %8108 = vpow2.f32 %v2799_v45  ;;  %v6280_v13 = vmul.f32 -1.702, %v9532_v39  ;;  %v6282_v24 = vmul.f32 -1.702, %v9535_v7 }
0x107c   :  { %8110 = vpow2.f32 %v2803_v41  ;;  %v6281_v25 = vmul.f32 -1.702, %v9538_v9  ;;  %v6283_v26 = vmul.f32 -1.702, %v9541_v47  ;;  %v2630_v16 = vpop.f32.mrb[28].mxu1  ;;  %v2719_v27 = vpop.f32.mrb[28].mxu0 }
0x107d   :  { %8112 = vpow2.f32 %v2801_v10  ;;  %v2807_v44 = vmul.f32 1.442695, %v6280_v13  ;;  %v2811_v18 = vmul.f32 1.442695, %v6282_v24  ;;  %v9548_v23 = vadd.f32 %v9503_v43, %v2630_v16  ;;  %v2632_v53 = vpop.f32.mrb[29].mxu1  ;;  %v2721_v28 = vpop.f32.mrb[29].mxu0 }
0x107e   :  { %8114 = vpow2.f32 %v2805_v5  ;;  %v2809_v31 = vmul.f32 1.442695, %v6281_v25  ;;  %v2813_v51 = vmul.f32 1.442695, %v6283_v26  ;;  %v9551_v32 = vadd.f32 %v9506_v42, %v2719_v27 }
0x107f   :  { %8116 = vpow2.f32 %v2807_v44  ;;  %v6284_v54 = vmul.f32 -1.702, %v9548_v23  ;;  %v9555_v55 = vadd.f32 %v9509_v48, %v2632_v53  ;;  %v9558_v33 = vadd.f32 %v9513_v22, %v2721_v28 }
0x1080   :  { %8118 = vpow2.f32 %v2811_v18  ;;  %v6286_v20 = vmul.f32 -1.702, %v9551_v32  ;;  %v2636_v34 = vpop.f32.mrb[30].mxu1  ;;  %v2725_v19 = vpop.f32.mrb[30].mxu0 }
0x1081   :  { %8120 = vpow2.f32 %v2809_v31  ;;  %v2815_v36 = vmul.f32 1.442695, %v6284_v54  ;;  %v6285_v37 = vmul.f32 -1.702, %v9555_v55  ;;  %v6287_v49 = vmul.f32 -1.702, %v9558_v33 }
0x1082   :  { %8122 = vpow2.f32 %v2813_v51  ;;  %v2819_v50 = vmul.f32 1.442695, %v6286_v20  ;;  %v2638_v58 = vpop.f32.mrb[31].mxu1  ;;  %v2727_v60 = vpop.f32.mrb[31].mxu0  ;;  %v9564_v38 = vadd.f32 %v9503_v43, %v2636_v34  ;;  %v9567_v13 = vadd.f32 %v9506_v42, %v2725_v19 }
0x1083   :  { %8124 = vpow2.f32 %v2815_v36  ;;  %v2817_v8 = vmul.f32 1.442695, %v6285_v37  ;;  %v2821_v2 = vmul.f32 1.442695, %v6287_v49  ;;  %v9570_v26 = vadd.f32 %v9509_v48, %v2638_v58 }
0x1084   :  { %8126 = vpow2.f32 %v2819_v50  ;;  %v9573_v44 = vadd.f32 %v9513_v22, %v2727_v60  ;;  %v6288_v53 = vmul.f32 -1.702, %v9564_v38  ;;  %v6290_v31 = vmul.f32 -1.702, %v9567_v13 }
0x1085   :  { %v8109_v46 = vpop.eup %8108  ;;  %8128 = vpow2.f32 %v2817_v8  ;;  %v6289_v54 = vmul.f32 -1.702, %v9570_v26 }
0x1086   :  { %v8111_v6 = vpop.eup %8110  ;;  %v2831_v35 = vadd.f32 1.0, %v8109_v46  ;;  %8130 = vpow2.f32 %v2821_v2  ;;  %v6291_v22 = vmul.f32 -1.702, %v9573_v44  ;;  %v2823_v37 = vmul.f32 1.442695, %v6288_v53 }
0x1087   :  { %v8113_v17 = vpop.eup %8112  ;;  %v2833_v45 = vadd.f32 1.0, %v8111_v6  ;;  %v2827_v50 = vmul.f32 1.442695, %v6290_v31  ;;  %v2825_v60 = vmul.f32 1.442695, %v6289_v54 }
0x1088   :  { %v8115_v41 = vpop.eup %8114  ;;  %8132 = vrcp.f32 %v2831_v35  ;;  %v2832_v4 = vadd.f32 1.0, %v8113_v17  ;;  %v2829_v2 = vmul.f32 1.442695, %v6291_v22 }
0x1089   :  { %v8117_v10 = vpop.eup %8116  ;;  %8134 = vrcp.f32 %v2833_v45  ;;  %v2834_v5 = vadd.f32 1.0, %v8115_v41 }
0x108a   :  { %v8119_v24 = vpop.eup %8118  ;;  %8136 = vrcp.f32 %v2832_v4  ;;  %v2835_v25 = vadd.f32 1.0, %v8117_v10 }
0x108b   :  { %v8121_v16 = vpop.eup %8120  ;;  %8138 = vrcp.f32 %v2834_v5  ;;  %v2837_v27 = vadd.f32 1.0, %v8119_v24 }
0x108c   :  { %v8123_v43 = vpop.eup %8122  ;;  %8140 = vrcp.f32 %v2835_v25  ;;  %v2836_v18 = vadd.f32 1.0, %v8121_v16 }
0x108d   :  { %v8125_v28 = vpop.eup %8124  ;;  %8142 = vrcp.f32 %v2837_v27  ;;  %v2838_v42 = vadd.f32 1.0, %v8123_v43 }
0x108e   :  { %v8127_v51 = vpop.eup %8126  ;;  %8144 = vrcp.f32 %v2836_v18  ;;  %v2839_v48 = vadd.f32 1.0, %v8125_v28 }
0x108f   :  { %v8129_v20 = vpop.eup %8128  ;;  %8146 = vrcp.f32 %v2838_v42  ;;  %v2841_v34 = vadd.f32 1.0, %v8127_v51 }
0x1090   :  { %v8131_v19 = vpop.eup %8130  ;;  %8148 = vrcp.f32 %v2839_v48  ;;  %v2840_v36 = vadd.f32 1.0, %v8129_v20 }
0x1091   :  { %8150 = vrcp.f32 %v2841_v34  ;;  %v2842_v49 = vadd.f32 1.0, %v8131_v19 }
0x1092   :  { %v8133_v58 = vpop.eup %8132  ;;  %8152 = vrcp.f32 %v2840_v36 }
0x1093   :  { %v8135_v8 = vpop.eup %8134  ;;  %8154 = vrcp.f32 %v2842_v49  ;;  %v2879_v45 = vmul.f32 %v8133_v58, %v9516_v63 }
0x1094   :  { %v8137_v46 = vpop.eup %8136  ;;  %8156 = vpow2.f32 %v2823_v37  ;;  %v2881_v10 = vmul.f32 %v8135_v8, %v9519_v52  ;;  %v6292_v8 = vld [vmem:[#allocation25] ss:$0 sm:$0xff] }
0x1095   :  { %v8139_v6 = vpop.eup %8138  ;;  %v2880_v35 = vmul.f32 %v8137_v46, %v9522_v62  ;;  %8158 = vpow2.f32 %v2827_v50 }
0x1096   :  { %v8141_v17 = vpop.eup %8140  ;;  %v2882_v41 = vmul.f32 %v8139_v6, %v9525_v3  ;;  %8160 = vpow2.f32 %v2825_v60 }
0x1097   :  { %v8143_v4 = vpop.eup %8142  ;;  %8162 = vpow2.f32 %v2829_v2  ;;  %3024 = vmatprep.mubr.f32.mxu1 %v2880_v35  ;;  %v2883_v16 = vmul.f32 %v8141_v17, %v9532_v39 }
0x1098   :  { %v8145_v5 = vpop.eup %8144  ;;  %3109 = vmatprep.mubr.f32.mxu0 %v2882_v41  ;;  %3025 = vmatmul.mubr.f32.vlgmr.msra.gmra.mrb[32].mxu1 %v2879_v45  ;;  %v2885_v3 = vmul.f32 %v8143_v4, %v9535_v7 }
0x1099   :  { %v8147_v24 = vpop.eup %8146  ;;  %v2884_v25 = vmul.f32 %v8145_v5, %v9538_v9  ;;  %3110 = vmatmul.mubr.f32.vlgmr.msra.gmra.mrb[32].mxu0 %v2881_v10 }
0x109a   :  { %v8149_v62 = vpop.eup %8148  ;;  %v2886_v63 = vmul.f32 %v8147_v24, %v9541_v47 }
0x109b   :  { %v8151_v27 = vpop.eup %8150  ;;  %3029 = vmatprep.mubr.f32.mxu1 %v2884_v25  ;;  %v2887_v9 = vmul.f32 %v8149_v62, %v9548_v23 }
0x109c   :  { %v8153_v43 = vpop.eup %8152  ;;  %3114 = vmatprep.mubr.f32.mxu0 %v2886_v63  ;;  %3030 = vmatmul.mubr.f32.gmra.mrb[34].mxu1 %v2883_v16  ;;  %v2889_v39 = vmul.f32 %v8151_v27, %v9551_v32 }
0x109d   :  { %v8155_v52 = vpop.eup %8154  ;;  %v2888_v18 = vmul.f32 %v8153_v43, %v9555_v55  ;;  %3115 = vmatmul.mubr.f32.gmra.mrb[34].mxu0 %v2885_v3 }
0x109e   :  { %v8157_v53 = vpop.eup %8156  ;;  %v2890_v28 = vmul.f32 %v8155_v52, %v9558_v33 }
0x109f   :  { %v8159_v42 = vpop.eup %8158  ;;  %v2843_v47 = vadd.f32 1.0, %v8157_v53  ;;  %3034 = vmatprep.mubr.f32.mxu1 %v2888_v18 }
0x10a0   :  { %v8161_v31 = vpop.eup %8160  ;;  %v2845_v7 = vadd.f32 1.0, %v8159_v42  ;;  %3119 = vmatprep.mubr.f32.mxu0 %v2890_v28  ;;  %3035 = vmatmul.mubr.f32.gmra.mrb[36].mxu1 %v2887_v9 }
0x10a1   :  { %v8163_v51 = vpop.eup %8162  ;;  %8164 = vrcp.f32 %v2843_v47  ;;  %v2844_v48 = vadd.f32 1.0, %v8161_v31  ;;  %3120 = vmatmul.mubr.f32.gmra.mrb[36].mxu0 %v2889_v39  ;;  %v3217_v47 = vld [vmem:[#allocation12 + $0x1a0] sm:$0xff] }
0x10a2   :  { %8166 = vrcp.f32 %v2845_v7  ;;  %v2846_v55 = vadd.f32 1.0, %v8163_v51  ;;  %v3213_v31 = vld [vmem:[#allocation12 + $0x180] sm:$0xff]  ;;  %v3216_v7 = vld [vmem:[#allocation12 + $0x198] sm:$0xff] }
0x10a3   :  { %8168 = vrcp.f32 %v2844_v48  ;;  %v3220_v51 = vld [vmem:[#allocation12 + $0x1b8] sm:$0xff]  ;;  %v3223_v48 = vld [vmem:[#allocation12 + $0x1d0] sm:$0xff] }
0x10a4   :  { %8170 = vrcp.f32 %v2846_v55  ;;  %v7486_v55 = vpack.c.bf16 %v3216_v7, %v3213_v31  ;;  %v3237_v7 = vld [vmem:[#allocation12 + $0x240] sm:$0xff] }
0x10ab   :  { %v8165_v23 = vpop.eup %8164 }
0x10ac   :  { %v8167_v54 = vpop.eup %8166  ;;  %v2891_v34 = vmul.f32 %v8165_v23, %v9564_v38  ;;  %v7488_v23 = vpack.c.bf16 %v3223_v48, %v3220_v51  ;;  %v3240_v51 = vld [vmem:[#allocation12 + $0x258] sm:$0xff] }
0x10ad   :  { %v8169_v33 = vpop.eup %8168  ;;  %v2893_v19 = vmul.f32 %v8167_v54, %v9567_v13  ;;  %v3215_v54 = vld [vmem:[#allocation12 + $0x190] sm:$0xff] }
0x10ae   :  { %v8171_v20 = vpop.eup %8170  ;;  %v2892_v32 = vmul.f32 %v8169_v33, %v9570_v26  ;;  %v3218_v33 = vld [vmem:[#allocation12 + $0x1a8] sm:$0xff] }
0x10af   :  { %v2894_v22 = vmul.f32 %v8171_v20, %v9573_v44  ;;  %v3219_v20 = vld [vmem:[#allocation12 + $0x1b0] sm:$0xff] }
0x10b0   :  { %3039 = vmatprep.mubr.f32.mxu1 %v2892_v32  ;;  %v7516_v32 = vpack.c.bf16 %v3218_v33, %v3215_v54  ;;  %v3247_v54 = vld [vmem:[#allocation12 + $0x290] sm:$0xff] }
0x10b1   :  { %3124 = vmatprep.mubr.f32.mxu0 %v2894_v22  ;;  %3040 = vmatmul.mubr.f32.gmra.mrb[38].mxu1 %v2891_v34  ;;  %v3222_v34 = vld [vmem:[#allocation12 + $0x1c8] sm:$0xff]  ;;  %v3239_v33 = vld [vmem:[#allocation12 + $0x250] sm:$0xff] }
0x10b2   :  { %3125 = vmatmul.mubr.f32.gmra.mrb[38].mxu0 %v2893_v19  ;;  %3327 = vmatprep.mubr.f32.mxu1 %v8782_v29  ;;  %v3226_v22 = vld [vmem:[#allocation12 + $0x1e8] sm:$0xff]  ;;  %v7490_v19 = vpack.c.bf16 %v3222_v34, %v3219_v20  ;;  %v3243_v34 = vld [vmem:[#allocation12 + $0x270] sm:$0xff] }
0x10b3   :  { %7517 = vmatprep.subr.bf16.mxu0 %v7516_v32 }
0x10b4   :  { %7519 = vmatpush3.bf16.msra.mxu0 %v7516_v32  ;;  %v3242_v32 = vld [vmem:[#allocation12 + $0x268] sm:$0xff] }
0x116b   :  { %v6504_v36 = vpop.f32.mrb[32].mxu1 }
0x116c   :  { %v6548_v37 = vpop.f32.mrb[32].mxu0  ;;  %v6505_v49 = vpop.f32.mrb[33].mxu1 }
0x116d   :  { %v6506_v50 = vadd.f32 %v6505_v49, %v6504_v36  ;;  %v6549_v58 = vpop.f32.mrb[33].mxu0  ;;  %v3221_v36 = vld [vmem:[#allocation12 + $0x1c0] sm:$0xff] }
0x116e   :  { %v6550_v60 = vadd.f32 %v6549_v58, %v6548_v37  ;;  %v3224_v37 = vld [vmem:[#allocation12 + $0x1d8] sm:$0xff]  ;;  %v3225_v58 = vld [vmem:[#allocation12 + $0x1e0] sm:$0xff] }
0x116f   :  { %v6507_v26 = vpop.f32.mrb[34].mxu1 }
0x1170   :  { %v3112_v2 = vadd.f32 %v6550_v60, %v6506_v50  ;;  %v6551_v38 = vpop.f32.mrb[34].mxu0  ;;  %v6508_v46 = vpop.f32.mrb[35].mxu1  ;;  %v7520_v50 = vpack.c.bf16 %v3224_v37, %v3221_v36  ;;  %v3228_v60 = vld [vmem:[#allocation12 + $0x1f8] sm:$0xff]  ;;  %v3250_v36 = vld [vmem:[#allocation12 + $0x2a8] sm:$0xff]  ;;  %v3253_v37 = vld [vmem:[#allocation12 + $0x2c0] sm:$0xff] }
0x1171   :  { %v6509_v44 = vadd.f32 %v6508_v46, %v6507_v26  ;;  %v6552_v6 = vpop.f32.mrb[35].mxu0 }
0x1172   :  { %v3136_v13 = vadd.f32 %v6292_v8, %v3112_v2  ;;  %v6553_v35 = vadd.f32 %v6552_v6, %v6551_v38  ;;  %7521 = vmatprep.subr.bf16.mxu0 %v7520_v50 }
0x1173   :  { %v6510_v17 = vpop.f32.mrb[36].mxu1  ;;  %7523 = vmatpush3.bf16.msra.mxu0 %v7520_v50  ;;  %v7508_v50 = vpack.c.bf16 %v3253_v37, %v3250_v36 }
0x1174   :  { %v3117_v45 = vadd.f32 %v6553_v35, %v6509_v44  ;;  %v6554_v41 = vpop.f32.mrb[36].mxu0  ;;  %v6511_v4 = vpop.f32.mrb[37].mxu1  ;;  %v9597_v10 = vadd.f32 %v3136_v13, %v9459_v21 }
0x1175   :  { %v6512_v5 = vadd.f32 %v6511_v4, %v6510_v17  ;;  %v6555_v24 = vpop.f32.mrb[37].mxu0 }
0x1176   :  { %v3137_v25 = vadd.f32 %v6292_v8, %v3117_v45  ;;  %v6556_v62 = vadd.f32 %v6555_v24, %v6554_v41  ;;  %3148 = vadd.xlane.f32.xlu0 %v9597_v10 }
0x1178   :  { %v3122_v16 = vadd.f32 %v6556_v62, %v6512_v5  ;;  %v9601_v63 = vadd.f32 %v3137_v25, %v9456_v56  ;;  %v3214_v56 = vld [vmem:[#allocation12 + $0x188] sm:$0xff] }
0x117a   :  { %v3138_v27 = vadd.f32 %v6292_v8, %v3122_v16  ;;  %3150 = vadd.xlane.f32.xlu1 %v9601_v63  ;;  %v3232_v16 = vld [vmem:[#allocation12 + $0x218] sm:$0xff] }
0x117c   :  { %v9605_v3 = vadd.f32 %v3138_v27, %v9464_v0  ;;  %v7484_v0 = vpack.c.bf16 %v3217_v47, %v3214_v56  ;;  %v3235_v27 = vld [vmem:[#allocation12 + $0x230] sm:$0xff]  ;;  %v3241_v56 = vld [vmem:[#allocation12 + $0x260] sm:$0xff] }
0x117d   :  { %v3233_v47 = vld [vmem:[#allocation12 + $0x220] sm:$0xff] }
0x117e   :  { %3152 = vadd.xlane.f32.xlu0 %v9605_v3  ;;  %7485 = vmatprep.subr.bf16.mxu1 %v7484_v0  ;;  %v3236_v0 = vld [vmem:[#allocation12 + $0x238] sm:$0xff] }
0x117f   :  { %7487 = vmatpush1.bf16.msra.mxu1 %v7486_v55  ;;  %v7528_v48 = vpack.c.bf16 %v3236_v0, %v3233_v47  ;;  %v7502_v55 = vpack.c.bf16 %v3240_v51, %v3237_v7  ;;  %v6294_v7 = vld [vmem:[#allocation10 + $0x1] ss:$0 sm:$0xff] }
0x1180   :  { %7489 = vmatprep.subr.bf16.mxu1 %v7488_v23  ;;  %v3244_v23 = vld [vmem:[#allocation12 + $0x278] sm:$0xff] }
0x1181   :  { %v7504_v20 = vpack.c.bf16 %v3247_v54, %v3244_v23 }
0x1183   :  { %7491 = vmatpush1.bf16.msra.mxu1 %v7490_v19 }
0x1184   :  { %v6513_v21 = vpop.f32.mrb[38].mxu1 }
0x1185   :  { %v6557_v43 = vpop.f32.mrb[38].mxu0  ;;  %v6514_v52 = vpop.f32.mrb[39].mxu1 }
0x1186   :  { %v6515_v18 = vadd.f32 %v6514_v52, %v6513_v21  ;;  %v6558_v53 = vpop.f32.mrb[39].mxu0  ;;  %v3227_v21 = vld [vmem:[#allocation12 + $0x1f0] sm:$0xff]  ;;  %v3230_v52 = vld [vmem:[#allocation12 + $0x208] sm:$0xff] }
0x1187   :  { %v6559_v9 = vadd.f32 %v6558_v53, %v6557_v43  ;;  %v7496_v43 = vpack.c.bf16 %v3235_v27, %v3232_v16  ;;  %v3234_v53 = vld [vmem:[#allocation12 + $0x228] sm:$0xff]  ;;  %v3260_v16 = vld [vmem:[#allocation12 + $0x2f8] sm:$0xff] }
0x1189   :  { %v3127_v28 = vadd.f32 %v6559_v9, %v6515_v18  ;;  %v3231_v18 = vld [vmem:[#allocation12 + $0x210] sm:$0xff]  ;;  %v7524_v9 = vpack.c.bf16 %v3230_v52, %v3227_v21 }
0x118b   :  { %v3139_v42 = vadd.f32 %v6292_v8, %v3127_v28  ;;  %v7494_v8 = vpack.c.bf16 %v3228_v60, %v3225_v58  ;;  %v7498_v28 = vpack.c.bf16 %v3234_v53, %v3231_v18  ;;  %7525 = vmatprep.subr.bf16.mxu0 %v7524_v9  ;;  %v3248_v58 = vld [vmem:[#allocation12 + $0x298] sm:$0xff]  ;;  %v3249_v60 = vld [vmem:[#allocation12 + $0x2a0] sm:$0xff] }
0x118c   :  { %7527 = vmatpush3.bf16.msra.mxu0 %v7524_v9 }
0x118d   :  { %v9609_v39 = vadd.f32 %v3139_v42, %v9468_v1  ;;  %v3229_v1 = vld [vmem:[#allocation12 + $0x200] sm:$0xff]  ;;  %v3238_v42 = vld [vmem:[#allocation12 + $0x248] sm:$0xff]  ;;  %7529 = vmatprep.subr.bf16.mxu0 %v7528_v48 }
0x118e   :  { %v7492_v49 = vpack.c.bf16 %v3229_v1, %v3226_v22  ;;  %v7500_v31 = vpack.c.bf16 %v3241_v56, %v3238_v42  ;;  %v3246_v22 = vld [vmem:[#allocation12 + $0x288] sm:$0xff]  ;;  %v7532_v1 = vpack.c.bf16 %v3242_v32, %v3239_v33 }
0x118f   :  { %3154 = vadd.xlane.f32.xlu1 %v9609_v39  ;;  %v7506_v19 = vpack.c.bf16 %v3246_v22, %v3243_v34 }
0x1190   :  { %7493 = vmatprep.subr.bf16.mxu1 %v7492_v49  ;;  %7531 = vmatpush3.bf16.msra.mxu0 %v7528_v48  ;;  %v3245_v49 = vld [vmem:[#allocation12 + $0x280] sm:$0xff] }
0x1191   :  { %7495 = vmatpush1.bf16.msra.mxu1 %v7494_v8  ;;  %7533 = vmatprep.subr.bf16.mxu0 %v7532_v1  ;;  %v3252_v8 = vld [vmem:[#allocation12 + $0x2b8] sm:$0xff] }
0x1192   :  { %7497 = vmatprep.subr.bf16.mxu1 %v7496_v43 }
0x1194   :  { %7535 = vmatpush3.bf16.msra.mxu0 %v7532_v1 }
0x1195   :  { %7499 = vmatpush1.bf16.msra.mxu1 %v7498_v28 }
0x1196   :  { %7501 = vmatprep.subr.bf16.mxu1 %v7500_v31  ;;  %v6293_v31 = vld [vmem:[#allocation9 + $0x1] ss:$0 sm:$0xff] }
0x1199   :  { %7503 = vmatpush1.bf16.msra.mxu1 %v7502_v55 }
0x119a   :  { %7505 = vmatprep.subr.bf16.mxu1 %v7504_v20 }
0x119d   :  { %7507 = vmatpush1.bf16.msra.mxu1 %v7506_v19 }
0x119e   :  { %7509 = vmatprep.subr.bf16.mxu1 %v7508_v50 }
0x1203   :  { %v3149_v26 = vpop.xlane.xlu0 %3148 }
0x1204   :  { %v3156_v2 = vmul.f32 0.0078125, %v3149_v26  ;;  %v7536_v26 = vpack.c.bf16 %v3248_v58, %v3245_v49 }
0x1206   :  { %v9613_v38 = vsub.f32 %v9597_v10, %v3156_v2  ;;  %v7510_v2 = vpack.c.bf16 %v3252_v8, %v3249_v60  ;;  %7537 = vmatprep.subr.bf16.mxu0 %v7536_v26 }
0x1207   :  { %v3151_v46 = vpop.xlane.xlu1 %3150  ;;  %7539 = vmatpush3.bf16.msra.mxu0 %v7536_v26 }
0x1208   :  { %v3157_v44 = vmul.f32 0.0078125, %v3151_v46  ;;  %v3164_v6 = vmul.f32 %v9613_v38, %v9613_v38  ;;  %7511 = vmatpush1.bf16.msra.mxu1 %v7510_v2  ;;  %v3256_v46 = vld [vmem:[#allocation12 + $0x2d8] sm:$0xff] }
0x120a   :  { %v9618_v13 = vsub.f32 %v9601_v63, %v3157_v44  ;;  %3168 = vadd.xlane.f32.xlu0 %v3164_v6  ;;  %v3259_v44 = vld [vmem:[#allocation12 + $0x2f0] sm:$0xff] }
0x120b   :  { %v3153_v35 = vpop.xlane.xlu0 %3152  ;;  %v3251_v6 = vld [vmem:[#allocation12 + $0x2b0] sm:$0xff] }
0x120c   :  { %v3158_v17 = vmul.f32 0.0078125, %v3153_v35  ;;  %v3165_v45 = vmul.f32 %v9618_v13, %v9618_v13  ;;  %v7512_v35 = vpack.c.bf16 %v3259_v44, %v3256_v46 }
0x120e   :  { %v9623_v41 = vsub.f32 %v9605_v3, %v3158_v17  ;;  %3170 = vadd.xlane.f32.xlu1 %v3165_v45  ;;  %v3254_v17 = vld [vmem:[#allocation12 + $0x2c8] sm:$0xff]  ;;  %v3255_v45 = vld [vmem:[#allocation12 + $0x2d0] sm:$0xff]  ;;  %7513 = vmatprep.subr.bf16.mxu1 %v7512_v35 }
0x1210   :  { %v3166_v4 = vmul.f32 %v9623_v41, %v9623_v41 }
0x1212   :  { %3172 = vadd.xlane.f32.xlu0 %v3166_v4  ;;  %v3258_v4 = vld [vmem:[#allocation12 + $0x2e8] sm:$0xff] }
0x121c   :  { %v3155_v5 = vpop.xlane.xlu1 %3154 }
0x121d   :  { %v3159_v24 = vmul.f32 0.0078125, %v3155_v5  ;;  %v7540_v5 = vpack.c.bf16 %v3254_v17, %v3251_v6 }
0x121f   :  { %v9628_v25 = vsub.f32 %v9609_v39, %v3159_v24  ;;  %v7514_v24 = vpack.c.bf16 %v3258_v4, %v3255_v45  ;;  %7541 = vmatprep.subr.bf16.mxu0 %v7540_v5 }
0x1220   :  { %7543 = vmatpush3.bf16.msra.mxu0 %v7540_v5 }
0x1221   :  { %v3167_v62 = vmul.f32 %v9628_v25, %v9628_v25  ;;  %7515 = vmatpush1.bf16.msra.mxu1 %v7514_v24 }
0x1223   :  { %3174 = vadd.xlane.f32.xlu1 %v3167_v62  ;;  %v3257_v62 = vld [vmem:[#allocation12 + $0x2e0] sm:$0xff] }
0x1224   :  { %v7544_v27 = vpack.c.bf16 %v3260_v16, %v3257_v62 }
0x1226   :  { %7545 = vmatprep.subr.bf16.mxu0 %v7544_v27 }
0x1227   :  { %7547 = vmatpush3.bf16.msra.mxu0 %v7544_v27 }
0x1297   :  { %v3169_v21 = vpop.xlane.xlu0 %3168 }
0x1298   :  { %v3176_v43 = vmul.f32 0.0078125, %v3169_v21 }
0x129a   :  { %v3180_v52 = vadd.f32 1e-05, %v3176_v43 }
0x129b   :  { %v3171_v18 = vpop.xlane.xlu1 %3170 }
0x129c   :  { %8172 = vrsqrt.f32 %v3180_v52  ;;  %v3177_v53 = vmul.f32 0.0078125, %v3171_v18 }
0x129e   :  { %v3181_v9 = vadd.f32 1e-05, %v3177_v53 }
0x129f   :  { %v3173_v28 = vpop.xlane.xlu0 %3172 }
0x12a0   :  { %8174 = vrsqrt.f32 %v3181_v9  ;;  %v3178_v42 = vmul.f32 0.0078125, %v3173_v28 }
0x12a2   :  { %v3182_v56 = vadd.f32 1e-05, %v3178_v42 }
0x12a4   :  { %8176 = vrsqrt.f32 %v3182_v56 }
0x12a6   :  { %v8173_v47 = vpop.eup %8172 }
0x12a7   :  { %v3188_v0 = vmul.f32 %v8173_v47, %v9613_v38 }
0x12a9   :  { %v3198_v51 = vmul.f32 %v6293_v31, %v3188_v0 }
0x12aa   :  { %v8175_v48 = vpop.eup %8174 }
0x12ab   :  { %v3208_v55 = vadd.f32 %v6294_v7, %v3198_v51  ;;  %v3189_v23 = vmul.f32 %v8175_v48, %v9618_v13 }
0x12ad   :  { %3328 = vmatmul.mubr.f32.vlgmr.msra.gmra.mrb[40].mxu1 %v3208_v55  ;;  %6989 = vmatprep.mubr.f32.mxu0 %v3208_v55  ;;  %v3199_v54 = vmul.f32 %v6293_v31, %v3189_v23 }
0x12ae   :  { %v8177_v33 = vpop.eup %8176  ;;  %3333 = vmatprep.mubr.f32.mxu1 %v8782_v29 }
0x12af   :  { %v3209_v20 = vadd.f32 %v6294_v7, %v3199_v54  ;;  %v3190_v32 = vmul.f32 %v8177_v33, %v9623_v41  ;;  %v3262_v41 = vld [vmem:[#allocation13 + $0x3] sm:$0x7] }
0x12b0   :  { %v3175_v34 = vpop.xlane.xlu1 %3174  ;;  %v3441_v50 = vrot.slane %v3262_v41, %v9185_v12  ;;  %v3449_v26 = vrot.slane %v3262_v41, %v9189_v14  ;;  %v3445_v2 = vrot.slane %v3262_v41, %v9192_v15 }
0x12b1   :  { %v3179_v22 = vmul.f32 0.0078125, %v3175_v34  ;;  %3334 = vmatmul.mubr.f32.gmra.mrb[42].mxu1 %v3209_v20  ;;  %6990 = vmatmul.mubr.f32.vlgmr.msra.gmra.mrb[40].mxu0 %v3209_v20  ;;  %v3200_v38 = vmul.f32 %v6293_v31, %v3190_v32 }
0x12b2   :  { %3339 = vmatprep.mubr.f32.mxu1 %v8782_v29 }
0x12b3   :  { %v3183_v1 = vadd.f32 1e-05, %v3179_v22  ;;  %v3210_v19 = vadd.f32 %v6294_v7, %v3200_v38 }
0x12b5   :  { %8178 = vrsqrt.f32 %v3183_v1  ;;  %3340 = vmatmul.mubr.f32.gmra.mrb[44].mxu1 %v3210_v19  ;;  %6992 = vmatprep.mubr.f32.mxu0 %v3210_v19 }
0x12b6   :  { %3345 = vmatprep.mubr.f32.mxu1 %v8782_v29 }
0x12bf   :  { %v8179_v13 = vpop.eup %8178 }
0x12c0   :  { %v3191_v36 = vmul.f32 %v8179_v13, %v9628_v25 }
0x12c2   :  { %v3201_v37 = vmul.f32 %v6293_v31, %v3191_v36 }
0x12c4   :  { %v3211_v49 = vadd.f32 %v6294_v7, %v3201_v37 }
0x12c6   :  { %3346 = vmatmul.mubr.f32.gmra.mrb[46].mxu1 %v3211_v49  ;;  %6993 = vmatmul.mubr.f32.gmra.mrb[42].mxu0 %v3211_v49 }
0x1380   :  { %v3329_v58 = vpop.f32.mrb[40].mxu1 }
0x1381   :  { %v9640_v60 = vadd.f32 %v3441_v50, %v3329_v58  ;;  %v3331_v8 = vpop.f32.mrb[41].mxu1 }
0x1382   :  { %v3454_v17 = vadd.f32 %v3445_v2, %v3331_v8 }
0x1383   :  { %6999 = vmatprep.mubr.msk.f32.mxu1 %vm625_vm0, %v9640_v60 }
0x1384   :  { %v3335_v46 = vpop.f32.mrb[42].mxu1  ;;  %v6991_v25 = vpop.f32.mrb[40].mxu0 }
0x1385   :  { %v3458_v44 = vadd.f32 %v6991_v25, %v3449_v26  ;;  %v3337_v6 = vpop.f32.mrb[43].mxu1  ;;  %v3418_v35 = vpop.f32.mrb[41].mxu0  ;;  %v9654_v43 = vadd.f32 %v3441_v50, %v3335_v46 }
0x1386   :  { %v3457_v45 = vadd.f32 %v3445_v2, %v3337_v6  ;;  %v3455_v4 = vadd.f32 %v3449_v26, %v3418_v35 }
0x1388   :  { %v3341_v5 = vpop.f32.mrb[44].mxu1  ;;  %v7548_v24 = vpack.c.bf16 %v3457_v45, %v3454_v17  ;;  %v7560_v62 = vpack.c.bf16 %v3458_v44, %v3455_v4  ;;  %v9646_v16 = vpack.i.bf16 %v3457_v45, %v3454_v17  ;;  %v9648_v21 = vpack.i.bf16 %v3458_v44, %v3455_v4 }
0x1389   :  { %v3343_v27 = vpop.f32.mrb[45].mxu1  ;;  %v9656_v52 = vadd.f32 %v3441_v50, %v3341_v5 }
0x138a   :  { %7550 = vmatprep.subr.msk.bf16.mxu1 %vm9202_vm1, %v7548_v24  ;;  %v3460_v56 = vadd.f32 %v3445_v2, %v3343_v27 }
0x138b   :  { %7553 = vmatpush3.bf16.xpose.msk.msra.mxu1 %vm9202_vm1, %v7548_v24 }
0x1392   :  { %7000 = vmatmul.mubr.msk.f32.vlgmr.msra.gmra.mrb[48].mxu1 %vm625_vm0, %v9654_v43 }
0x1393   :  { %7006 = vmatprep.mubr.msk.f32.mxu1 %vm625_vm0, %v9656_v52 }
0x1399   :  { %v3347_v18 = vpop.f32.mrb[46].mxu1  ;;  %v6994_v53 = vpop.f32.mrb[42].mxu0 }
0x139a   :  { %v3464_v9 = vadd.f32 %v6994_v53, %v3449_v26  ;;  %v3349_v28 = vpop.f32.mrb[47].mxu1  ;;  %v3428_v42 = vpop.f32.mrb[43].mxu0  ;;  %v9672_v55 = vadd.f32 %v3441_v50, %v3347_v18 }
0x139b   :  { %v3463_v47 = vadd.f32 %v3445_v2, %v3349_v28  ;;  %v3461_v31 = vadd.f32 %v3449_v26, %v3428_v42 }
0x139d   :  { %v7554_v0 = vpack.c.bf16 %v3463_v47, %v3460_v56  ;;  %v9662_v7 = vpack.c.bf16 %v3464_v9, %v3461_v31  ;;  %v9664_v51 = vpack.i.bf16 %v3463_v47, %v3460_v56  ;;  %v9666_v48 = vpack.i.bf16 %v3464_v9, %v3461_v31 }
0x139f   :  { %7556 = vmatprep.subr.msk.bf16.mxu1 %vm9202_vm1, %v7554_v0 }
0x13a0   :  { %7559 = vmatpush3.bf16.xpose.msk.msra.mxu1 %vm9202_vm1, %v7554_v0 }
0x13a1   :  { %7561 = vmatprep.subr.bf16.mxu1 %v7560_v62 }
0x13a7   :  { %7007 = vmatmul.mubr.msk.f32.vlgmr.msra.gmra.mrb[50].mxu1 %vm625_vm0, %v9672_v55 }
0x13a8   :  { %7563 = vmatpush3.bf16.msra.mxu1 %v7560_v62 }
0x13a9   :  { %7565 = vmatprep.subr.bf16.mxu1 %v9662_v7 }
0x1465   :  { %v7001_v23 = vpop.f32.mrb[48].mxu1 }
0x1466   :  { %v3640_v54 = vmul.f32 0.17677669, %v7001_v23  ;;  %v3543_v33 = vpop.f32.mrb[49].mxu1 }
0x1467   :  { %v3639_v20 = vmul.f32 0.17677669, %v3543_v33 }
0x1468   :  { %v3644_v32 = vadd.f32 %v3640_v54, %v9243_v59 }
0x1469   :  { %v3643_v34 = vadd.f32 %v3639_v20, %v9245_v61 }
0x146a   :  { %v3650_v22 = vsel %vm808_vm4, %v3644_v32, -inf }
0x146b   :  { %3651 = vmax.xlane.f32.xlu1 %v3650_v22  ;;  %v3647_v38 = vsel %vm808_vm4, %v3643_v34, -inf }
0x146c   :  { %3648 = vmax.xlane.f32.xlu0 %v3647_v38 }
0x147a   :  { %v7008_v1 = vpop.f32.mrb[50].mxu1 }
0x147b   :  { %v3642_v19 = vmul.f32 0.17677669, %v7008_v1  ;;  %v3630_v13 = vpop.f32.mrb[51].mxu1 }
0x147c   :  { %v3641_v36 = vmul.f32 0.17677669, %v3630_v13 }
0x147d   :  { %v3646_v37 = vadd.f32 %v3642_v19, %v9243_v59 }
0x147e   :  { %v3645_v49 = vadd.f32 %v3641_v36, %v9245_v61 }
0x147f   :  { %v3656_v41 = vsel %vm808_vm4, %v3646_v37, -inf }
0x1480   :  { %3657 = vmax.xlane.f32.xlu1 %v3656_v41  ;;  %v3653_v50 = vsel %vm808_vm4, %v3645_v49, -inf }
0x1481   :  { %3654 = vmax.xlane.f32.xlu0 %v3653_v50 }
0x14f8   :  { %v3652_v58 = vpop.xlane.xlu1 %3651 }
0x14f9   :  { %v3660_v8 = vsub.f32 %v3644_v32, %v3652_v58  ;;  %v3649_v26 = vpop.xlane.xlu0 %3648 }
0x14fa   :  { %v3659_v2 = vsub.f32 %v3643_v34, %v3649_v26 }
0x14fb   :  { %v3665_v46 = vmul.f32 1.442695, %v3660_v8 }
0x14fc   :  { %v3663_v25 = vmul.f32 1.442695, %v3659_v2 }
0x14fd   :  { %8180 = vpow2.f32 %v3665_v46 }
0x14fe   :  { %8182 = vpow2.f32 %v3663_v25 }
0x1507   :  { %v8181_v44 = vpop.eup %8180 }
0x1508   :  { %v8183_v6 = vpop.eup %8182  ;;  %v3674_v35 = vsel %vm808_vm4, %v8181_v44, 0.0 }
0x1509   :  { %3675 = vadd.xlane.f32.xlu1 %v3674_v35  ;;  %v3671_v17 = vsel %vm808_vm4, %v8183_v6, 0.0 }
0x150a   :  { %3672 = vadd.xlane.f32.xlu0 %v3671_v17 }
0x150d   :  { %v3658_v45 = vpop.xlane.xlu1 %3657 }
0x150e   :  { %v3662_v4 = vsub.f32 %v3646_v37, %v3658_v45  ;;  %v3655_v5 = vpop.xlane.xlu0 %3654 }
0x150f   :  { %v3661_v24 = vsub.f32 %v3645_v49, %v3655_v5 }
0x1510   :  { %v3669_v62 = vmul.f32 1.442695, %v3662_v4 }
0x1511   :  { %v3667_v27 = vmul.f32 1.442695, %v3661_v24 }
0x1512   :  { %8184 = vpow2.f32 %v3669_v62 }
0x1513   :  { %8186 = vpow2.f32 %v3667_v27 }
0x151c   :  { %v8185_v18 = vpop.eup %8184 }
0x151d   :  { %v8187_v53 = vpop.eup %8186  ;;  %v3680_v9 = vsel %vm808_vm4, %v8185_v18, 0.0 }
0x151e   :  { %3681 = vadd.xlane.f32.xlu1 %v3680_v9  ;;  %v3677_v28 = vsel %vm808_vm4, %v8187_v53, 0.0 }
0x151f   :  { %3678 = vadd.xlane.f32.xlu0 %v3677_v28 }
0x152f   :  { %7944 = vrot.lane.b32.xlu1 %v9664_v51, %s8784_s17 }
0x1533   :  { %3853 = vrot.lane.b32.xlu1 %v9640_v60, %s8784_s17 }
0x1535   :  { %7939 = vrot.lane.b32.xlu0 %v9646_v16, %s8784_s17 }
0x1537   :  { %3855 = vrot.lane.b32.xlu1 %v9654_v43, %s8784_s17 }
0x1539   :  { %3944 = vrot.lane.b32.xlu0 %v9656_v52, %s8784_s17 }
0x153b   :  { %3946 = vrot.lane.b32.xlu1 %v9672_v55, %s8784_s17 }
0x1596   :  { %v3676_v42 = vpop.xlane.xlu1 %3675 }
0x1597   :  { %8188 = vrcp.f32 %v3676_v42  ;;  %v3673_v56 = vpop.xlane.xlu0 %3672 }
0x1598   :  { %8190 = vrcp.f32 %v3673_v56 }
0x15a1   :  { %v8189_v47 = vpop.eup %8188 }
0x15a2   :  { %v8191_v31 = vpop.eup %8190  ;;  %v3686_v23 = vmul.f32 %v8189_v47, %v8181_v44 }
0x15a3   :  { %v3684_v0 = vmul.f32 %v8191_v31, %v8183_v6 }
0x15a5   :  { %7013 = vmatprep.mubr.msk.f32.mxu1 %vm808_vm4, %v3684_v0 }
0x15a6   :  { %7014 = vmatmul.mubr.msk.f32.vlgmr.msra.gmra.mrb[52].mxu1 %vm808_vm4, %v3686_v23 }
0x15a7   :  { %7567 = vmatpush3.bf16.msra.mxu1 %v9662_v7 }
0x15ab   :  { %v3682_v54 = vpop.xlane.xlu1 %3681 }
0x15ac   :  { %8192 = vrcp.f32 %v3682_v54  ;;  %v3679_v33 = vpop.xlane.xlu0 %3678 }
0x15ad   :  { %8194 = vrcp.f32 %v3679_v33 }
0x15af   :  { %v7945_v20 = vpop.permute.xlu1 %7944 }
0x15b0   :  { %v7947_v32 = vunpack.i.h.bf16 %v7945_v20  ;;  %v7946_v34 = vunpack.i.l.bf16 %v7945_v20  ;;  %v7940_v22 = vpop.permute.xlu0 %7939 }
0x15b1   :  { %v7942_v38 = vunpack.i.h.bf16 %v7940_v22  ;;  %v7941_v1 = vunpack.i.l.bf16 %v7940_v22 }
0x15b2   :  { %v7574_v19 = vpack.c.bf16 %v7947_v32, %v7946_v34 }
0x15b3   :  { %v7568_v13 = vpack.c.bf16 %v7942_v38, %v7941_v1  ;;  %v3854_v36 = vpop.permute.xlu1 %3853 }
0x15b4   :  { %7027 = vmatprep.mubr.msk.f32.mxu0 %vm625_vm0, %v3854_v36  ;;  %7576 = vmatprep.subr.msk.bf16.mxu1 %vm9202_vm1, %v7574_v19  ;;  %v3945_v50 = vpop.permute.xlu0 %3944 }
0x15b5   :  { %7570 = vmatprep.subr.msk.bf16.mxu0 %vm9202_vm1, %v7568_v13 }
0x15b6   :  { %v8193_v7 = vpop.eup %8192  ;;  %7573 = vmatpush3.bf16.xpose.msk.msra.mxu0 %vm9202_vm1, %v7568_v13 }
0x15b7   :  { %v8195_v37 = vpop.eup %8194  ;;  %v3690_v41 = vmul.f32 %v8193_v7, %v8185_v18  ;;  %v3856_v58 = vpop.permute.xlu1 %3855 }
0x15b8   :  { %v3688_v49 = vmul.f32 %v8195_v37, %v8187_v53 }
0x15ba   :  { %7020 = vmatprep.mubr.msk.f32.mxu1 %vm808_vm4, %v3688_v49 }
0x15bb   :  { %7021 = vmatmul.mubr.msk.f32.vlgmr.msra.gmra.mrb[54].mxu1 %vm808_vm4, %v3690_v41  ;;  %v3947_v8 = vpop.permute.xlu1 %3946 }
0x15bc   :  { %7579 = vmatpush3.bf16.xpose.msk.msra.mxu1 %vm9202_vm1, %v7574_v19  ;;  %7034 = vmatprep.mubr.msk.f32.mxu1 %vm625_vm0, %v3945_v50 }
0x15bd   :  { %7028 = vmatmul.mubr.msk.f32.vlgmr.msra.gmra.mrb[44].mxu0 %vm625_vm0, %v3856_v58 }
0x15c3   :  { %7035 = vmatmul.mubr.msk.f32.vlgmr.msra.gmra.mrb[56].mxu1 %vm625_vm0, %v3947_v8 }
0x1679   :  { %v9718_v26 = vpop.f32.mrb[52].mxu1 }
0x167a   :  { %v9720_v2 = vpop.f32.mrb[53].mxu1 }
0x168e   :  { %v9722_v46 = vpop.f32.mrb[54].mxu1 }
0x168f   :  { %v9724_v25 = vpop.f32.mrb[55].mxu1 }
0x1690   :  { %v7029_v44 = vpop.f32.mrb[44].mxu0 }
0x1691   :  { %v4036_v6 = vmul.f32 0.17677669, %v7029_v44  ;;  %v3935_v35 = vpop.f32.mrb[45].mxu0 }
0x1692   :  { %v4035_v17 = vmul.f32 0.17677669, %v3935_v35 }
0x1693   :  { %v4040_v45 = vadd.f32 %v4036_v6, %v9243_v59 }
0x1694   :  { %v4039_v4 = vadd.f32 %v4035_v17, %v9245_v61 }
0x1695   :  { %v4046_v5 = vsel %vm808_vm4, %v4040_v45, -inf }
0x1696   :  { %v7036_v24 = vpop.f32.mrb[56].mxu1  ;;  %4047 = vmax.xlane.f32.xlu1 %v4046_v5  ;;  %v4043_v62 = vsel %vm808_vm4, %v4039_v4, -inf }
0x1697   :  { %v4026_v27 = vpop.f32.mrb[57].mxu1  ;;  %4044 = vmax.xlane.f32.xlu0 %v4043_v62  ;;  %v4038_v18 = vmul.f32 0.17677669, %v7036_v24 }
0x1698   :  { %v4037_v53 = vmul.f32 0.17677669, %v4026_v27 }
0x1699   :  { %v4042_v28 = vadd.f32 %v4038_v18, %v9243_v59 }
0x169a   :  { %v4041_v9 = vadd.f32 %v4037_v53, %v9245_v61 }
0x169b   :  { %v4052_v56 = vsel %vm808_vm4, %v4042_v28, -inf }
0x169c   :  { %v4049_v42 = vsel %vm808_vm4, %v4041_v9, -inf }
0x169d   :  { %4050 = vmax.xlane.f32.xlu0 %v4049_v42 }
0x16a1   :  { %4053 = vmax.xlane.f32.xlu0 %v4052_v56 }
0x1723   :  { %v4048_v47 = vpop.xlane.xlu1 %4047 }
0x1724   :  { %v4056_v31 = vsub.f32 %v4040_v45, %v4048_v47  ;;  %v4045_v0 = vpop.xlane.xlu0 %4044 }
0x1725   :  { %v4055_v23 = vsub.f32 %v4039_v4, %v4045_v0 }
0x1726   :  { %v4061_v54 = vmul.f32 1.442695, %v4056_v31 }
0x1727   :  { %v4059_v33 = vmul.f32 1.442695, %v4055_v23 }
0x1728   :  { %8196 = vpow2.f32 %v4061_v54 }
0x1729   :  { %8198 = vpow2.f32 %v4059_v33 }
0x172a   :  { %v4051_v38 = vpop.xlane.xlu0 %4050 }
0x172b   :  { %v4057_v1 = vsub.f32 %v4041_v9, %v4051_v38 }
0x172d   :  { %v4063_v19 = vmul.f32 1.442695, %v4057_v1 }
0x172e   :  { %v4054_v13 = vpop.xlane.xlu0 %4053 }
0x172f   :  { %v4058_v36 = vsub.f32 %v4042_v28, %v4054_v13  ;;  %8200 = vpow2.f32 %v4063_v19 }
0x1731   :  { %v4065_v7 = vmul.f32 1.442695, %v4058_v36 }
0x1732   :  { %v8197_v20 = vpop.eup %8196 }
0x1733   :  { %v8199_v32 = vpop.eup %8198  ;;  %v4070_v34 = vsel %vm808_vm4, %v8197_v20, 0.0  ;;  %8202 = vpow2.f32 %v4065_v7 }
0x1734   :  { %4071 = vadd.xlane.f32.xlu1 %v4070_v34  ;;  %v4067_v22 = vsel %vm808_vm4, %v8199_v32, 0.0 }
0x1735   :  { %4068 = vadd.xlane.f32.xlu0 %v4067_v22 }
0x1739   :  { %v8201_v37 = vpop.eup %8200 }
0x173a   :  { %v4073_v49 = vsel %vm808_vm4, %v8201_v37, 0.0 }
0x173d   :  { %v8203_v41 = vpop.eup %8202 }
0x173e   :  { %v4076_v50 = vsel %vm808_vm4, %v8203_v41, 0.0 }
0x1745   :  { %7954 = vrot.lane.b32.xlu1 %v9666_v48, %s8784_s17 }
0x1749   :  { %7959 = vrot.lane.b32.xlu1 %v9646_v16, %s8765_s10 }
0x174b   :  { %7949 = vrot.lane.b32.xlu0 %v9648_v21, %s8784_s17 }
0x174d   :  { %7964 = vrot.lane.b32.xlu1 %v9664_v51, %s8765_s10 }
0x176a   :  { %4074 = vadd.xlane.f32.xlu0 %v4073_v49 }
0x1771   :  { %4077 = vadd.xlane.f32.xlu1 %v4076_v50 }
0x1780   :  { %4265 = vrot.lane.b32.xlu0 %v9640_v60, %s8765_s10 }
0x1782   :  { %4267 = vrot.lane.b32.xlu1 %v9654_v43, %s8765_s10 }
0x1784   :  { %4356 = vrot.lane.b32.xlu0 %v9656_v52, %s8765_s10 }
0x1786   :  { %4358 = vrot.lane.b32.xlu1 %v9672_v55, %s8765_s10 }
0x17c1   :  { %v4072_v58 = vpop.xlane.xlu1 %4071 }
0x17c2   :  { %8204 = vrcp.f32 %v4072_v58  ;;  %v4069_v8 = vpop.xlane.xlu0 %4068 }
0x17c3   :  { %8206 = vrcp.f32 %v4069_v8 }
0x17c5   :  { %v7955_v44 = vpop.permute.xlu1 %7954 }
0x17c6   :  { %v7957_v6 = vunpack.i.h.bf16 %v7955_v44  ;;  %v7956_v35 = vunpack.i.l.bf16 %v7955_v44  ;;  %v7950_v17 = vpop.permute.xlu0 %7949 }
0x17c7   :  { %v7952_v45 = vunpack.i.h.bf16 %v7950_v17  ;;  %v7951_v4 = vunpack.i.l.bf16 %v7950_v17 }
0x17c8   :  { %v7584_v5 = vpack.c.bf16 %v7957_v6, %v7956_v35 }
0x17c9   :  { %v7580_v24 = vpack.c.bf16 %v7952_v45, %v7951_v4  ;;  %v7960_v62 = vpop.permute.xlu1 %7959 }
0x17ca   :  { %v7962_v27 = vunpack.i.h.bf16 %v7960_v62  ;;  %v7961_v18 = vunpack.i.l.bf16 %v7960_v62  ;;  %7585 = vmatprep.subr.bf16.mxu1 %v7584_v5 }
0x17cb   :  { %7581 = vmatprep.subr.bf16.mxu0 %v7580_v24  ;;  %7587 = vmatpush3.bf16.msra.mxu1 %v7584_v5 }
0x17cc   :  { %v8205_v53 = vpop.eup %8204  ;;  %v7588_v9 = vpack.c.bf16 %v7962_v27, %v7961_v18  ;;  %7583 = vmatpush3.bf16.msra.mxu0 %v7580_v24 }
0x17cd   :  { %v8207_v28 = vpop.eup %8206  ;;  %v7965_v42 = vpop.permute.xlu1 %7964  ;;  %v4082_v0 = vmul.f32 %v8205_v53, %v8197_v20 }
0x17ce   :  { %v7967_v56 = vunpack.i.h.bf16 %v7965_v42  ;;  %v7966_v47 = vunpack.i.l.bf16 %v7965_v42  ;;  %7590 = vmatprep.subr.msk.bf16.mxu0 %vm9202_vm1, %v7588_v9  ;;  %v4080_v31 = vmul.f32 %v8207_v28, %v8199_v32 }
0x17d0   :  { %v7594_v23 = vpack.c.bf16 %v7967_v56, %v7966_v47  ;;  %7041 = vmatprep.mubr.msk.f32.mxu0 %vm808_vm4, %v4080_v31 }
0x17d1   :  { %7042 = vmatmul.mubr.msk.f32.vlgmr.msra.gmra.mrb[46].mxu0 %vm808_vm4, %v4082_v0 }
0x17d2   :  { %7596 = vmatprep.subr.msk.bf16.mxu1 %vm9202_vm1, %v7594_v23 }
0x17d5   :  { %7593 = vmatpush3.bf16.xpose.msk.msra.mxu0 %vm9202_vm1, %v7588_v9 }
0x17f7   :  { %v4075_v54 = vpop.xlane.xlu0 %4074 }
0x17f8   :  { %8208 = vrcp.f32 %v4075_v54 }
0x17fb   :  { %v4266_v33 = vpop.permute.xlu0 %4265 }
0x17fc   :  { %7055 = vmatprep.mubr.msk.f32.mxu0 %vm625_vm0, %v4266_v33 }
0x17fe   :  { %v4078_v34 = vpop.xlane.xlu1 %4077 }
0x17ff   :  { %8210 = vrcp.f32 %v4078_v34  ;;  %v4357_v19 = vpop.permute.xlu0 %4356 }
0x1802   :  { %v8209_v32 = vpop.eup %8208  ;;  %v4268_v20 = vpop.permute.xlu1 %4267 }
0x1803   :  { %7056 = vmatmul.mubr.msk.f32.vlgmr.msra.gmra.mrb[48].mxu0 %vm625_vm0, %v4268_v20  ;;  %v4084_v22 = vmul.f32 %v8209_v32, %v8201_v37 }
0x1805   :  { %7048 = vmatprep.mubr.msk.f32.mxu1 %vm808_vm4, %v4084_v22 }
0x1806   :  { %v4359_v13 = vpop.permute.xlu1 %4358 }
0x1809   :  { %v8211_v38 = vpop.eup %8210 }
0x180a   :  { %v4086_v1 = vmul.f32 %v8211_v38, %v8203_v41 }
0x180c   :  { %7049 = vmatmul.mubr.msk.f32.vlgmr.msra.gmra.mrb[58].mxu1 %vm808_vm4, %v4086_v1 }
0x180d   :  { %7599 = vmatpush3.bf16.xpose.msk.msra.mxu1 %vm9202_vm1, %v7594_v23  ;;  %7062 = vmatprep.mubr.msk.f32.mxu1 %vm625_vm0, %v4357_v19 }
0x1814   :  { %7063 = vmatmul.mubr.msk.f32.vlgmr.msra.gmra.mrb[60].mxu1 %vm625_vm0, %v4359_v13 }
0x18a4   :  { %v9770_v36 = vpop.f32.mrb[46].mxu0 }
0x18a5   :  { %v9772_v7 = vpop.f32.mrb[47].mxu0 }
0x18a6   :  { %v7998_v37 = vpack.i.bf16 %v9770_v36, %v9772_v7 }
0x18d6   :  { %v7057_v49 = vpop.f32.mrb[48].mxu0 }
0x18d7   :  { %v4448_v41 = vmul.f32 0.17677669, %v7057_v49  ;;  %v4347_v50 = vpop.f32.mrb[49].mxu0 }
0x18d8   :  { %v4447_v58 = vmul.f32 0.17677669, %v4347_v50 }
0x18d9   :  { %v4452_v8 = vadd.f32 %v4448_v41, %v9243_v59 }
0x18da   :  { %v4451_v44 = vadd.f32 %v4447_v58, %v9245_v61 }
0x18db   :  { %v4458_v6 = vsel %vm808_vm4, %v4452_v8, -inf }
0x18dc   :  { %4459 = vmax.xlane.f32.xlu1 %v4458_v6  ;;  %v4455_v35 = vsel %vm808_vm4, %v4451_v44, -inf }
0x18dd   :  { %4456 = vmax.xlane.f32.xlu0 %v4455_v35 }
0x18df   :  { %v9780_v17 = vpop.f32.mrb[58].mxu1 }
0x18e0   :  { %v9782_v45 = vpop.f32.mrb[59].mxu1 }
0x18e1   :  { %v8013_v4 = vpack.i.bf16 %v9780_v17, %v9782_v45 }
0x18e7   :  { %v7064_v5 = vpop.f32.mrb[60].mxu1 }
0x18e8   :  { %v4438_v24 = vpop.f32.mrb[61].mxu1  ;;  %v4450_v62 = vmul.f32 0.17677669, %v7064_v5 }
0x18e9   :  { %v4449_v27 = vmul.f32 0.17677669, %v4438_v24 }
0x18ea   :  { %v4454_v53 = vadd.f32 %v4450_v62, %v9243_v59 }
0x18eb   :  { %v4453_v18 = vadd.f32 %v4449_v27, %v9245_v61 }
0x18ec   :  { %v4464_v28 = vsel %vm808_vm4, %v4454_v53, -inf }
0x18ed   :  { %v4461_v9 = vsel %vm808_vm4, %v4453_v18, -inf }
0x18ee   :  { %4462 = vmax.xlane.f32.xlu0 %v4461_v9 }
0x18f2   :  { %4465 = vmax.xlane.f32.xlu0 %v4464_v28 }
0x1969   :  { %v4460_v42 = vpop.xlane.xlu1 %4459 }
0x196a   :  { %v4468_v56 = vsub.f32 %v4452_v8, %v4460_v42  ;;  %v4457_v47 = vpop.xlane.xlu0 %4456 }
0x196b   :  { %v4467_v31 = vsub.f32 %v4451_v44, %v4457_v47 }
0x196c   :  { %v4473_v0 = vmul.f32 1.442695, %v4468_v56 }
0x196d   :  { %v4471_v23 = vmul.f32 1.442695, %v4467_v31 }
0x196e   :  { %8212 = vpow2.f32 %v4473_v0 }
0x196f   :  { %8214 = vpow2.f32 %v4471_v23 }
0x1978   :  { %v8213_v54 = vpop.eup %8212 }
0x1979   :  { %v8215_v33 = vpop.eup %8214  ;;  %v4482_v34 = vsel %vm808_vm4, %v8213_v54, 0.0 }
0x197a   :  { %4483 = vadd.xlane.f32.xlu1 %v4482_v34  ;;  %v4479_v32 = vsel %vm808_vm4, %v8215_v33, 0.0 }
0x197b   :  { %4480 = vadd.xlane.f32.xlu0 %v4479_v32  ;;  %v4463_v20 = vpop.xlane.xlu0 %4462 }
0x197c   :  { %v4469_v22 = vsub.f32 %v4453_v18, %v4463_v20 }
0x197e   :  { %v4475_v38 = vmul.f32 1.442695, %v4469_v22 }
0x197f   :  { %v4466_v1 = vpop.xlane.xlu0 %4465 }
0x1980   :  { %v4470_v19 = vsub.f32 %v4454_v53, %v4466_v1  ;;  %8216 = vpow2.f32 %v4475_v38 }
0x1982   :  { %v4477_v13 = vmul.f32 1.442695, %v4470_v19 }
0x1984   :  { %8218 = vpow2.f32 %v4477_v13 }
0x198a   :  { %v8217_v49 = vpop.eup %8216 }
0x198b   :  { %7974 = vrot.lane.b32.xlu1 %v9666_v48, %s8765_s10  ;;  %v4485_v41 = vsel %vm808_vm4, %v8217_v49, 0.0 }
0x198e   :  { %v8219_v50 = vpop.eup %8218 }
0x198f   :  { %7979 = vrot.lane.b32.xlu1 %v9646_v16, %s8778_s25  ;;  %v4488_v16 = vsel %vm808_vm4, %v8219_v50, 0.0 }
0x1991   :  { %7969 = vrot.lane.b32.xlu0 %v9648_v21, %s8765_s10 }
0x1993   :  { %7984 = vrot.lane.b32.xlu1 %v9664_v51, %s8778_s25 }
0x19b0   :  { %4486 = vadd.xlane.f32.xlu0 %v4485_v41 }
0x19b7   :  { %4489 = vadd.xlane.f32.xlu1 %v4488_v16 }
0x19c6   :  { %4673 = vrot.lane.b32.xlu0 %v9640_v60, %s8778_s25 }
0x19c8   :  { %4675 = vrot.lane.b32.xlu1 %v9654_v43, %s8778_s25 }
0x19ca   :  { %4764 = vrot.lane.b32.xlu0 %v9656_v52, %s8778_s25 }
0x19cc   :  { %4766 = vrot.lane.b32.xlu1 %v9672_v55, %s8778_s25 }
0x1a07   :  { %v4484_v51 = vpop.xlane.xlu1 %4483 }
0x1a08   :  { %8220 = vrcp.f32 %v4484_v51  ;;  %v4481_v58 = vpop.xlane.xlu0 %4480 }
0x1a09   :  { %8222 = vrcp.f32 %v4481_v58 }
0x1a0b   :  { %v7975_v8 = vpop.permute.xlu1 %7974 }
0x1a0c   :  { %v7977_v44 = vunpack.i.h.bf16 %v7975_v8  ;;  %v7976_v6 = vunpack.i.l.bf16 %v7975_v8  ;;  %v7970_v35 = vpop.permute.xlu0 %7969 }
0x1a0d   :  { %v7972_v5 = vunpack.i.h.bf16 %v7970_v35  ;;  %v7971_v24 = vunpack.i.l.bf16 %v7970_v35 }
0x1a0e   :  { %v7604_v60 = vpack.c.bf16 %v7977_v44, %v7976_v6 }
0x1a0f   :  { %v7600_v62 = vpack.c.bf16 %v7972_v5, %v7971_v24  ;;  %v7980_v27 = vpop.permute.xlu1 %7979 }
0x1a10   :  { %v7982_v43 = vunpack.i.h.bf16 %v7980_v27  ;;  %v7981_v18 = vunpack.i.l.bf16 %v7980_v27  ;;  %7605 = vmatprep.subr.bf16.mxu1 %v7604_v60 }
0x1a11   :  { %7601 = vmatprep.subr.bf16.mxu0 %v7600_v62  ;;  %7607 = vmatpush3.bf16.msra.mxu1 %v7604_v60 }
0x1a12   :  { %v8221_v52 = vpop.eup %8220  ;;  %v7608_v55 = vpack.c.bf16 %v7982_v43, %v7981_v18  ;;  %7603 = vmatpush3.bf16.msra.mxu0 %v7600_v62 }
0x1a13   :  { %v8223_v53 = vpop.eup %8222  ;;  %v7985_v9 = vpop.permute.xlu1 %7984  ;;  %v4494_v47 = vmul.f32 %v8221_v52, %v8213_v54 }
0x1a14   :  { %v7987_v28 = vunpack.i.h.bf16 %v7985_v9  ;;  %v7986_v42 = vunpack.i.l.bf16 %v7985_v9  ;;  %7610 = vmatprep.subr.msk.bf16.mxu0 %vm9202_vm1, %v7608_v55  ;;  %v4492_v56 = vmul.f32 %v8223_v53, %v8215_v33 }
0x1a16   :  { %v7614_v31 = vpack.c.bf16 %v7987_v28, %v7986_v42  ;;  %7069 = vmatprep.mubr.msk.f32.mxu0 %vm808_vm4, %v4492_v56 }
0x1a17   :  { %7070 = vmatmul.mubr.msk.f32.vlgmr.msra.gmra.mrb[50].mxu0 %vm808_vm4, %v4494_v47 }
0x1a18   :  { %7616 = vmatprep.subr.msk.bf16.mxu1 %vm9202_vm1, %v7614_v31 }
0x1a1b   :  { %7613 = vmatpush3.bf16.xpose.msk.msra.mxu0 %vm9202_vm1, %v7608_v55 }
0x1a3d   :  { %v4487_v0 = vpop.xlane.xlu0 %4486 }
0x1a3e   :  { %8224 = vrcp.f32 %v4487_v0 }
0x1a41   :  { %v4674_v23 = vpop.permute.xlu0 %4673 }
0x1a42   :  { %7083 = vmatprep.mubr.msk.f32.mxu0 %vm625_vm0, %v4674_v23 }
0x1a44   :  { %v4490_v34 = vpop.xlane.xlu1 %4489 }
0x1a45   :  { %8226 = vrcp.f32 %v4490_v34  ;;  %v4765_v38 = vpop.permute.xlu0 %4764 }
0x1a48   :  { %v8225_v33 = vpop.eup %8224  ;;  %v4676_v54 = vpop.permute.xlu1 %4675 }
0x1a49   :  { %7084 = vmatmul.mubr.msk.f32.vlgmr.msra.gmra.mrb[52].mxu0 %vm625_vm0, %v4676_v54  ;;  %v4496_v32 = vmul.f32 %v8225_v33, %v8217_v49 }
0x1a4b   :  { %7076 = vmatprep.mubr.msk.f32.mxu1 %vm808_vm4, %v4496_v32 }
0x1a4c   :  { %v4767_v1 = vpop.permute.xlu1 %4766 }
0x1a4f   :  { %v8227_v20 = vpop.eup %8226 }
0x1a50   :  { %v4498_v22 = vmul.f32 %v8227_v20, %v8219_v50 }
0x1a52   :  { %7077 = vmatmul.mubr.msk.f32.vlgmr.msra.gmra.mrb[62].mxu1 %vm808_vm4, %v4498_v22 }
0x1a53   :  { %7619 = vmatpush3.bf16.xpose.msk.msra.mxu1 %vm9202_vm1, %v7614_v31  ;;  %7090 = vmatprep.mubr.msk.f32.mxu1 %vm625_vm0, %v4765_v38 }
0x1a5a   :  { %7091 = vmatmul.mubr.msk.f32.vlgmr.msra.gmra.mrb[64].mxu1 %vm625_vm0, %v4767_v1 }
0x1aea   :  { %v7071_v19 = vpop.f32.mrb[50].mxu0 }
0x1aeb   :  { %v4577_v13 = vpop.f32.mrb[51].mxu0 }
0x1aec   :  { %v8003_v41 = vpack.i.bf16 %v7071_v19, %v4577_v13 }
0x1b1c   :  { %v7085_v16 = vpop.f32.mrb[52].mxu0 }
0x1b1d   :  { %v4856_v49 = vmul.f32 0.17677669, %v7085_v16  ;;  %v4755_v51 = vpop.f32.mrb[53].mxu0 }
0x1b1e   :  { %v4855_v58 = vmul.f32 0.17677669, %v4755_v51 }
0x1b1f   :  { %v4860_v50 = vadd.f32 %v4856_v49, %v9243_v59 }
0x1b20   :  { %v4859_v8 = vadd.f32 %v4855_v58, %v9245_v61 }
0x1b21   :  { %v4866_v44 = vsel %vm808_vm4, %v4860_v50, -inf }
0x1b22   :  { %4867 = vmax.xlane.f32.xlu1 %v4866_v44  ;;  %v4863_v30 = vsel %vm808_vm4, %v4859_v8, -inf }
0x1b23   :  { %4864 = vmax.xlane.f32.xlu0 %v4863_v30 }
0x1b25   :  { %v9830_v6 = vpop.f32.mrb[62].mxu1 }
0x1b26   :  { %v9832_v35 = vpop.f32.mrb[63].mxu1 }
0x1b27   :  { %v8018_v5 = vpack.i.bf16 %v9830_v6, %v9832_v35 }
0x1b2d   :  { %v7092_v24 = vpop.f32.mrb[64].mxu1 }
0x1b2e   :  { %v4846_v60 = vpop.f32.mrb[65].mxu1  ;;  %v4858_v62 = vmul.f32 0.17677669, %v7092_v24 }
0x1b2f   :  { %v4857_v27 = vmul.f32 0.17677669, %v4846_v60 }
0x1b30   :  { %v4862_v18 = vadd.f32 %v4858_v62, %v9243_v59  ;;  %v5142_v62 = vld [vmem:[#allocation15 + $0x80] sm:$0xff] }
0x1b31   :  { %v4861_v43 = vadd.f32 %v4857_v27, %v9245_v61  ;;  %v5143_v27 = vld [vmem:[#allocation15 + $0x88] sm:$0xff] }
0x1b32   :  { %v4872_v55 = vsel %vm808_vm4, %v4862_v18, -inf }
0x1b33   :  { %v4869_v52 = vsel %vm808_vm4, %v4861_v43, -inf }
0x1b34   :  { %4870 = vmax.xlane.f32.xlu0 %v4869_v52  ;;  %v5145_v52 = vld [vmem:[#allocation15 + $0x98] sm:$0xff] }
0x1b38   :  { %4873 = vmax.xlane.f32.xlu0 %v4872_v55 }
0x1baf   :  { %v4868_v53 = vpop.xlane.xlu1 %4867 }
0x1bb0   :  { %v4876_v9 = vsub.f32 %v4860_v50, %v4868_v53  ;;  %v4865_v28 = vpop.xlane.xlu0 %4864  ;;  %v5146_v53 = vld [vmem:[#allocation15 + $0xa0] sm:$0xff] }
0x1bb1   :  { %v4875_v42 = vsub.f32 %v4859_v8, %v4865_v28 }
0x1bb2   :  { %v4881_v56 = vmul.f32 1.442695, %v4876_v9  ;;  %v5147_v9 = vld [vmem:[#allocation15 + $0xa8] sm:$0xff] }
0x1bb3   :  { %v4879_v47 = vmul.f32 1.442695, %v4875_v42  ;;  %v7636_v28 = vpack.c.bf16 %v5147_v9, %v5146_v53  ;;  %v5148_v42 = vld [vmem:[#allocation15 + $0xb0] sm:$0xff] }
0x1bb4   :  { %8228 = vpow2.f32 %v4881_v56  ;;  %v5149_v56 = vld [vmem:[#allocation15 + $0xb8] sm:$0xff] }
0x1bb5   :  { %8230 = vpow2.f32 %v4879_v47  ;;  %v7640_v47 = vpack.c.bf16 %v5149_v56, %v5148_v42  ;;  %v6343_v42 = vld [vmem:[#allocation16 + $0x1] ss:$0 sm:$0xff] }
0x1bbe   :  { %v8229_v31 = vpop.eup %8228 }
0x1bbf   :  { %v8231_v0 = vpop.eup %8230  ;;  %v4890_v61 = vsel %vm808_vm4, %v8229_v31, 0.0 }
0x1bc0   :  { %4891 = vadd.xlane.f32.xlu1 %v4890_v61  ;;  %v4887_v59 = vsel %vm808_vm4, %v8231_v0, 0.0 }
0x1bc1   :  { %v4871_v23 = vpop.xlane.xlu0 %4870  ;;  %4888 = vadd.xlane.f32.xlu0 %v4887_v59  ;;  %v5152_v59 = vld [vmem:[#allocation15 + $0xd0] sm:$0xff] }
0x1bc2   :  { %v4877_v34 = vsub.f32 %v4861_v43, %v4871_v23  ;;  %v5144_v43 = vld [vmem:[#allocation15 + $0x90] sm:$0xff]  ;;  %v5153_v23 = vld [vmem:[#allocation15 + $0xd8] sm:$0xff] }
0x1bc3   :  { %v7632_v55 = vpack.c.bf16 %v5145_v52, %v5144_v43 }
0x1bc4   :  { %v4883_v33 = vmul.f32 1.442695, %v4877_v34  ;;  %v7648_v34 = vpack.c.bf16 %v5153_v23, %v5152_v59 }
0x1bc5   :  { %v4874_v54 = vpop.xlane.xlu0 %4873 }
0x1bc6   :  { %8232 = vpow2.f32 %v4883_v33  ;;  %v4878_v32 = vsub.f32 %v4862_v18, %v4874_v54  ;;  %v7628_v18 = vpack.c.bf16 %v5143_v27, %v5142_v62  ;;  %v5154_v33 = vld [vmem:[#allocation15 + $0xe0] sm:$0xff]  ;;  %v5155_v54 = vld [vmem:[#allocation15 + $0xe8] sm:$0xff] }
0x1bc8   :  { %v4885_v20 = vmul.f32 1.442695, %v4878_v32  ;;  %v7652_v32 = vpack.c.bf16 %v5155_v54, %v5154_v33 }
0x1bca   :  { %8234 = vpow2.f32 %v4885_v20  ;;  %v5156_v20 = vld [vmem:[#allocation15 + $0xf0] sm:$0xff] }
0x1bd0   :  { %v8233_v22 = vpop.eup %8232 }
0x1bd1   :  { %v4893_v38 = vsel %vm808_vm4, %v8233_v22, 0.0 }
0x1bd2   :  { %4894 = vadd.xlane.f32.xlu0 %v4893_v38 }
0x1bd4   :  { %v8235_v1 = vpop.eup %8234 }
0x1bd5   :  { %v4896_v19 = vsel %vm808_vm4, %v8235_v1, 0.0 }
0x1bd6   :  { %4897 = vadd.xlane.f32.xlu1 %v4896_v19 }
0x1be7   :  { %7994 = vrot.lane.b32.xlu1 %v9666_v48, %s8778_s25 }
0x1be8   :  { %7989 = vrot.lane.b32.xlu0 %v9648_v21, %s8778_s25 }
0x1beb   :  { %7999 = vrot.lane.b32.xlu1 %v7998_v37, %s8778_s25 }
0x1bef   :  { %8004 = vrot.lane.b32.xlu1 %v8003_v41, %s8765_s10 }
0x1bf3   :  { %8014 = vrot.lane.b32.xlu1 %v8013_v4, %s8778_s25  ;;  %s6206_s25 = sshll.u32 %s8787_s21, 4  ;;  %s6207_s25 = int_to_ptr.vmem [resolvable:$true] %s6206_s25 }
0x1bf4   :  { %s8708_s0 = scalar_lea.vmem %s6207_s25, 32  ;;  %p8713_p0 = scmp.lt.s32.totalorder %s6207_s25, %s6207_s25 }
0x1bf5   :  { %p8709_p13 = scmp.ne.s32.totalorder %s6207_s25, %s8708_s0  ;;  %p8714_p1 = scmp.lt.s32.totalorder %s8708_s0, %s8708_s0 }
0x1bf7   :  { %p8715_p2 = por %p8714_p1, %p8713_p0 }
0x1bf9   :  { %p8716_p3 = pnand %p8715_p2, %p8709_p13 }
0x1c4d   :  { %v4892_v49 = vpop.xlane.xlu1 %4891 }
0x1c4e   :  { %v4889_v13 = vpop.xlane.xlu0 %4888 }
0x1c4f   :  { %8236 = vrcp.f32 %v4889_v13 }
0x1c50   :  { %8238 = vrcp.f32 %v4892_v49 }
0x1c59   :  { %v8237_v16 = vpop.eup %8236 }
0x1c5a   :  { %v4900_v48 = vmul.f32 %v8237_v16, %v8231_v0  ;;  %v8239_v58 = vpop.eup %8238  ;;  %v5151_v0 = vld [vmem:[#allocation15 + $0xc8] sm:$0xff] }
0x1c5b   :  { %v4902_v8 = vmul.f32 %v8239_v58, %v8229_v31  ;;  %v5150_v31 = vld [vmem:[#allocation15 + $0xc0] sm:$0xff] }
0x1c5c   :  { %7097 = vmatprep.mubr.msk.f32.mxu0 %vm808_vm4, %v4900_v48  ;;  %v7644_v61 = vpack.c.bf16 %v5151_v0, %v5150_v31 }
0x1c5f   :  { %v4895_v21 = vpop.xlane.xlu0 %4894 }
0x1c60   :  { %8240 = vrcp.f32 %v4895_v21 }
0x1c63   :  { %v4898_v51 = vpop.xlane.xlu1 %4897  ;;  %v7990_v36 = vpop.permute.xlu0 %7989 }
0x1c64   :  { %8242 = vrcp.f32 %v4898_v51  ;;  %v7992_v7 = vunpack.i.h.bf16 %v7990_v36  ;;  %v7991_v37 = vunpack.i.l.bf16 %v7990_v36 }
0x1c66   :  { %v7620_v41 = vpack.c.bf16 %v7992_v7, %v7991_v37 }
0x1c67   :  { %v7995_v50 = vpop.permute.xlu1 %7994 }
0x1c68   :  { %v7997_v17 = vunpack.i.h.bf16 %v7995_v50  ;;  %v7996_v45 = vunpack.i.l.bf16 %v7995_v50  ;;  %7621 = vmatprep.subr.bf16.mxu0 %v7620_v41 }
0x1c69   :  { %7623 = vmatpush3.bf16.msra.mxu0 %v7620_v41 }
0x1c6a   :  { %v8241_v4 = vpop.eup %8240  ;;  %v7624_v44 = vpack.c.bf16 %v7997_v17, %v7996_v45  ;;  %7629 = vmatprep.subr.bf16.mxu0 %v7628_v18 }
0x1c6b   :  { %v4904_v30 = vmul.f32 %v8241_v4, %v8233_v22  ;;  %v5157_v22 = vld [vmem:[#allocation15 + $0xf8] sm:$0xff]  ;;  %v8000_v21 = vpop.permute.xlu1 %7999 }
0x1c6c   :  { %7098 = vmatmul.mubr.msk.f32.vlgmr.msra.gmra.mrb[54].mxu0 %vm808_vm4, %v4902_v8  ;;  %7625 = vmatprep.subr.bf16.mxu1 %v7624_v44  ;;  %v7656_v38 = vpack.c.bf16 %v5157_v22, %v5156_v20  ;;  %v8002_v36 = vunpack.i.h.bf16 %v8000_v21  ;;  %v8001_v7 = vunpack.i.l.bf16 %v8000_v21  ;;  %v5335_v22 = vld [vmem:[#allocation21 + $0x238] sm:$0xff]  ;;  %v5341_v21 = vld [vmem:[#allocation21 + $0x268] sm:$0xff] }
0x1c6d   :  { %7627 = vmatpush3.bf16.msra.mxu1 %v7624_v44  ;;  %7104 = vmatprep.mubr.msk.f32.mxu1 %vm808_vm4, %v4904_v30 }
0x1c6e   :  { %v8243_v24 = vpop.eup %8242  ;;  %7631 = vmatpush3.bf16.msra.mxu0 %v7628_v18  ;;  %v5130_v17 = vsel %vm625_vm0, %v9718_v26, %v8002_v36  ;;  %v5129_v8 = vsel %vm625_vm0, %v9720_v2, %v8001_v7 }
0x1c6f   :  { %v4906_v60 = vmul.f32 %v8243_v24, %v8235_v1  ;;  %7633 = vmatprep.subr.bf16.mxu0 %v7632_v55  ;;  %v8005_v51 = vpop.permute.xlu1 %8004 }
0x1c70   :  { %v8007_v37 = vunpack.i.h.bf16 %v8005_v51  ;;  %v8006_v41 = vunpack.i.l.bf16 %v8005_v51  ;;  %v5339_v51 = vld [vmem:[#allocation21 + $0x258] sm:$0xff] }
0x1c71   :  { %7105 = vmatmul.mubr.msk.f32.vlgmr.msra.gmra.mrb[66].mxu1 %vm808_vm4, %v4906_v60 }
0x1c72   :  { %5458 = vmatprep.mubr.f32.mxu1 %v8782_v29  ;;  %7635 = vmatpush3.bf16.msra.mxu0 %v7632_v55  ;;  %v5134_v44 = vsel %vm2295_vm5, %v5130_v17, %v8007_v37  ;;  %v5336_v37 = vld [vmem:[#allocation21 + $0x240] sm:$0xff]  ;;  %v5342_v17 = vld [vmem:[#allocation21 + $0x270] sm:$0xff] }
0x1c73   :  { %7637 = vmatprep.subr.bf16.mxu0 %v7636_v28  ;;  %v8015_v58 = vpop.permute.xlu1 %8014 }
0x1c74   :  { %v8017_v6 = vunpack.i.h.bf16 %v8015_v58  ;;  %v8016_v35 = vunpack.i.l.bf16 %v8015_v58  ;;  %v5338_v58 = vld [vmem:[#allocation21 + $0x250] sm:$0xff] }
0x1c76   :  { %7639 = vmatpush3.bf16.msra.mxu0 %v7636_v28  ;;  %v5131_v2 = vsel %vm625_vm0, %v9724_v25, %v8016_v35  ;;  %v5132_v52 = vsel %vm625_vm0, %v9722_v46, %v8017_v6  ;;  %v5347_v35 = vld [vmem:[#allocation21 + $0x298] sm:$0xff] }
0x1c77   :  { %7641 = vmatprep.subr.bf16.mxu0 %v7640_v47 }
0x1c7a   :  { %7643 = vmatpush3.bf16.msra.mxu0 %v7640_v47 }
0x1c7b   :  { %7645 = vmatprep.subr.bf16.mxu0 %v7644_v61 }
0x1c7e   :  { %7647 = vmatpush3.bf16.msra.mxu0 %v7644_v61 }
0x1c7f   :  { %7649 = vmatprep.subr.bf16.mxu0 %v7648_v34 }
0x1c82   :  { %7651 = vmatpush3.bf16.msra.mxu0 %v7648_v34 }
0x1c83   :  { %7653 = vmatprep.subr.bf16.mxu0 %v7652_v32 }
0x1c86   :  { %7655 = vmatpush3.bf16.msra.mxu0 %v7652_v32  ;;  %v5331_v32 = vld [vmem:[#allocation21 + $0x218] sm:$0xff] }
0x1c87   :  { %7657 = vmatprep.subr.bf16.mxu0 %v7656_v38 }
0x1c8a   :  { %7659 = vmatpush3.bf16.msra.mxu0 %v7656_v38  ;;  %v5328_v38 = vld [vmem:[#allocation21 + $0x200] sm:$0xff] }
0x1d3f   :  { %v7099_v1 = vpop.f32.mrb[54].mxu0 }
0x1d40   :  { %v4985_v19 = vpop.f32.mrb[55].mxu0 }
0x1d41   :  { %v8008_v13 = vpack.i.bf16 %v7099_v1, %v4985_v19  ;;  %v5332_v1 = vld [vmem:[#allocation21 + $0x220] sm:$0xff]  ;;  %v7692_v19 = vpack.c.bf16 %v5335_v22, %v5331_v32 }
0x1d42   :  { %v5352_v22 = vld [vmem:[#allocation21 + $0x2c0] sm:$0xff] }
0x1d43   :  { %8009 = vrot.lane.b32.xlu0 %v8008_v13, %s8784_s17  ;;  %v7662_v13 = vpack.c.bf16 %v5332_v1, %v5328_v38  ;;  %7693 = vmatprep.subr.bf16.mxu0 %v7692_v19  ;;  %v5356_v38 = vld [vmem:[#allocation21 + $0x2e0] sm:$0xff] }
0x1d44   :  { %v7106_v16 = vpop.f32.mrb[66].mxu1  ;;  %v7674_v19 = vpack.c.bf16 %v5356_v38, %v5352_v22  ;;  %v5388_v22 = vld [vmem:[#allocation21 + $0x3e0] sm:$0xff] }
0x1d45   :  { %v5072_v49 = vpop.f32.mrb[67].mxu1 }
0x1d46   :  { %v8023_v48 = vpack.i.bf16 %v7106_v16, %v5072_v49  ;;  %v5330_v16 = vld [vmem:[#allocation21 + $0x210] sm:$0xff] }
0x1d47   :  { %8019 = vrot.lane.b32.xlu0 %v8018_v5, %s8765_s10  ;;  %v5133_v5 = vsel %vm2295_vm5, %v5129_v8, %v8006_v41  ;;  %v5334_v49 = vld [vmem:[#allocation21 + $0x230] sm:$0xff]  ;;  %v5340_v41 = vld [vmem:[#allocation21 + $0x260] sm:$0xff]  ;;  %v7698_v8 = vpack.c.bf16 %v5342_v17, %v5338_v58  ;;  %s6055_s10 = sld [smem:[#allocation3]] }
0x1d48   :  { %8024 = vrot.lane.b32.xlu1 %v8023_v48, %s8784_s17  ;;  %v7694_v48 = vpack.c.bf16 %v5334_v49, %v5330_v16  ;;  %v5358_v16 = vld [vmem:[#allocation21 + $0x2f0] sm:$0xff] }
0x1d49   :  { %v5362_v58 = vld [vmem:[#allocation21 + $0x310] sm:$0xff] }
0x1db5   :  { %v8010_v50 = vpop.permute.xlu0 %8009 }
0x1db6   :  { %v8012_v45 = vunpack.i.h.bf16 %v8010_v50  ;;  %v8011_v4 = vunpack.i.l.bf16 %v8010_v50  ;;  %v7666_v50 = vpack.c.bf16 %v5340_v41, %v5336_v37 }
0x1db8   :  { %v5137_v30 = vsel %vm2300_vm6, %v5133_v5, %v8011_v4  ;;  %v5138_v24 = vsel %vm2300_vm6, %v5134_v44, %v8012_v45  ;;  %v5345_v45 = vld [vmem:[#allocation21 + $0x288] sm:$0xff]  ;;  %v5351_v5 = vld [vmem:[#allocation21 + $0x2b8] sm:$0xff]  ;;  %v5344_v44 = vld [vmem:[#allocation21 + $0x280] sm:$0xff] }
0x1db9   :  { %v8020_v60 = vpop.permute.xlu0 %8019  ;;  %7139 = vmatprep.mubr.f32.mxu0 %v5137_v30  ;;  %v5349_v4 = vld [vmem:[#allocation21 + $0x2a8] sm:$0xff]  ;;  %v7700_v30 = vpack.c.bf16 %v5351_v5, %v5347_v35  ;;  %v5375_v35 = vld [vmem:[#allocation21 + $0x378] sm:$0xff]  ;;  %v5368_v5 = vld [vmem:[#allocation21 + $0x340] sm:$0xff] }
0x1dba   :  { %v8022_v62 = vunpack.i.h.bf16 %v8020_v60  ;;  %v8021_v27 = vunpack.i.l.bf16 %v8020_v60  ;;  %v8025_v26 = vpop.permute.xlu1 %8024  ;;  %7140 = vmatmul.mubr.f32.vlgmr.msra.gmra.mrb[56].mxu0 %v5138_v24  ;;  %v7668_v6 = vpack.c.bf16 %v5349_v4, %v5345_v45  ;;  %v5348_v24 = vld [vmem:[#allocation21 + $0x2a0] sm:$0xff]  ;;  %v5346_v60 = vld [vmem:[#allocation21 + $0x290] sm:$0xff]  ;;  %v5369_v45 = vld [vmem:[#allocation21 + $0x348] sm:$0xff] }
0x1dbb   :  { %v8027_v43 = vunpack.i.h.bf16 %v8025_v26  ;;  %v8026_v18 = vunpack.i.l.bf16 %v8025_v26  ;;  %7695 = vmatpush1.bf16.msra.mxu0 %v7694_v48  ;;  %v5365_v48 = vld [vmem:[#allocation21 + $0x328] sm:$0xff] }
0x1dbc   :  { %v5135_v55 = vsel %vm2295_vm5, %v5131_v2, %v8021_v27  ;;  %v5136_v53 = vsel %vm2295_vm5, %v5132_v52, %v8022_v62  ;;  %v5350_v62 = vld [vmem:[#allocation21 + $0x2b0] sm:$0xff]  ;;  %v7670_v27 = vpack.c.bf16 %v5348_v24, %v5344_v44  ;;  %v5373_v4 = vld [vmem:[#allocation21 + $0x368] sm:$0xff]  ;;  %v5372_v44 = vld [vmem:[#allocation21 + $0x360] sm:$0xff] }
0x1dbd   :  { %v5139_v9 = vsel %vm2300_vm6, %v5135_v55, %v8026_v18  ;;  %v5140_v28 = vsel %vm2300_vm6, %v5136_v53, %v8027_v43  ;;  %v7702_v26 = vpack.c.bf16 %v5350_v62, %v5346_v60  ;;  %v7682_v24 = vpack.c.bf16 %v5372_v44, %v5368_v5  ;;  %v5370_v60 = vld [vmem:[#allocation21 + $0x350] sm:$0xff] }
0x1dbe   :  { %7142 = vmatprep.mubr.f32.mxu0 %v5139_v9  ;;  %v5374_v62 = vld [vmem:[#allocation21 + $0x370] sm:$0xff] }
0x1dbf   :  { %7143 = vmatmul.mubr.f32.gmra.mrb[58].mxu0 %v5140_v28 }
0x1dc0   :  { %5547 = vmatprep.mubr.f32.mxu0 %v8782_v29 }
0x1e8d   :  { %v7141_v56 = vpop.f32.mrb[56].mxu0 }
0x1e8e   :  { %v5252_v47 = vadd.f32 %v7141_v56, %v6343_v42  ;;  %v5226_v31 = vpop.f32.mrb[57].mxu0 }
0x1e8f   :  { %v5251_v25 = vadd.f32 %v6343_v42, %v5226_v31 }
0x1e90   :  { %v9886_v0 = vadd.f32 %v5252_v47, %v9601_v63  ;;  %v5333_v63 = vld [vmem:[#allocation21 + $0x228] sm:$0xff] }
0x1e91   :  { %v9889_v46 = vadd.f32 %v5251_v25, %v9597_v10  ;;  %v5329_v10 = vld [vmem:[#allocation21 + $0x208] sm:$0xff] }
0x1e92   :  { %5265 = vadd.xlane.f32.xlu1 %v9886_v0  ;;  %v7144_v61 = vpop.f32.mrb[58].mxu0  ;;  %v7660_v20 = vpack.c.bf16 %v5333_v63, %v5329_v10  ;;  %v5357_v10 = vld [vmem:[#allocation21 + $0x2e8] sm:$0xff]  ;;  %v5355_v63 = vld [vmem:[#allocation21 + $0x2d8] sm:$0xff] }
0x1e93   :  { %5263 = vadd.xlane.f32.xlu0 %v9889_v46  ;;  %v5236_v59 = vpop.f32.mrb[59].mxu0  ;;  %v5254_v34 = vadd.f32 %v7144_v61, %v6343_v42 }
0x1e94   :  { %v5253_v23 = vadd.f32 %v6343_v42, %v5236_v59  ;;  %7661 = vmatprep.subr.bf16.mxu1 %v7660_v20  ;;  %v5359_v20 = vld [vmem:[#allocation21 + $0x2f8] sm:$0xff] }
0x1e95   :  { %v9898_v54 = vadd.f32 %v5254_v34, %v9609_v39  ;;  %v5343_v39 = vld [vmem:[#allocation21 + $0x278] sm:$0xff]  ;;  %7663 = vmatpush1.bf16.msra.mxu1 %v7662_v13  ;;  %v5353_v34 = vld [vmem:[#allocation21 + $0x2c8] sm:$0xff]  ;;  %v7704_v1 = vpack.c.bf16 %v5359_v20, %v5355_v63  ;;  %v5354_v13 = vld [vmem:[#allocation21 + $0x2d0] sm:$0xff] }
0x1e96   :  { %v9894_v33 = vadd.f32 %v5253_v23, %v9605_v3  ;;  %v5337_v3 = vld [vmem:[#allocation21 + $0x248] sm:$0xff]  ;;  %v7696_v7 = vpack.c.bf16 %v5343_v39, %v5339_v51  ;;  %v7672_v32 = vpack.c.bf16 %v5357_v10, %v5353_v34  ;;  %v7706_v49 = vpack.c.bf16 %v5358_v16, %v5354_v13  ;;  %v5367_v39 = vld [vmem:[#allocation21 + $0x338] sm:$0xff]  ;;  %v5384_v20 = vld [vmem:[#allocation21 + $0x3c0] sm:$0xff] }
0x1e97   :  { %v7664_v36 = vpack.c.bf16 %v5341_v21, %v5337_v3  ;;  %v5361_v3 = vld [vmem:[#allocation21 + $0x308] sm:$0xff]  ;;  %v5363_v21 = vld [vmem:[#allocation21 + $0x318] sm:$0xff]  ;;  %v5390_v13 = vld [vmem:[#allocation21 + $0x3f0] sm:$0xff] }
0x1e98   :  { %5267 = vadd.xlane.f32.xlu0 %v9894_v33  ;;  %7697 = vmatprep.subr.bf16.mxu0 %v7696_v7  ;;  %v7676_v51 = vpack.c.bf16 %v5365_v48, %v5361_v3  ;;  %v5364_v7 = vld [vmem:[#allocation21 + $0x320] sm:$0xff]  ;;  %v7708_v37 = vpack.c.bf16 %v5367_v39, %v5363_v21  ;;  %v5389_v34 = vld [vmem:[#allocation21 + $0x3e8] sm:$0xff]  ;;  %v5387_v10 = vld [vmem:[#allocation21 + $0x3d8] sm:$0xff] }
0x1e99   :  { %7665 = vmatprep.subr.bf16.mxu1 %v7664_v36  ;;  %7699 = vmatpush1.bf16.msra.mxu0 %v7698_v8  ;;  %v5360_v36 = vld [vmem:[#allocation21 + $0x300] sm:$0xff]  ;;  %v5371_v8 = vld [vmem:[#allocation21 + $0x358] sm:$0xff] }
0x1e9a   :  { %7667 = vmatpush1.bf16.msra.mxu1 %v7666_v50  ;;  %7701 = vmatprep.subr.bf16.mxu0 %v7700_v30  ;;  %v7678_v41 = vpack.c.bf16 %v5364_v7, %v5360_v36  ;;  %v5366_v50 = vld [vmem:[#allocation21 + $0x330] sm:$0xff]  ;;  %v7712_v30 = vpack.c.bf16 %v5375_v35, %v5371_v8  ;;  %v6345_v35 = vld [vmem:[#allocation19 + $0x1] ss:$0 sm:$0xff] }
0x1e9b   :  { %7669 = vmatprep.subr.bf16.mxu1 %v7668_v6  ;;  %v7710_v17 = vpack.c.bf16 %v5366_v50, %v5362_v58  ;;  %v7680_v6 = vpack.c.bf16 %v5373_v4, %v5369_v45  ;;  %v6344_v4 = vld [vmem:[#allocation18 + $0x1] ss:$0 sm:$0xff] }
0x1e9c   :  { %5269 = vadd.xlane.f32.xlu0 %v9898_v54 }
0x1e9d   :  { %7703 = vmatpush1.bf16.msra.mxu0 %v7702_v26  ;;  %v5377_v26 = vld [vmem:[#allocation21 + $0x388] sm:$0xff] }
0x1e9e   :  { %7671 = vmatpush1.bf16.msra.mxu1 %v7670_v27  ;;  %7705 = vmatprep.subr.bf16.mxu0 %v7704_v1  ;;  %v7714_v27 = vpack.c.bf16 %v5374_v62, %v5370_v60  ;;  %v7690_v1 = vpack.c.bf16 %v5388_v22, %v5384_v20  ;;  %v5789_v20 = vld [vmem:[#allocation24 + $0x398] sm:$0xff]  ;;  %v5740_v22 = vld [vmem:[#allocation24 + $0x210] sm:$0xff] }
0x1e9f   :  { %7673 = vmatprep.subr.bf16.mxu1 %v7672_v32  ;;  %v5391_v32 = vld [vmem:[#allocation21 + $0x3f8] sm:$0xff] }
0x1ea0   :  { %v7720_v38 = vpack.c.bf16 %v5391_v32, %v5387_v10  ;;  %v5757_v10 = vld [vmem:[#allocation24 + $0x298] sm:$0xff] }
0x1ea1   :  { %7707 = vmatpush1.bf16.msra.mxu0 %v7706_v49 }
0x1ea2   :  { %7675 = vmatpush1.bf16.msra.mxu1 %v7674_v19  ;;  %7709 = vmatprep.subr.bf16.mxu0 %v7708_v37  ;;  %v5386_v19 = vld [vmem:[#allocation21 + $0x3d0] sm:$0xff] }
0x1ea3   :  { %7677 = vmatprep.subr.bf16.mxu1 %v7676_v51  ;;  %v7722_v16 = vpack.c.bf16 %v5390_v13, %v5386_v19  ;;  %v5772_v13 = vld [vmem:[#allocation24 + $0x310] sm:$0xff] }
0x1ea5   :  { %7711 = vmatpush1.bf16.msra.mxu0 %v7710_v17 }
0x1ea6   :  { %7679 = vmatpush1.bf16.msra.mxu1 %v7678_v41  ;;  %7713 = vmatprep.subr.bf16.mxu0 %v7712_v30 }
0x1ea7   :  { %7681 = vmatprep.subr.bf16.mxu1 %v7680_v6 }
0x1ea9   :  { %7715 = vmatpush1.bf16.msra.mxu0 %v7714_v27 }
0x1eaa   :  { %7683 = vmatpush1.bf16.msra.mxu1 %v7682_v24 }
0x1f1f   :  { %v5266_v43 = vpop.xlane.xlu1 %5265 }
0x1f20   :  { %v5272_v18 = vmul.f32 0.0078125, %v5266_v43  ;;  %v5264_v2 = vpop.xlane.xlu0 %5263  ;;  %v5381_v43 = vld [vmem:[#allocation21 + $0x3a8] sm:$0xff] }
0x1f21   :  { %v5271_v52 = vmul.f32 0.0078125, %v5264_v2  ;;  %v7684_v2 = vpack.c.bf16 %v5381_v43, %v5377_v26 }
0x1f22   :  { %v9902_v55 = vsub.f32 %v9886_v0, %v5272_v18  ;;  %v5379_v18 = vld [vmem:[#allocation21 + $0x398] sm:$0xff] }
0x1f23   :  { %v9905_v53 = vsub.f32 %v9889_v46, %v5271_v52  ;;  %v5383_v52 = vld [vmem:[#allocation21 + $0x3b8] sm:$0xff]  ;;  %7685 = vmatprep.subr.bf16.mxu1 %v7684_v2  ;;  %v5755_v2 = vld [vmem:[#allocation24 + $0x288] sm:$0xff] }
0x1f24   :  { %v5280_v9 = vmul.f32 %v9902_v55, %v9902_v55 }
0x1f25   :  { %v5268_v28 = vpop.xlane.xlu0 %5267  ;;  %v5279_v42 = vmul.f32 %v9905_v53, %v9905_v53 }
0x1f26   :  { %v5273_v56 = vmul.f32 0.0078125, %v5268_v28  ;;  %5285 = vadd.xlane.f32.xlu1 %v5280_v9  ;;  %v5376_v9 = vld [vmem:[#allocation21 + $0x380] sm:$0xff] }
0x1f27   :  { %5283 = vadd.xlane.f32.xlu0 %v5279_v42  ;;  %v5380_v28 = vld [vmem:[#allocation21 + $0x3a0] sm:$0xff]  ;;  %v7716_v42 = vpack.c.bf16 %v5383_v52, %v5379_v18  ;;  %v5754_v18 = vld [vmem:[#allocation24 + $0x280] sm:$0xff] }
0x1f28   :  { %v9912_v47 = vsub.f32 %v9894_v33, %v5273_v56  ;;  %v7686_v56 = vpack.c.bf16 %v5380_v28, %v5376_v9  ;;  %v7724_v52 = vpack.c.bf16 %v5755_v2, %v5754_v18  ;;  %v5787_v9 = vld [vmem:[#allocation24 + $0x388] sm:$0xff]  ;;  %v5738_v28 = vld [vmem:[#allocation24 + $0x200] sm:$0xff] }
0x1f29   :  { %v5270_v31 = vpop.xlane.xlu0 %5269  ;;  %7717 = vmatprep.subr.bf16.mxu0 %v7716_v42  ;;  %v5739_v42 = vld [vmem:[#allocation24 + $0x208] sm:$0xff]  ;;  %v5746_v18 = vld [vmem:[#allocation24 + $0x240] sm:$0xff] }
0x1f2a   :  { %v5274_v25 = vmul.f32 0.0078125, %v5270_v31  ;;  %v5281_v61 = vmul.f32 %v9912_v47, %v9912_v47  ;;  %v5378_v31 = vld [vmem:[#allocation21 + $0x390] sm:$0xff]  ;;  %7687 = vmatpush1.bf16.msra.mxu1 %v7686_v56 }
0x1f2b   :  { %v5747_v2 = vld [vmem:[#allocation24 + $0x248] sm:$0xff] }
0x1f2c   :  { %v9917_v59 = vsub.f32 %v9898_v54, %v5274_v25  ;;  %5287 = vadd.xlane.f32.xlu0 %v5281_v61  ;;  %v5382_v25 = vld [vmem:[#allocation21 + $0x3b0] sm:$0xff] }
0x1f2d   :  { %v7718_v61 = vpack.c.bf16 %v5382_v25, %v5378_v31  ;;  %v7726_v31 = vpack.c.bf16 %v5739_v42, %v5738_v28  ;;  %v5770_v25 = vld [vmem:[#allocation24 + $0x300] sm:$0xff]  ;;  %v5779_v28 = vld [vmem:[#allocation24 + $0x348] sm:$0xff] }
0x1f2e   :  { %v5282_v23 = vmul.f32 %v9917_v59, %v9917_v59 }
0x1f2f   :  { %7719 = vmatpush1.bf16.msra.mxu0 %v7718_v61  ;;  %v5771_v61 = vld [vmem:[#allocation24 + $0x308] sm:$0xff] }
0x1f30   :  { %5289 = vadd.xlane.f32.xlu1 %v5282_v23  ;;  %v5385_v23 = vld [vmem:[#allocation21 + $0x3c8] sm:$0xff]  ;;  %7721 = vmatprep.subr.bf16.mxu0 %v7720_v38  ;;  %v5741_v38 = vld [vmem:[#allocation24 + $0x218] sm:$0xff] }
0x1f31   :  { %v7688_v63 = vpack.c.bf16 %v5389_v34, %v5385_v23  ;;  %v7758_v23 = vpack.c.bf16 %v5771_v61, %v5770_v25  ;;  %v5756_v34 = vld [vmem:[#allocation24 + $0x290] sm:$0xff]  ;;  %v7730_v19 = vpack.c.bf16 %v5741_v38, %v5740_v22  ;;  %v5781_v22 = vld [vmem:[#allocation24 + $0x358] sm:$0xff] }
0x1f32   :  { %v7728_v32 = vpack.c.bf16 %v5757_v10, %v5756_v34  ;;  %v5796_v25 = vld [vmem:[#allocation24 + $0x3d0] sm:$0xff]  ;;  %v5749_v10 = vld [vmem:[#allocation24 + $0x258] sm:$0xff] }
0x1f33   :  { %7689 = vmatprep.subr.bf16.mxu1 %v7688_v63  ;;  %7723 = vmatpush1.bf16.msra.mxu0 %v7722_v16  ;;  %v5788_v63 = vld [vmem:[#allocation24 + $0x390] sm:$0xff]  ;;  %v5773_v16 = vld [vmem:[#allocation24 + $0x318] sm:$0xff] }
0x1f34   :  { %7691 = vmatpush1.bf16.msra.mxu1 %v7690_v1  ;;  %v7760_v1 = vpack.c.bf16 %v5789_v20, %v5788_v63  ;;  %v5748_v34 = vld [vmem:[#allocation24 + $0x250] sm:$0xff] }
0x1f35   :  { %7725 = vmatprep.subr.bf16.mxu1 %v7724_v52  ;;  %v7742_v52 = vpack.c.bf16 %v5747_v2, %v5746_v18  ;;  %v5780_v20 = vld [vmem:[#allocation24 + $0x350] sm:$0xff] }
0x1f36   :  { %v7778_v38 = vpack.c.bf16 %v5781_v22, %v5780_v20 }
0x1fb3   :  { %v5286_v49 = vpop.xlane.xlu1 %5285 }
0x1fb4   :  { %v5292_v3 = vmul.f32 0.0078125, %v5286_v49  ;;  %v5284_v48 = vpop.xlane.xlu0 %5283  ;;  %v7762_v49 = vpack.c.bf16 %v5773_v16, %v5772_v13  ;;  %v5798_v13 = vld [vmem:[#allocation24 + $0x3e0] sm:$0xff] }
0x1fb5   :  { %v5291_v21 = vmul.f32 0.0078125, %v5284_v48  ;;  %v5759_v48 = vld [vmem:[#allocation24 + $0x2a8] sm:$0xff] }
0x1fb6   :  { %v5296_v51 = vadd.f32 1e-05, %v5292_v3  ;;  %v5758_v3 = vld [vmem:[#allocation24 + $0x2a0] sm:$0xff] }
0x1fb7   :  { %v5295_v39 = vadd.f32 1e-05, %v5291_v21  ;;  %v5790_v21 = vld [vmem:[#allocation24 + $0x3a0] sm:$0xff] }
0x1fb8   :  { %8244 = vrsqrt.f32 %v5296_v51  ;;  %v7732_v51 = vpack.c.bf16 %v5759_v48, %v5758_v3  ;;  %v5750_v3 = vld [vmem:[#allocation24 + $0x260] sm:$0xff]  ;;  %v5751_v48 = vld [vmem:[#allocation24 + $0x268] sm:$0xff] }
0x1fb9   :  { %8246 = vrsqrt.f32 %v5295_v39  ;;  %v5288_v36 = vpop.xlane.xlu0 %5287  ;;  %v5791_v39 = vld [vmem:[#allocation24 + $0x3a8] sm:$0xff] }
0x1fba   :  { %v5293_v7 = vmul.f32 0.0078125, %v5288_v36  ;;  %v7764_v36 = vpack.c.bf16 %v5791_v39, %v5790_v21  ;;  %v5782_v39 = vld [vmem:[#allocation24 + $0x360] sm:$0xff] }
0x1fbc   :  { %v5297_v37 = vadd.f32 1e-05, %v5293_v7  ;;  %v5742_v7 = vld [vmem:[#allocation24 + $0x220] sm:$0xff] }
0x1fbd   :  { %v5290_v41 = vpop.xlane.xlu1 %5289 }
0x1fbe   :  { %8248 = vrsqrt.f32 %v5297_v37  ;;  %v5294_v58 = vmul.f32 0.0078125, %v5290_v41  ;;  %v5743_v37 = vld [vmem:[#allocation24 + $0x228] sm:$0xff]  ;;  %v5774_v41 = vld [vmem:[#allocation24 + $0x320] sm:$0xff] }
0x1fc0   :  { %v5298_v50 = vadd.f32 1e-05, %v5294_v58  ;;  %v7734_v58 = vpack.c.bf16 %v5743_v37, %v5742_v7  ;;  %v5768_v37 = vld [vmem:[#allocation24 + $0x2f0] sm:$0xff] }
0x1fc2   :  { %v8245_v17 = vpop.eup %8244  ;;  %8250 = vrsqrt.f32 %v5298_v50  ;;  %v5775_v50 = vld [vmem:[#allocation24 + $0x328] sm:$0xff] }
0x1fc3   :  { %v8247_v45 = vpop.eup %8246  ;;  %v5304_v6 = vmul.f32 %v8245_v17, %v9902_v55  ;;  %v7766_v17 = vpack.c.bf16 %v5775_v50, %v5774_v41  ;;  %v5769_v41 = vld [vmem:[#allocation24 + $0x2f8] sm:$0xff] }
0x1fc4   :  { %v5303_v8 = vmul.f32 %v8247_v45, %v9905_v53  ;;  %v5760_v45 = vld [vmem:[#allocation24 + $0x2b0] sm:$0xff]  ;;  %v7752_v50 = vpack.c.bf16 %v5769_v41, %v5768_v37 }
0x1fc5   :  { %v5314_v24 = vmul.f32 %v6344_v4, %v5304_v6 }
0x1fc6   :  { %v5313_v5 = vmul.f32 %v6344_v4, %v5303_v8  ;;  %v5792_v8 = vld [vmem:[#allocation24 + $0x3b0] sm:$0xff] }
0x1fc7   :  { %v5324_v27 = vadd.f32 %v6345_v35, %v5314_v24 }
0x1fc8   :  { %v8249_v44 = vpop.eup %8248  ;;  %v5323_v30 = vadd.f32 %v6345_v35, %v5313_v5  ;;  %v5744_v5 = vld [vmem:[#allocation24 + $0x230] sm:$0xff] }
0x1fc9   :  { %v5305_v60 = vmul.f32 %v8249_v44, %v9912_v47  ;;  %v5745_v44 = vld [vmem:[#allocation24 + $0x238] sm:$0xff] }
0x1fca   :  { %5459 = vmatmul.mubr.f32.vlgmr.msra.gmra.mrb[68].mxu1 %v5323_v30  ;;  %5548 = vmatmul.mubr.f32.vlgmr.msra.gmra.mrb[60].mxu0 %v5323_v30  ;;  %v7738_v24 = vpack.c.bf16 %v5745_v44, %v5744_v5  ;;  %v5785_v5 = vld [vmem:[#allocation24 + $0x378] sm:$0xff] }
0x1fcb   :  { %5464 = vmatprep.mubr.f32.mxu1 %v8782_v29  ;;  %5553 = vmatprep.mubr.f32.mxu0 %v8782_v29  ;;  %v5315_v26 = vmul.f32 %v6344_v4, %v5305_v60  ;;  %v5776_v60 = vld [vmem:[#allocation24 + $0x330] sm:$0xff] }
0x1fcc   :  { %v8251_v62 = vpop.eup %8250  ;;  %7727 = vmatpush3.bf16.msra.mxu1 %v7726_v31  ;;  %v5765_v31 = vld [vmem:[#allocation24 + $0x2d8] sm:$0xff] }
0x1fcd   :  { %v5306_v53 = vmul.f32 %v8251_v62, %v9917_v59  ;;  %v5325_v55 = vadd.f32 %v6345_v35, %v5315_v26  ;;  %v5786_v59 = vld [vmem:[#allocation24 + $0x380] sm:$0xff]  ;;  %7729 = vmatprep.subr.bf16.mxu1 %v7728_v32  ;;  %v5777_v62 = vld [vmem:[#allocation24 + $0x338] sm:$0xff]  ;;  %v7746_v32 = vpack.c.bf16 %v5749_v10, %v5748_v34 }
0x1fce   :  { %5465 = vmatmul.mubr.f32.gmra.mrb[70].mxu1 %v5324_v27  ;;  %5554 = vmatmul.mubr.f32.gmra.mrb[62].mxu0 %v5324_v27  ;;  %v7756_v56 = vpack.c.bf16 %v5787_v9, %v5786_v59  ;;  %v7770_v27 = vpack.c.bf16 %v5777_v62, %v5776_v60  ;;  %v5762_v26 = vld [vmem:[#allocation24 + $0x2c0] sm:$0xff] }
0x1fcf   :  { %5470 = vmatprep.mubr.f32.mxu1 %v8782_v29  ;;  %5559 = vmatprep.mubr.f32.mxu0 %v8782_v29  ;;  %v5316_v43 = vmul.f32 %v6344_v4, %v5306_v53  ;;  %v5761_v4 = vld [vmem:[#allocation24 + $0x2b8] sm:$0xff]  ;;  %v5763_v53 = vld [vmem:[#allocation24 + $0x2c8] sm:$0xff]  ;;  %v5778_v9 = vld [vmem:[#allocation24 + $0x340] sm:$0xff] }
0x1fd0   :  { %7757 = vmatprep.subr.bf16.mxu0 %v7756_v56  ;;  %7731 = vmatpush3.bf16.msra.mxu1 %v7730_v19  ;;  %v7736_v6 = vpack.c.bf16 %v5761_v4, %v5760_v45  ;;  %v7774_v42 = vpack.c.bf16 %v5779_v28, %v5778_v9  ;;  %v5764_v56 = vld [vmem:[#allocation24 + $0x2d0] sm:$0xff]  ;;  %v5767_v19 = vld [vmem:[#allocation24 + $0x2e8] sm:$0xff]  ;;  %v5753_v4 = vld [vmem:[#allocation24 + $0x278] sm:$0xff] }
0x1fd1   :  { %v5326_v47 = vadd.f32 %v6345_v35, %v5316_v43  ;;  %7759 = vmatpush3.bf16.msra.mxu0 %v7758_v23  ;;  %7733 = vmatprep.subr.bf16.mxu1 %v7732_v51  ;;  %v5793_v35 = vld [vmem:[#allocation24 + $0x3b8] sm:$0xff]  ;;  %v7740_v43 = vpack.c.bf16 %v5763_v53, %v5762_v26  ;;  %v7744_v61 = vpack.c.bf16 %v5765_v31, %v5764_v56  ;;  %v5752_v45 = vld [vmem:[#allocation24 + $0x270] sm:$0xff] }
0x1fd2   :  { %5471 = vmatmul.mubr.f32.gmra.mrb[72].mxu1 %v5325_v55  ;;  %5560 = vmatmul.mubr.f32.gmra.mrb[64].mxu0 %v5325_v55  ;;  %v7768_v30 = vpack.c.bf16 %v5793_v35, %v5792_v8  ;;  %v5794_v55 = vld [vmem:[#allocation24 + $0x3c0] sm:$0xff]  ;;  %v5797_v23 = vld [vmem:[#allocation24 + $0x3d8] sm:$0xff]  ;;  %v7750_v51 = vpack.c.bf16 %v5751_v48, %v5750_v3  ;;  %v5784_v35 = vld [vmem:[#allocation24 + $0x370] sm:$0xff] }
0x1fd3   :  { %5476 = vmatprep.mubr.f32.mxu1 %v8782_v29  ;;  %5565 = vmatprep.mubr.f32.mxu0 %v8782_v29  ;;  %v7776_v63 = vpack.c.bf16 %v5797_v23, %v5796_v25  ;;  %v7786_v44 = vpack.c.bf16 %v5785_v5, %v5784_v35 }
0x1fd4   :  { %7761 = vmatprep.subr.bf16.mxu0 %v7760_v1  ;;  %7735 = vmatpush3.bf16.msra.mxu1 %v7734_v58  ;;  %v5766_v1 = vld [vmem:[#allocation24 + $0x2e0] sm:$0xff]  ;;  %v5800_v58 = vld [vmem:[#allocation24 + $0x3f0] sm:$0xff] }
0x1fd5   :  { %7763 = vmatpush3.bf16.msra.mxu0 %v7762_v49  ;;  %7737 = vmatprep.subr.bf16.mxu1 %v7736_v6  ;;  %v7748_v16 = vpack.c.bf16 %v5767_v19, %v5766_v1  ;;  %v5799_v49 = vld [vmem:[#allocation24 + $0x3e8] sm:$0xff]  ;;  %v7754_v6 = vpack.c.bf16 %v5753_v4, %v5752_v45 }
0x1fd6   :  { %5477 = vmatmul.mubr.f32.gmra.mrb[74].mxu1 %v5326_v47  ;;  %5566 = vmatmul.mubr.f32.gmra.mrb[66].mxu0 %v5326_v47  ;;  %v5795_v47 = vld [vmem:[#allocation24 + $0x3c8] sm:$0xff]  ;;  %v7780_v21 = vpack.c.bf16 %v5799_v49, %v5798_v13 }
0x1fd7   :  { %7765 = vmatprep.subr.bf16.mxu0 %v7764_v36  ;;  %v7772_v59 = vpack.c.bf16 %v5795_v47, %v5794_v55  ;;  %v5783_v36 = vld [vmem:[#allocation24 + $0x368] sm:$0xff] }
0x1fd8   :  { %7739 = vmatpush3.bf16.msra.mxu1 %v7738_v24  ;;  %v7782_v7 = vpack.c.bf16 %v5783_v36, %v5782_v39 }
0x1fd9   :  { %7767 = vmatpush3.bf16.msra.mxu0 %v7766_v17  ;;  %7741 = vmatprep.subr.bf16.mxu1 %v7740_v43  ;;  %v5801_v17 = vld [vmem:[#allocation24 + $0x3f8] sm:$0xff] }
0x1fda   :  { %7769 = vmatprep.subr.bf16.mxu0 %v7768_v30  ;;  %v7784_v8 = vpack.c.bf16 %v5801_v17, %v5800_v58  ;;  %v5393_v30 = vld [vmem:[#allocation22 + $0x4] sm:$0xf] }
0x1fdb   :  { %v9932_v24 = vrot.slane %v5393_v30, %v9185_v12  ;;  %v9935_v60 = vrot.slane %v5393_v30, %v9189_v14  ;;  %v9938_v62 = vrot.slane %v5393_v30, %v9192_v15 }
0x1fdc   :  { %7743 = vmatpush3.bf16.msra.mxu1 %v7742_v52 }
0x1fdd   :  { %7771 = vmatpush3.bf16.msra.mxu0 %v7770_v27  ;;  %7745 = vmatprep.subr.bf16.mxu1 %v7744_v61  ;;  %v9942_v27 = vrot.slane %v5393_v30, %v2745_v40 }
0x1fde   :  { %7773 = vmatprep.subr.bf16.mxu0 %v7772_v59 }
0x1fe0   :  { %7747 = vmatpush3.bf16.msra.mxu1 %v7746_v32 }
0x1fe1   :  { %7775 = vmatpush3.bf16.msra.mxu0 %v7774_v42  ;;  %7749 = vmatprep.subr.bf16.mxu1 %v7748_v16 }
0x1fe2   :  { %7777 = vmatprep.subr.bf16.mxu0 %v7776_v63 }
0x1fe4   :  { %7751 = vmatpush3.bf16.msra.mxu1 %v7750_v51 }
0x1fe5   :  { %7779 = vmatpush3.bf16.msra.mxu0 %v7778_v38  ;;  %7753 = vmatprep.subr.bf16.mxu1 %v7752_v50 }
0x1fe6   :  { %7781 = vmatprep.subr.bf16.mxu0 %v7780_v21 }
0x1fe8   :  { %7755 = vmatpush3.bf16.msra.mxu1 %v7754_v6 }
0x1fe9   :  { %7783 = vmatpush3.bf16.msra.mxu0 %v7782_v7 }
0x1fea   :  { %7785 = vmatprep.subr.bf16.mxu0 %v7784_v8 }
0x1fed   :  { %7787 = vmatpush3.bf16.msra.mxu0 %v7786_v44 }
0x209d   :  { %v5460_v26 = vpop.f32.mrb[68].mxu1  ;;  %v5549_v53 = vpop.f32.mrb[60].mxu0 }
0x209e   :  { %v9945_v55 = vadd.f32 %v9932_v24, %v5460_v26  ;;  %v9948_v43 = vadd.f32 %v9935_v60, %v5549_v53  ;;  %v5462_v47 = vpop.f32.mrb[69].mxu1  ;;  %v5551_v18 = vpop.f32.mrb[61].mxu0 }
0x209f   :  { %v9951_v14 = vadd.f32 %v9938_v62, %v5462_v47  ;;  %v9954_v2 = vadd.f32 %v9942_v27, %v5551_v18 }
0x20a0   :  { %v6346_v11 = vmul.f32 -1.702, %v9945_v55  ;;  %v6348_v40 = vmul.f32 -1.702, %v9948_v43 }
0x20a1   :  { %v6347_v59 = vmul.f32 -1.702, %v9951_v14  ;;  %v6349_v52 = vmul.f32 -1.702, %v9954_v2  ;;  %v5466_v9 = vpop.f32.mrb[70].mxu1  ;;  %v5555_v28 = vpop.f32.mrb[62].mxu0 }
0x20a2   :  { %v5641_v42 = vmul.f32 1.442695, %v6346_v11  ;;  %v5645_v56 = vmul.f32 1.442695, %v6348_v40  ;;  %v9961_v31 = vadd.f32 %v9932_v24, %v5466_v9  ;;  %v9964_v25 = vadd.f32 %v9935_v60, %v5555_v28  ;;  %v5468_v61 = vpop.f32.mrb[71].mxu1  ;;  %v5557_v23 = vpop.f32.mrb[63].mxu0 }
0x20a3   :  { %v5643_v34 = vmul.f32 1.442695, %v6347_v59  ;;  %v5647_v10 = vmul.f32 1.442695, %v6349_v52  ;;  %v9967_v63 = vadd.f32 %v9938_v62, %v5468_v61  ;;  %v9970_v32 = vadd.f32 %v9942_v27, %v5557_v23 }
0x20a4   :  { %8252 = vpow2.f32 %v5641_v42  ;;  %v6350_v20 = vmul.f32 -1.702, %v9961_v31  ;;  %v6352_v22 = vmul.f32 -1.702, %v9964_v25 }
0x20a5   :  { %8254 = vpow2.f32 %v5645_v56  ;;  %v6351_v38 = vmul.f32 -1.702, %v9967_v63  ;;  %v6353_v1 = vmul.f32 -1.702, %v9970_v32  ;;  %v5472_v19 = vpop.f32.mrb[72].mxu1  ;;  %v5561_v13 = vpop.f32.mrb[64].mxu0 }
0x20a6   :  { %8256 = vpow2.f32 %v5643_v34  ;;  %v5649_v16 = vmul.f32 1.442695, %v6350_v20  ;;  %v5653_v49 = vmul.f32 1.442695, %v6352_v22  ;;  %v9977_v3 = vadd.f32 %v9932_v24, %v5472_v19  ;;  %v5474_v48 = vpop.f32.mrb[73].mxu1  ;;  %v5563_v21 = vpop.f32.mrb[65].mxu0 }
0x20a7   :  { %8258 = vpow2.f32 %v5647_v10  ;;  %v5651_v51 = vmul.f32 1.442695, %v6351_v38  ;;  %v5655_v39 = vmul.f32 1.442695, %v6353_v1  ;;  %v9980_v36 = vadd.f32 %v9935_v60, %v5561_v13 }
0x20a8   :  { %8260 = vpow2.f32 %v5649_v16  ;;  %v6354_v7 = vmul.f32 -1.702, %v9977_v3  ;;  %v9984_v37 = vadd.f32 %v9938_v62, %v5474_v48  ;;  %v9987_v41 = vadd.f32 %v9942_v27, %v5563_v21 }
0x20a9   :  { %8262 = vpow2.f32 %v5653_v49  ;;  %v6356_v58 = vmul.f32 -1.702, %v9980_v36  ;;  %v5478_v50 = vpop.f32.mrb[74].mxu1  ;;  %v5567_v17 = vpop.f32.mrb[66].mxu0 }
0x20aa   :  { %8264 = vpow2.f32 %v5651_v51  ;;  %v5657_v45 = vmul.f32 1.442695, %v6354_v7  ;;  %v6355_v4 = vmul.f32 -1.702, %v9984_v37  ;;  %v6357_v8 = vmul.f32 -1.702, %v9987_v41 }
0x20ab   :  { %8266 = vpow2.f32 %v5655_v39  ;;  %v5661_v6 = vmul.f32 1.442695, %v6356_v58  ;;  %v5480_v35 = vpop.f32.mrb[75].mxu1  ;;  %v5569_v5 = vpop.f32.mrb[67].mxu0  ;;  %v9993_v52 = vadd.f32 %v9932_v24, %v5478_v50  ;;  %v9996_v42 = vadd.f32 %v9935_v60, %v5567_v17 }
0x20ac   :  { %8268 = vpow2.f32 %v5657_v45  ;;  %v5659_v44 = vmul.f32 1.442695, %v6355_v4  ;;  %v5663_v30 = vmul.f32 1.442695, %v6357_v8  ;;  %v9999_v23 = vadd.f32 %v9938_v62, %v5480_v35 }
0x20ad   :  { %8270 = vpow2.f32 %v5661_v6  ;;  %v10002_v20 = vadd.f32 %v9942_v27, %v5569_v5  ;;  %v6358_v38 = vmul.f32 -1.702, %v9993_v52  ;;  %v6360_v19 = vmul.f32 -1.702, %v9996_v42 }
0x20ae   :  { %v8253_v26 = vpop.eup %8252  ;;  %8272 = vpow2.f32 %v5659_v44  ;;  %v6359_v16 = vmul.f32 -1.702, %v9999_v23 }
0x20af   :  { %v8255_v53 = vpop.eup %8254  ;;  %v5673_v47 = vadd.f32 1.0, %v8253_v26  ;;  %8274 = vpow2.f32 %v5663_v30  ;;  %v6361_v27 = vmul.f32 -1.702, %v10002_v20  ;;  %v5665_v39 = vmul.f32 1.442695, %v6358_v38 }
0x20b0   :  { %v8257_v18 = vpop.eup %8256  ;;  %v5675_v11 = vadd.f32 1.0, %v8255_v53  ;;  %v5669_v58 = vmul.f32 1.442695, %v6360_v19  ;;  %v5667_v17 = vmul.f32 1.442695, %v6359_v16 }
0x20b1   :  { %v8259_v40 = vpop.eup %8258  ;;  %8276 = vrcp.f32 %v5673_v47  ;;  %v5674_v59 = vadd.f32 1.0, %v8257_v18  ;;  %v5671_v4 = vmul.f32 1.442695, %v6361_v27 }
0x20b2   :  { %v8261_v9 = vpop.eup %8260  ;;  %8278 = vrcp.f32 %v5675_v11  ;;  %v5676_v28 = vadd.f32 1.0, %v8259_v40 }
0x20b3   :  { %v8263_v56 = vpop.eup %8262  ;;  %8280 = vrcp.f32 %v5674_v59  ;;  %v5677_v61 = vadd.f32 1.0, %v8261_v9 }
0x20b4   :  { %v8265_v34 = vpop.eup %8264  ;;  %8282 = vrcp.f32 %v5676_v28  ;;  %v5679_v10 = vadd.f32 1.0, %v8263_v56 }
0x20b5   :  { %v8267_v24 = vpop.eup %8266  ;;  %8284 = vrcp.f32 %v5677_v61  ;;  %v5678_v22 = vadd.f32 1.0, %v8265_v34 }
0x20b6   :  { %v8269_v1 = vpop.eup %8268  ;;  %8286 = vrcp.f32 %v5679_v10  ;;  %v5680_v60 = vadd.f32 1.0, %v8267_v24 }
0x20b7   :  { %v8271_v13 = vpop.eup %8270  ;;  %8288 = vrcp.f32 %v5678_v22  ;;  %v5681_v62 = vadd.f32 1.0, %v8269_v1 }
0x20b8   :  { %v8273_v49 = vpop.eup %8272  ;;  %8290 = vrcp.f32 %v5680_v60  ;;  %v5683_v48 = vadd.f32 1.0, %v8271_v13 }
0x20b9   :  { %v8275_v21 = vpop.eup %8274  ;;  %8292 = vrcp.f32 %v5681_v62  ;;  %v5682_v51 = vadd.f32 1.0, %v8273_v49 }
0x20ba   :  { %8294 = vrcp.f32 %v5683_v48  ;;  %v5684_v7 = vadd.f32 1.0, %v8275_v21 }
0x20bb   :  { %v8277_v50 = vpop.eup %8276  ;;  %8296 = vrcp.f32 %v5682_v51  ;;  %v6362_v51 = vld [vmem:[#allocation25 + $0x1] ss:$0 sm:$0xff] }
0x20bc   :  { %v8279_v45 = vpop.eup %8278  ;;  %8298 = vrcp.f32 %v5684_v7  ;;  %v5721_v44 = vmul.f32 %v8277_v50, %v9945_v55 }
0x20bd   :  { %v8281_v8 = vpop.eup %8280  ;;  %8300 = vpow2.f32 %v5665_v39  ;;  %v5723_v53 = vmul.f32 %v8279_v45, %v9948_v43 }
0x20be   :  { %v8283_v6 = vpop.eup %8282  ;;  %v5722_v35 = vmul.f32 %v8281_v8, %v9951_v14  ;;  %8302 = vpow2.f32 %v5669_v58 }
0x20bf   :  { %v8285_v5 = vpop.eup %8284  ;;  %v5724_v30 = vmul.f32 %v8283_v6, %v9954_v2  ;;  %8304 = vpow2.f32 %v5667_v17 }
0x20c0   :  { %v8287_v26 = vpop.eup %8286  ;;  %8306 = vpow2.f32 %v5671_v4  ;;  %5868 = vmatprep.mubr.f32.mxu1 %v5722_v35  ;;  %v5725_v40 = vmul.f32 %v8285_v5, %v9961_v31 }
0x20c1   :  { %v8289_v47 = vpop.eup %8288  ;;  %5953 = vmatprep.mubr.f32.mxu0 %v5724_v30  ;;  %5869 = vmatmul.mubr.f32.vlgmr.msra.gmra.mrb[76].mxu1 %v5721_v44  ;;  %v5727_v2 = vmul.f32 %v8287_v26, %v9964_v25 }
0x20c2   :  { %v8291_v18 = vpop.eup %8290  ;;  %v5726_v11 = vmul.f32 %v8289_v47, %v9967_v63  ;;  %5954 = vmatmul.mubr.f32.vlgmr.msra.gmra.mrb[68].mxu0 %v5723_v53 }
0x20c3   :  { %v8293_v14 = vpop.eup %8292  ;;  %v5728_v55 = vmul.f32 %v8291_v18, %v9970_v32 }
0x20c4   :  { %v8295_v59 = vpop.eup %8294  ;;  %5873 = vmatprep.mubr.f32.mxu1 %v5726_v11  ;;  %v5729_v63 = vmul.f32 %v8293_v14, %v9977_v3 }
0x20c5   :  { %v8297_v9 = vpop.eup %8296  ;;  %5958 = vmatprep.mubr.f32.mxu0 %v5728_v55  ;;  %5874 = vmatmul.mubr.f32.gmra.mrb[78].mxu1 %v5725_v40  ;;  %v5731_v31 = vmul.f32 %v8295_v59, %v9980_v36 }
0x20c6   :  { %v8299_v43 = vpop.eup %8298  ;;  %v5730_v28 = vmul.f32 %v8297_v9, %v9984_v37  ;;  %5959 = vmatmul.mubr.f32.gmra.mrb[70].mxu0 %v5727_v2 }
0x20c7   :  { %v8301_v56 = vpop.eup %8300  ;;  %v5732_v61 = vmul.f32 %v8299_v43, %v9987_v41 }
0x20c8   :  { %v8303_v34 = vpop.eup %8302  ;;  %v5685_v32 = vadd.f32 1.0, %v8301_v56  ;;  %5878 = vmatprep.mubr.f32.mxu1 %v5730_v28 }
0x20c9   :  { %v8305_v10 = vpop.eup %8304  ;;  %v5687_v25 = vadd.f32 1.0, %v8303_v34  ;;  %5963 = vmatprep.mubr.f32.mxu0 %v5732_v61  ;;  %5879 = vmatmul.mubr.f32.gmra.mrb[80].mxu1 %v5729_v63 }
0x20ca   :  { %v8307_v24 = vpop.eup %8306  ;;  %8308 = vrcp.f32 %v5685_v32  ;;  %v5686_v22 = vadd.f32 1.0, %v8305_v10  ;;  %5964 = vmatmul.mubr.f32.gmra.mrb[72].mxu0 %v5731_v31 }
0x20cb   :  { %8310 = vrcp.f32 %v5687_v25  ;;  %v5688_v37 = vadd.f32 1.0, %v8307_v24  ;;  %v6056_v25 = vstv %s6055_s10  ;;  %v6062_v24 = vstv %s6366_s8 }
0x20cc   :  { %8312 = vrcp.f32 %v5686_v22  ;;  %vm6057_vm7 = vcmp.eq.s32.totalorder %v9238_v57, %v6056_v25  ;;  %vm6063_vm8 = vcmp.eq.s32.totalorder %v9238_v57, %v6062_v24 }
0x20cd   :  { %8314 = vrcp.f32 %v5688_v37  ;;  %v6365_v37 = vsel %vm6057_vm7, 1.0, %v8782_v29 }
0x20d4   :  { %v8309_v3 = vpop.eup %8308 }
0x20d5   :  { %v8311_v38 = vpop.eup %8310  ;;  %v5733_v60 = vmul.f32 %v8309_v3, %v9993_v52  ;;  %v6367_v3 = vsel %vm6063_vm8, 1.0, %v8782_v29 }
0x20d6   :  { %v8313_v41 = vpop.eup %8312  ;;  %v5735_v13 = vmul.f32 %v8311_v38, %v9996_v42  ;;  %v6067_v38 = vsel %vm6066_vm9, %v6365_v37, %v6367_v3 }
0x20d7   :  { %v8315_v1 = vpop.eup %8314  ;;  %v5734_v36 = vmul.f32 %v8313_v41, %v9999_v23  ;;  %v6071_v41 = vrot.slane %v6067_v38, %v9185_v12 }
0x20d8   :  { %v5736_v19 = vmul.f32 %v8315_v1, %v10002_v20  ;;  %v6082_v1 = vrot.slane %v6067_v38, %v9192_v15 }
0x20d9   :  { %5883 = vmatprep.mubr.f32.mxu1 %v5734_v36 }
0x20da   :  { %5968 = vmatprep.mubr.f32.mxu0 %v5736_v19  ;;  %5884 = vmatmul.mubr.f32.gmra.mrb[82].mxu1 %v5733_v60 }
0x20db   :  { %5969 = vmatmul.mubr.f32.gmra.mrb[74].mxu0 %v5735_v13  ;;  %v6108_v13 = vld [vmem:[#allocation30] sm:$0xff]  ;;  %7177 = vmatprep.mubr.msk.f32.mxu1 %vm8786_vm10, %v8782_v29 }
0x2194   :  { %v6696_v62 = vpop.f32.mrb[76].mxu1 }
0x2195   :  { %v6740_v16 = vpop.f32.mrb[68].mxu0  ;;  %v6697_v49 = vpop.f32.mrb[77].mxu1 }
0x2196   :  { %v6698_v48 = vadd.f32 %v6697_v49, %v6696_v62  ;;  %v6741_v27 = vpop.f32.mrb[69].mxu0  ;;  %v6109_v62 = vld [vmem:[#allocation30 + $0x8] sm:$0xff]  ;;  %v8785_v49 = vmov 0.0|0.0  }
0x2197   :  { %v6742_v21 = vadd.f32 %v6741_v27, %v6740_v16  ;;  %v6110_v16 = vld [vmem:[#allocation30 + $0x10] sm:$0xff]  ;;  %7788 = vmatprep.subr.bf16.mxu1 %v8785_v49  ;;  %v7789_v12 = vpack.c.bf16 %v6109_v62, %v6108_v13  ;;  %v6112_v27 = vld [vmem:[#allocation30 + $0x20] sm:$0xff] }
0x2198   :  { %v6699_v39 = vpop.f32.mrb[78].mxu1 }
0x2199   :  { %v5956_v7 = vadd.f32 %v6742_v21, %v6698_v48  ;;  %v6743_v23 = vpop.f32.mrb[70].mxu0  ;;  %v6700_v58 = vpop.f32.mrb[79].mxu1  ;;  %v6111_v48 = vld [vmem:[#allocation30 + $0x18] sm:$0xff]  ;;  %7790 = vmatpush3.bf16.msra.mxu1 %v7789_v12  ;;  %v6113_v21 = vld [vmem:[#allocation30 + $0x28] sm:$0xff] }
0x219a   :  { %v6701_v52 = vadd.f32 %v6700_v58, %v6699_v39  ;;  %v6744_v50 = vpop.f32.mrb[71].mxu0  ;;  %v7792_v15 = vpack.c.bf16 %v6111_v48, %v6110_v16  ;;  %7791 = vmatprep.subr.bf16.mxu1 %v8785_v49  ;;  %v6114_v39 = vld [vmem:[#allocation30 + $0x30] sm:$0xff]  ;;  %v6116_v58 = vld [vmem:[#allocation30 + $0x40] sm:$0xff] }
0x219b   :  { %v5980_v20 = vadd.f32 %v6362_v51, %v5956_v7  ;;  %v6745_v17 = vadd.f32 %v6744_v50, %v6743_v23  ;;  %v6115_v7 = vld [vmem:[#allocation30 + $0x38] sm:$0xff] }
0x219c   :  { %v6702_v42 = vpop.f32.mrb[80].mxu1  ;;  %v7798_v23 = vpack.c.bf16 %v6115_v7, %v6114_v39 }
0x219d   :  { %v5961_v45 = vadd.f32 %v6745_v17, %v6701_v52  ;;  %v6746_v4 = vpop.f32.mrb[72].mxu0  ;;  %v6703_v8 = vpop.f32.mrb[81].mxu1  ;;  %v5984_v6 = vadd.f32 %v5980_v20, %v9889_v46  ;;  %7793 = vmatpush3.bf16.msra.mxu1 %v7792_v15  ;;  %v6117_v52 = vld [vmem:[#allocation30 + $0x48] sm:$0xff]  ;;  %v6118_v20 = vld [vmem:[#allocation30 + $0x50] sm:$0xff]  ;;  %v6119_v17 = vld [vmem:[#allocation30 + $0x58] sm:$0xff] }
0x219e   :  { %v6704_v35 = vadd.f32 %v6703_v8, %v6702_v42  ;;  %v6747_v5 = vpop.f32.mrb[73].mxu0  ;;  %7794 = vmatprep.subr.bf16.mxu1 %v8785_v49  ;;  %v7801_v50 = vpack.c.bf16 %v6117_v52, %v6116_v58  ;;  %v7804_v42 = vpack.c.bf16 %v6119_v17, %v6118_v20 }
0x219f   :  { %v5981_v44 = vadd.f32 %v6362_v51, %v5961_v45  ;;  %v6748_v30 = vadd.f32 %v6747_v5, %v6746_v4  ;;  %5990 = vadd.xlane.f32.xlu0 %v5984_v6  ;;  %v6120_v45 = vld [vmem:[#allocation30 + $0x60] sm:$0xff]  ;;  %v6121_v4 = vld [vmem:[#allocation30 + $0x68] sm:$0xff] }
0x21a0   :  { %v7807_v8 = vpack.c.bf16 %v6121_v4, %v6120_v45 }
0x21a1   :  { %v5966_v26 = vadd.f32 %v6748_v30, %v6704_v35  ;;  %v5985_v53 = vadd.f32 %v5981_v44, %v9886_v0  ;;  %v6123_v35 = vld [vmem:[#allocation30 + $0x78] sm:$0xff] }
0x21a3   :  { %v5982_v47 = vadd.f32 %v6362_v51, %v5966_v26  ;;  %5992 = vadd.xlane.f32.xlu1 %v5985_v53 }
0x21a5   :  { %v5986_v18 = vadd.f32 %v5982_v47, %v9894_v33 }
0x21a7   :  { %5994 = vadd.xlane.f32.xlu0 %v5986_v18 }
0x21ad   :  { %v6705_v11 = vpop.f32.mrb[82].mxu1 }
0x21ae   :  { %v6749_v14 = vpop.f32.mrb[74].mxu0  ;;  %v6706_v40 = vpop.f32.mrb[83].mxu1 }
0x21af   :  { %v6707_v55 = vadd.f32 %v6706_v40, %v6705_v11  ;;  %v6750_v59 = vpop.f32.mrb[75].mxu0 }
0x21b0   :  { %v6751_v2 = vadd.f32 %v6750_v59, %v6749_v14 }
0x21b2   :  { %v5971_v46 = vadd.f32 %v6751_v2, %v6707_v55 }
0x21b4   :  { %v5983_v9 = vadd.f32 %v6362_v51, %v5971_v46  ;;  %v7795_v51 = vpack.c.bf16 %v6113_v21, %v6112_v27 }
0x21b6   :  { %v5987_v43 = vadd.f32 %v5983_v9, %v9898_v54  ;;  %7796 = vmatpush3.bf16.msra.mxu1 %v7795_v51 }
0x21b7   :  { %7797 = vmatprep.subr.bf16.mxu1 %v8785_v49 }
0x21b8   :  { %5996 = vadd.xlane.f32.xlu1 %v5987_v43 }
0x21ba   :  { %7799 = vmatpush3.bf16.msra.mxu1 %v7798_v23 }
0x21bb   :  { %7800 = vmatprep.subr.bf16.mxu1 %v8785_v49 }
0x21be   :  { %7802 = vmatpush3.bf16.msra.mxu1 %v7801_v50 }
0x21bf   :  { %7803 = vmatprep.subr.bf16.mxu1 %v8785_v49 }
0x21c2   :  { %7805 = vmatpush3.bf16.msra.mxu1 %v7804_v42 }
0x21c3   :  { %7806 = vmatprep.subr.bf16.mxu1 %v8785_v49 }
0x21c6   :  { %7808 = vmatpush3.bf16.msra.mxu1 %v7807_v8 }
0x21c7   :  { %7809 = vmatprep.subr.bf16.mxu1 %v8785_v49 }
0x222c   :  { %v5991_v28 = vpop.xlane.xlu0 %5990 }
0x222d   :  { %v5998_v56 = vmul.f32 0.0078125, %v5991_v28 }
0x222f   :  { %v10028_v63 = vsub.f32 %v5984_v6, %v5998_v56  ;;  %v6122_v6 = vld [vmem:[#allocation30 + $0x70] sm:$0xff] }
0x2230   :  { %v5993_v0 = vpop.xlane.xlu1 %5992  ;;  %v7810_v5 = vpack.c.bf16 %v6123_v35, %v6122_v6 }
0x2231   :  { %v5999_v33 = vmul.f32 0.0078125, %v5993_v0  ;;  %v6006_v61 = vmul.f32 %v10028_v63, %v10028_v63 }
0x2232   :  { %7811 = vmatpush3.bf16.msra.mxu1 %v7810_v5 }
0x2233   :  { %v10032_v34 = vsub.f32 %v5985_v53, %v5999_v33  ;;  %6010 = vadd.xlane.f32.xlu0 %v6006_v61  ;;  %v6364_v61 = vld [vmem:[#allocation28] ss:$0 sm:$0xff] }
0x2234   :  { %v5995_v31 = vpop.xlane.xlu0 %5994 }
0x2235   :  { %v6000_v32 = vmul.f32 0.0078125, %v5995_v31  ;;  %v6007_v54 = vmul.f32 %v10032_v34, %v10032_v34 }
0x2237   :  { %v10036_v10 = vsub.f32 %v5986_v18, %v6000_v32  ;;  %6012 = vadd.xlane.f32.xlu1 %v6007_v54 }
0x2239   :  { %v6008_v22 = vmul.f32 %v10036_v10, %v10036_v10 }
0x223b   :  { %6014 = vadd.xlane.f32.xlu0 %v6008_v22 }
0x2245   :  { %v5997_v36 = vpop.xlane.xlu1 %5996 }
0x2246   :  { %v6001_v60 = vmul.f32 0.0078125, %v5997_v36 }
0x2248   :  { %6077 = vbcast.lane.b32.xlu1 %v6071_v41, 264  ;;  %v10046_v19 = vsub.f32 %v5987_v43, %v6001_v60  ;;  %v6363_v43 = vld [vmem:[#allocation27] ss:$0 sm:$0xff] }
0x224a   :  { %v6009_v57 = vmul.f32 %v10046_v19, %v10046_v19 }
0x224c   :  { %6084 = vbcast.lane.b32.xlu1 %v6082_v1, 256 }
0x2251   :  { %6073 = vbcast.lane.b32.xlu0 %v6071_v41, 256 }
0x2270   :  { %6016 = vadd.xlane.f32.xlu1 %v6009_v57 }
0x2281   :  { %6088 = vbcast.lane.b32.xlu1 %v6082_v1, 264 }
0x22c0   :  { %v6011_v30 = vpop.xlane.xlu0 %6010 }
0x22c1   :  { %v6018_v53 = vmul.f32 0.0078125, %v6011_v30 }
0x22c3   :  { %v6022_v18 = vadd.f32 1e-05, %v6018_v53 }
0x22c4   :  { %v6013_v44 = vpop.xlane.xlu1 %6012 }
0x22c5   :  { %v6019_v26 = vmul.f32 0.0078125, %v6013_v44 }
0x22c7   :  { %v6023_v47 = vadd.f32 1e-05, %v6019_v26 }
0x22c8   :  { %v6015_v29 = vpop.xlane.xlu0 %6014  ;;  %v6078_v14 = vpop.permute.xlu1 %6077 }
0x22c9   :  { %8316 = vrsqrt.f32 %v6023_v47  ;;  %v6020_v11 = vmul.f32 0.0078125, %v6015_v29 }
0x22ca   :  { %8318 = vrsqrt.f32 %v6022_v18 }
0x22cb   :  { %v6024_v55 = vadd.f32 1e-05, %v6020_v11 }
0x22cc   :  { %v6085_v46 = vpop.permute.xlu1 %6084  ;;  %v6074_v24 = vpop.permute.xlu0 %6073 }
0x22cd   :  { %8320 = vrsqrt.f32 %v6024_v55 }
0x22d3   :  { %v8317_v40 = vpop.eup %8316 }
0x22d4   :  { %v8319_v59 = vpop.eup %8318  ;;  %v6031_v2 = vmul.f32 %v8317_v40, %v10032_v34 }
0x22d5   :  { %v6030_v9 = vmul.f32 %v8319_v59, %v10028_v63 }
0x22d6   :  { %v6041_v28 = vmul.f32 %v6363_v43, %v6031_v2 }
0x22d7   :  { %v6040_v33 = vmul.f32 %v6363_v43, %v6030_v9  ;;  %v8321_v25 = vpop.eup %8320 }
0x22d8   :  { %v6051_v32 = vadd.f32 %v6364_v61, %v6041_v28  ;;  %v6032_v37 = vmul.f32 %v8321_v25, %v10036_v10 }
0x22d9   :  { %v6050_v54 = vadd.f32 %v6364_v61, %v6040_v33 }
0x22da   :  { %v6091_v22 = vmul.f32 %v6078_v14, %v6051_v32  ;;  %v6042_v38 = vmul.f32 %v6363_v43, %v6032_v37 }
0x22db   :  { %v6090_v34 = vmul.f32 %v6074_v24, %v6050_v54 }
0x22dc   :  { %v6052_v36 = vadd.f32 %v6364_v61, %v6042_v38 }
0x22dd   :  { %v6094_v3 = vadd.f32 %v6091_v22, %v6090_v34 }
0x22de   :  { %v6092_v16 = vmul.f32 %v6085_v46, %v6052_v36 }
0x22df   :  { %v6095_v63 = vrot.slane %v6094_v3, 4 }
0x22e1   :  { %v6096_v13 = vadd.f32 %v6095_v63, %v6094_v3 }
0x22e3   :  { %v6097_v12 = vrot.slane %v6096_v13, 2 }
0x22e5   :  { %v6098_v27 = vadd.f32 %v6097_v12, %v6096_v13 }
0x22e7   :  { %v6099_v51 = vrot.slane %v6098_v27, 1 }
0x22e9   :  { %v6100_v23 = vadd.f32 %v6099_v51, %v6098_v27 }
0x22fd   :  { %v6017_v56 = vpop.xlane.xlu1 %6016 }
0x22fe   :  { %v6021_v0 = vmul.f32 0.0078125, %v6017_v56 }
0x2300   :  { %v6025_v31 = vadd.f32 1e-05, %v6021_v0 }
0x2301   :  { %v6089_v57 = vpop.permute.xlu1 %6088 }
0x2302   :  { %8322 = vrsqrt.f32 %v6025_v31 }
0x230c   :  { %v8323_v41 = vpop.eup %8322 }
0x230d   :  { %v6033_v1 = vmul.f32 %v8323_v41, %v10046_v19 }
0x230f   :  { %v6043_v60 = vmul.f32 %v6363_v43, %v6033_v1 }
0x2311   :  { %v6053_v62 = vadd.f32 %v6364_v61, %v6043_v60 }
0x2313   :  { %v6093_v49 = vmul.f32 %v6089_v57, %v6053_v62 }
0x2315   :  { %v6101_v48 = vadd.f32 %v6093_v49, %v6092_v16 }
0x2317   :  { %v6102_v15 = vrot.slane %v6101_v48, 4 }
0x2319   :  { %v6103_v21 = vadd.f32 %v6102_v15, %v6101_v48 }
0x231b   :  { %v6104_v10 = vrot.slane %v6103_v21, 2 }
0x231d   :  { %v6105_v39 = vadd.f32 %v6104_v10, %v6103_v21 }
0x231f   :  { %v6106_v7 = vrot.slane %v6105_v39, 1 }
0x2321   :  { %v6107_v58 = vadd.f32 %v6106_v7, %v6105_v39 }
0x2323   :  { %v6127_v19 = vsel %vm6126_vm11, %v6107_v58, %v6100_v23 }
0x2324   :  { %7178 = vmatmul.mubr.f32.vlgmr.msra.gmra.mrb[84].mxu1 %v6127_v19 }
0x23f7   :  { %v6195_v52 = vpop.f32.mrb[84].mxu1 }
0x23f8   :  { %6199 = vst [vmem:[#allocation31] sm:$0x3] %v6195_v52  ;;  %v7179_v50 = vpop.f32.mrb[85].mxu1 }
0x23f9   :  { %8719 = shalt.err (!%p8716_p3)
}
0x23fa   :  { %s10108_s1 = sld [smem:[#allocation47_spill]] }
0x2400   :  { %s8720_s26 = scalar_lea.hbm %s10108_s1, 32 }
0x2401   :  { %p8721_p4 = scmp.ne.s32.totalorder %s10108_s1, %s8720_s26  ;;  %p8724_p5 = scmp.lt.u32.totalorder %s8720_s26, %s10108_s1 }
0x2403   :  { %p8726_p6 = pnand %p8724_p5, %p8721_p4 }
0x2405   :  { %8729 = shalt.err (!%p8726_p6)
}
0x2406   :  { %6209 = dma.vmem_to_hbm [thread:$0]  %s6207_s25, 32, %s10108_s1, [#allocation6]  }
0x2407   :  { %8750 = dma.done.wait [#allocation6], 32  }
0x2408   :  { %8751 = vsyncadd [#allocation6], 4294967264 }
0x2409   :  { %6213 = vsyncpa [#allocation5], 1 }
0x240a   :  { %6214 = vsyncpa [#allocation8], 1 }
0x240b   :  { %6215 = vsyncpa [#allocation11], 1 }
0x240c   :  { %6216 = vsyncpa [#allocation14], 1 }
0x240d   :  { %6217 = vsyncpa [#allocation17], 1 }
0x240e   :  { %6218 = vsyncpa [#allocation20], 1 }
0x240f   :  { %6219 = vsyncpa [#allocation23], 1 }
0x2410   :  { %6220 = vsyncpa [#allocation26], 1 }
0x2411   :  { %6221 = vsyncpa [#allocation29], 1 }
0x2412   :  { %6222 = vsyncpa [#allocation6], 1 }

</bundles_post_ra>
